<compile_context>
chip_gen: v7x
topology: tpu7x:2x2x1
jax: 0.10.0
libtpu: 0.0.40
codegen_flags: <defaults>
</compile_context>

<pallas_src>
import functools
import math

import jax
import jax.numpy as jnp
from jax.experimental import pallas as pl
from jax.experimental.pallas import tpu as pltpu


# ------------------------------ fused kernel --------------------------------
def _fused_kernel(x_ref,
                  w1fx_ref, w1fh_ref, b1f_ref,
                  w1bx_ref, w1bh_ref, b1b_ref,
                  wfc1f_ref, wfc1b_ref, bfc1_ref,
                  w2fx_ref, w2fh_ref, b2f_ref,
                  w2bx_ref, w2bh_ref, b2b_ref,
                  wfc2f_ref, wfc2b_ref, bfc2_ref,
                  w3_ref, b3_ref,
                  out_ref,
                  z_sc,
                  *, T, W):
    f32 = jnp.float32
    G1 = w1fh_ref.shape[0]       # D * H1 : grouped gate width of layer-1 bank
    G2 = w2fh_ref.shape[0]       # H3     : gate width of layer-2

    def cell(g_in, h, c, wh_ref, G):
        """One LSTM step for a whole bank.  g_in already holds x@Wx + b.
        Gate columns are grouped [i | f | o | g], each G wide."""
        g = g_in + jnp.dot(h, wh_ref[...], preferred_element_type=f32)
        sig = jax.nn.sigmoid(g[:, :3 * G])
        i_g = sig[:, 0 * G:1 * G]
        f_g = sig[:, 1 * G:2 * G]
        o_g = sig[:, 2 * G:3 * G]
        g_g = jnp.tanh(g[:, 3 * G:4 * G])
        c = f_g * c + i_g * g_g
        h = o_g * jnp.tanh(c)
        return h, c

    def bilstm(xg_f, xg_b, whf_ref, whb_ref, G):
        """Forward + backward recurrence over T steps (static, fully unrolled).
        xg_*: (T*W, 4G) precomputed input projections (+bias), time-major rows.
        Returns time-major (T*W, G) hidden outputs for each direction."""
        hf = jnp.zeros((W, G), f32)
        cf = jnp.zeros((W, G), f32)
        hb = jnp.zeros((W, G), f32)
        cb = jnp.zeros((W, G), f32)
        outs_f, outs_b = [], []
        for s in range(T):                       # == fori_loop(..., unroll=True)
            rf = s * W                           # forward reads time s
            rb = (T - 1 - s) * W                 # backward reads time T-1-s
            hf, cf = cell(xg_f[rf:rf + W, :], hf, cf, whf_ref, G)
            hb, cb = cell(xg_b[rb:rb + W, :], hb, cb, whb_ref, G)
            outs_f.append(hf)
            outs_b.append(hb)
        h_f = jnp.concatenate(outs_f, axis=0)          # already time-major
        h_b = jnp.concatenate(outs_b[::-1], axis=0)    # back to time-major
        return h_f, h_b

    x = x_ref[...]                                                  # (T*W, D*C)

    # ---- layer 1: D descriptor biLSTMs, block-diagonal over descriptors ----
    xg_f = jnp.dot(x, w1fx_ref[...], preferred_element_type=f32) + b1f_ref[...]
    xg_b = jnp.dot(x, w1bx_ref[...], preferred_element_type=f32) + b1b_ref[...]
    h1f, h1b = bilstm(xg_f, xg_b, w1fh_ref, w1bh_ref, G1)           # (T*W, D*H1)

    # ---- fc1 (block-diagonal over descriptors) -> concat_out ---------------
    y1 = (jnp.dot(h1f, wfc1f_ref[...], preferred_element_type=f32)
          + jnp.dot(h1b, wfc1b_ref[...], preferred_element_type=f32)
          + bfc1_ref[...])                                          # (T*W, D*H2)

    # ---- layer 2 biLSTM -----------------------------------------------------
    yg_f = jnp.dot(y1, w2fx_ref[...], preferred_element_type=f32) + b2f_ref[...]
    yg_b = jnp.dot(y1, w2bx_ref[...], preferred_element_type=f32) + b2b_ref[...]
    h2f, h2b = bilstm(yg_f, yg_b, w2fh_ref, w2bh_ref, G2)           # (T*W, H3)

    # ---- fc2 (dropout is identity in eval mode) -----------------------------
    z = (jnp.dot(h2f, wfc2f_ref[...], preferred_element_type=f32)
         + jnp.dot(h2b, wfc2b_ref[...], preferred_element_type=f32)
         + bfc2_ref[...])                                           # (T*W, H4)

    # ---- Flatten(1, 2) + fc3 epilogue ---------------------------------------
    # out[t, c] = sum_w z[t, w, :] @ w3[w]  with z rows stored (t-major, w-minor);
    # per-window rows are gathered with a sublane-strided read of the VMEM copy.
    z_sc[...] = z
    acc = jnp.zeros(out_ref.shape, f32) + b3_ref[...]
    for w in range(W):
        zw = z_sc[pl.ds(w, T, stride=W), :]                         # (T, H4)
        acc = acc + jnp.dot(zw, w3_ref[w], preferred_element_type=f32)
    out_ref[...] = acc.astype(out_ref.dtype)


def two_level_lstm_forward(x, packed):
    T, W, D, C = x.shape
    x2d = x.reshape(T * W, D * C)                   # contiguous, free reshape
    H4 = packed["wfc2f"].shape[1]
    NC = packed["b3"].shape[1]
    kernel = functools.partial(_fused_kernel, T=T, W=W)
    return pl.pallas_call(
        kernel,
        out_shape=jax.ShapeDtypeStruct((T, NC), x.dtype),
        scratch_shapes=[pltpu.VMEM((T * W, H4), jnp.float32)],
    )(x2d,
      packed["w1fx"], packed["w1fh"], packed["b1f"],
      packed["w1bx"], packed["w1bh"], packed["b1b"],
      packed["wfc1f"], packed["wfc1b"], packed["bfc1"],
      packed["w2fx"], packed["w2fh"], packed["b2f"],
      packed["w2bx"], packed["w2bh"], packed["b2b"],
      packed["wfc2f"], packed["wfc2b"], packed["bfc2"],
      packed["w3"], packed["b3"])


# --------------------------- weight packing ----------------------------------
_GATE_SRC = (0, 1, 3, 2)   # target gate order [i, f, o, g] from PyTorch [i, f, g, o]


def _pack_lstm_bank(bank):
    """Pack per-descriptor LSTM weights (one direction, PyTorch layout) into
    block-diagonal Wx (D*In, 4*D*H), Wh (D*H, 4*D*H) and bias (1, 4*D*H) with
    gate columns grouped [i | f | o | g] across descriptors."""
    D = len(bank)
    In = bank[0]["w_ih"].shape[1]
    H = bank[0]["w_hh"].shape[1]
    G = D * H
    Wx = jnp.zeros((D * In, 4 * G), jnp.float32)
    Wh = jnp.zeros((D * H, 4 * G), jnp.float32)
    b = jnp.zeros((1, 4 * G), jnp.float32)
    for d, p in enumerate(bank):
        wi = p["w_ih"].T            # (In, 4H) cols [i|f|g|o]
        wh = p["w_hh"].T            # (H, 4H)
        bb = p["b_ih"] + p["b_hh"]
        for s, g in enumerate(_GATE_SRC):
            col = s * G + d * H
            Wx = Wx.at[d * In:(d + 1) * In, col:col + H].set(wi[:, g * H:(g + 1) * H])
            Wh = Wh.at[d * H:(d + 1) * H, col:col + H].set(wh[:, g * H:(g + 1) * H])
            b = b.at[0, col:col + H].set(bb[g * H:(g + 1) * H])
    return Wx, Wh, b


def _pack_fc_bank(fcs, h_in, h_out):
    """Block-diagonal pack of per-descriptor Linear(2*h_in, h_out) layers,
    split into forward-half / backward-half input weights."""
    D = len(fcs)
    Wf = jnp.zeros((D * h_in, D * h_out), jnp.float32)
    Wb = jnp.zeros((D * h_in, D * h_out), jnp.float32)
    b = jnp.zeros((1, D * h_out), jnp.float32)
    for d, p in enumerate(fcs):
        wt = p["w"].T               # (2*h_in, h_out)
        Wf = Wf.at[d * h_in:(d + 1) * h_in, d * h_out:(d + 1) * h_out].set(wt[:h_in])
        Wb = Wb.at[d * h_in:(d + 1) * h_in, d * h_out:(d + 1) * h_out].set(wt[h_in:])
        b = b.at[0, d * h_out:(d + 1) * h_out].set(p["b"])
    return Wf, Wb, b


def pack_params(params, *, W):
    L1 = params["layer1"]
    H1 = L1[0]["fwd"]["w_hh"].shape[1]
    H2 = params["fc1"][0]["w"].shape[0]
    H3 = params["layer2"]["fwd"]["w_hh"].shape[1]
    H4 = params["fc2"]["w"].shape[0]

    w1fx, w1fh, b1f = _pack_lstm_bank([p["fwd"] for p in L1])
    w1bx, w1bh, b1b = _pack_lstm_bank([p["bwd"] for p in L1])
    wfc1f, wfc1b, bfc1 = _pack_fc_bank(params["fc1"], H1, H2)
    w2fx, w2fh, b2f = _pack_lstm_bank([params["layer2"]["fwd"]])
    w2bx, w2bh, b2b = _pack_lstm_bank([params["layer2"]["bwd"]])
    wt2 = params["fc2"]["w"].T                       # (2*H3, H4)
    wt3 = params["fc3"]["w"].T                       # (W*H4, NC)
    return dict(
        w1fx=w1fx, w1fh=w1fh, b1f=b1f, w1bx=w1bx, w1bh=w1bh, b1b=b1b,
        wfc1f=wfc1f, wfc1b=wfc1b, bfc1=bfc1,
        w2fx=w2fx, w2fh=w2fh, b2f=b2f, w2bx=w2bx, w2bh=w2bh, b2b=b2b,
        wfc2f=wt2[:H3], wfc2b=wt2[H3:], bfc2=params["fc2"]["b"][None, :],
        w3=wt3.reshape(W, H4, wt3.shape[1]), b3=params["fc3"]["b"][None, :],
    )


# --------------------------- parameter init ----------------------------------
def init_params(key, C, D, W, num_classes, H1, H2, H3, H4):
    keys = iter(jax.random.split(key, 128))

    def uni(shape, k):
        return jax.random.uniform(next(keys), shape, jnp.float32, -k, k)

    def lstm_dir(in_dim, H):
        k = 1.0 / math.sqrt(H)
        return dict(w_ih=uni((4 * H, in_dim), k), w_hh=uni((4 * H, H), k),
                    b_ih=uni((4 * H,), k), b_hh=uni((4 * H,), k))

    def bilstm_p(in_dim, H):
        return dict(fwd=lstm_dir(in_dim, H), bwd=lstm_dir(in_dim, H))

    def linear_p(in_dim, out_dim):
        k = 1.0 / math.sqrt(in_dim)
        return dict(w=uni((out_dim, in_dim), k), b=uni((out_dim,), k))

    return dict(
        layer1=[bilstm_p(C, H1) for _ in range(D)],
        fc1=[linear_p(2 * H1, H2) for _ in range(D)],
        layer2=bilstm_p(D * H2, H3),
        fc2=linear_p(2 * H3, H4),
        fc3=linear_p(H4 * W, num_classes),
    )


# --------------------------- pure-JAX reference -------------------------------
def _lstm_dir_ref(x, p, reverse=False):
    N = x.shape[1]
    H = p["w_hh"].shape[1]
    if reverse:
        x = x[::-1]

    def step(carry, xt):
        h, c = carry
        g = xt @ p["w_ih"].T + h @ p["w_hh"].T + p["b_ih"] + p["b_hh"]
        i = jax.nn.sigmoid(g[:, :H])
        f = jax.nn.sigmoid(g[:, H:2 * H])
        gg = jnp.tanh(g[:, 2 * H:3 * H])
        o = jax.nn.sigmoid(g[:, 3 * H:])
        c = f * c + i * gg
        h = o * jnp.tanh(c)
        return (h, c), h

    init = (jnp.zeros((N, H), jnp.float32), jnp.zeros((N, H), jnp.float32))
    _, hs = jax.lax.scan(step, init, x)
    return hs[::-1] if reverse else hs


def _bilstm_ref(x, p):
    return jnp.concatenate([_lstm_dir_ref(x, p["fwd"]),
                            _lstm_dir_ref(x, p["bwd"], reverse=True)], axis=-1)


def two_level_lstm_reference(x, params):
    T, W, D, C = x.shape
    outs = []
    for i in range(D):
        t = _bilstm_ref(x[:, :, i, :], params["layer1"][i])
        t = t @ params["fc1"][i]["w"].T + params["fc1"][i]["b"]
        outs.append(t)
    cat = jnp.concatenate(outs, axis=2)
    y = _bilstm_ref(cat, params["layer2"])
    y = y @ params["fc2"]["w"].T + params["fc2"]["b"]
    y = y.reshape(T, W * y.shape[-1])            # Flatten(1,2); dropout = eval identity
    return y @ params["fc3"]["w"].T + params["fc3"]["b"]


# ----------------------------------- main -------------------------------------
if __name__ == "__main__":
    T = 2            # dim0 of x (nn.LSTM time axis)
    W = 8            # num_windows (LSTM batch axis)
    D = 5            # num_descriptors
    C = 4            # num_columns
    NUM_CLASSES = 3
    H1, H2, H3, H4 = 32, 16, 32, 16

    key = jax.random.PRNGKey(0)
    kx, kp = jax.random.split(key)
    x = jax.random.normal(kx, (T, W, D, C), jnp.float32)
    params = init_params(kp, C, D, W, NUM_CLASSES, H1, H2, H3, H4)
    packed = pack_params(params, W=W)

    fwd = jax.jit(two_level_lstm_forward)
    out = fwd(x, packed)
    jax.block_until_ready(out)
    assert out.shape == (T, NUM_CLASSES), out.shape
    assert bool(jnp.all(jnp.isfinite(out)))

    ref = two_level_lstm_reference(x, params)
    err = float(jnp.max(jnp.abs(out - ref)))
    assert err < 2e-3, f"max abs err vs reference: {err}"
    print("KERNEL_OK")
</pallas_src>

<mosaic_0001>
module attributes {stable_mosaic.version = 11 : i64} {
  func.func @_fused_kernel(%arg0: memref<16x20xf32, #tpu.memory_space<vmem>>, %arg1: memref<20x640xf32, #tpu.memory_space<vmem>>, %arg2: memref<160x640xf32, #tpu.memory_space<vmem>>, %arg3: memref<1x640xf32, #tpu.memory_space<vmem>>, %arg4: memref<20x640xf32, #tpu.memory_space<vmem>>, %arg5: memref<160x640xf32, #tpu.memory_space<vmem>>, %arg6: memref<1x640xf32, #tpu.memory_space<vmem>>, %arg7: memref<160x80xf32, #tpu.memory_space<vmem>>, %arg8: memref<160x80xf32, #tpu.memory_space<vmem>>, %arg9: memref<1x80xf32, #tpu.memory_space<vmem>>, %arg10: memref<80x128xf32, #tpu.memory_space<vmem>>, %arg11: memref<32x128xf32, #tpu.memory_space<vmem>>, %arg12: memref<1x128xf32, #tpu.memory_space<vmem>>, %arg13: memref<80x128xf32, #tpu.memory_space<vmem>>, %arg14: memref<32x128xf32, #tpu.memory_space<vmem>>, %arg15: memref<1x128xf32, #tpu.memory_space<vmem>>, %arg16: memref<32x16xf32, #tpu.memory_space<vmem>>, %arg17: memref<32x16xf32, #tpu.memory_space<vmem>>, %arg18: memref<1x16xf32, #tpu.memory_space<vmem>>, %arg19: memref<8x16x3xf32, #tpu.memory_space<vmem>>, %arg20: memref<1x3xf32, #tpu.memory_space<vmem>>, %arg21: memref<2x3xf32, #tpu.memory_space<vmem>>, %arg22: memref<16x16xf32, #tpu.memory_space<vmem>>) attributes {dimension_semantics = [], scalar_prefetch = 0 : i64, scratch_operands = 1 : i64, tpu.core_type = #tpu.core_type<tc>} {
    %c0 = arith.constant 0 : index
    %c0_0 = arith.constant 0 : index
    %0 = vector.load %arg0[%c0, %c0_0] : memref<16x20xf32, #tpu.memory_space<vmem>>, vector<16x20xf32>
    %c0_1 = arith.constant 0 : index
    %c0_2 = arith.constant 0 : index
    %1 = vector.load %arg1[%c0_1, %c0_2] : memref<20x640xf32, #tpu.memory_space<vmem>>, vector<20x640xf32>
    %cst = arith.constant dense<0.000000e+00> : vector<16x640xf32>
    %2 = tpu.matmul %0, %1, %cst {dimension_numbers = #tpu.dot_dimension_numbers<[1], [0], [0], [1], [0, 0, 1, 1], [], []>} : vector<16x20xf32>, vector<20x640xf32>, vector<16x640xf32> -> vector<16x640xf32>
    %c0_3 = arith.constant 0 : index
    %c0_4 = arith.constant 0 : index
    %3 = vector.load %arg3[%c0_3, %c0_4] : memref<1x640xf32, #tpu.memory_space<vmem>>, vector<1x640xf32>
    %4 = vector.broadcast %3 : vector<1x640xf32> to vector<16x640xf32>
    %5 = arith.addf %2, %4 : vector<16x640xf32>
    %c0_5 = arith.constant 0 : index
    %c0_6 = arith.constant 0 : index
    %6 = vector.load %arg4[%c0_5, %c0_6] : memref<20x640xf32, #tpu.memory_space<vmem>>, vector<20x640xf32>
    %cst_7 = arith.constant dense<0.000000e+00> : vector<16x640xf32>
    %7 = tpu.matmul %0, %6, %cst_7 {dimension_numbers = #tpu.dot_dimension_numbers<[1], [0], [0], [1], [0, 0, 1, 1], [], []>} : vector<16x20xf32>, vector<20x640xf32>, vector<16x640xf32> -> vector<16x640xf32>
    %c0_8 = arith.constant 0 : index
    %c0_9 = arith.constant 0 : index
    %8 = vector.load %arg6[%c0_8, %c0_9] : memref<1x640xf32, #tpu.memory_space<vmem>>, vector<1x640xf32>
    %9 = vector.broadcast %8 : vector<1x640xf32> to vector<16x640xf32>
    %10 = arith.addf %7, %9 : vector<16x640xf32>
    %cst_10 = arith.constant 0.000000e+00 : f32
    %11 = vector.broadcast %cst_10 : f32 to vector<8x160xf32>
    %cst_11 = arith.constant 0.000000e+00 : f32
    %12 = vector.broadcast %cst_11 : f32 to vector<8x160xf32>
    %cst_12 = arith.constant 0.000000e+00 : f32
    %13 = vector.broadcast %cst_12 : f32 to vector<8x160xf32>
    %cst_13 = arith.constant 0.000000e+00 : f32
    %14 = vector.broadcast %cst_13 : f32 to vector<8x160xf32>
    %15 = vector.extract_strided_slice %5 {offsets = [0, 0], sizes = [8, 640], strides = [1, 1]} : vector<16x640xf32> to vector<8x640xf32>
    %c0_14 = arith.constant 0 : index
    %c0_15 = arith.constant 0 : index
    %16 = vector.load %arg2[%c0_14, %c0_15] : memref<160x640xf32, #tpu.memory_space<vmem>>, vector<160x640xf32>
    %cst_16 = arith.constant dense<0.000000e+00> : vector<8x640xf32>
    %17 = tpu.matmul %11, %16, %cst_16 {dimension_numbers = #tpu.dot_dimension_numbers<[1], [0], [0], [1], [0, 0, 1, 1], [], []>} : vector<8x160xf32>, vector<160x640xf32>, vector<8x640xf32> -> vector<8x640xf32>
    %18 = arith.addf %15, %17 : vector<8x640xf32>
    %19 = vector.extract_strided_slice %18 {offsets = [0, 0], sizes = [8, 480], strides = [1, 1]} : vector<8x640xf32> to vector<8x480xf32>
    %20 = arith.negf %19 : vector<8x480xf32>
    %21 = math.exp %20 : vector<8x480xf32>
    %cst_17 = arith.constant 1.000000e+00 : f32
    %22 = vector.broadcast %cst_17 : f32 to vector<8x480xf32>
    %23 = arith.addf %22, %21 : vector<8x480xf32>
    %24 = arith.divf %22, %23 : vector<8x480xf32>
    %25 = vector.extract_strided_slice %24 {offsets = [0, 0], sizes = [8, 160], strides = [1, 1]} : vector<8x480xf32> to vector<8x160xf32>
    %26 = vector.extract_strided_slice %24 {offsets = [0, 160], sizes = [8, 160], strides = [1, 1]} : vector<8x480xf32> to vector<8x160xf32>
    %27 = vector.extract_strided_slice %24 {offsets = [0, 320], sizes = [8, 160], strides = [1, 1]} : vector<8x480xf32> to vector<8x160xf32>
    %28 = vector.extract_strided_slice %18 {offsets = [0, 480], sizes = [8, 160], strides = [1, 1]} : vector<8x640xf32> to vector<8x160xf32>
    %29 = math.tanh %28 : vector<8x160xf32>
    %30 = arith.mulf %26, %12 : vector<8x160xf32>
    %31 = arith.mulf %25, %29 : vector<8x160xf32>
    %32 = arith.addf %30, %31 : vector<8x160xf32>
    %33 = math.tanh %32 : vector<8x160xf32>
    %34 = arith.mulf %27, %33 : vector<8x160xf32>
    %35 = vector.extract_strided_slice %10 {offsets = [8, 0], sizes = [8, 640], strides = [1, 1]} : vector<16x640xf32> to vector<8x640xf32>
    %c0_18 = arith.constant 0 : index
    %c0_19 = arith.constant 0 : index
    %36 = vector.load %arg5[%c0_18, %c0_19] : memref<160x640xf32, #tpu.memory_space<vmem>>, vector<160x640xf32>
    %cst_20 = arith.constant dense<0.000000e+00> : vector<8x640xf32>
    %37 = tpu.matmul %13, %36, %cst_20 {dimension_numbers = #tpu.dot_dimension_numbers<[1], [0], [0], [1], [0, 0, 1, 1], [], []>} : vector<8x160xf32>, vector<160x640xf32>, vector<8x640xf32> -> vector<8x640xf32>
    %38 = arith.addf %35, %37 : vector<8x640xf32>
    %39 = vector.extract_strided_slice %38 {offsets = [0, 0], sizes = [8, 480], strides = [1, 1]} : vector<8x640xf32> to vector<8x480xf32>
    %40 = arith.negf %39 : vector<8x480xf32>
    %41 = math.exp %40 : vector<8x480xf32>
    %cst_21 = arith.constant 1.000000e+00 : f32
    %42 = vector.broadcast %cst_21 : f32 to vector<8x480xf32>
    %43 = arith.addf %42, %41 : vector<8x480xf32>
    %44 = arith.divf %42, %43 : vector<8x480xf32>
    %45 = vector.extract_strided_slice %44 {offsets = [0, 0], sizes = [8, 160], strides = [1, 1]} : vector<8x480xf32> to vector<8x160xf32>
    %46 = vector.extract_strided_slice %44 {offsets = [0, 160], sizes = [8, 160], strides = [1, 1]} : vector<8x480xf32> to vector<8x160xf32>
    %47 = vector.extract_strided_slice %44 {offsets = [0, 320], sizes = [8, 160], strides = [1, 1]} : vector<8x480xf32> to vector<8x160xf32>
    %48 = vector.extract_strided_slice %38 {offsets = [0, 480], sizes = [8, 160], strides = [1, 1]} : vector<8x640xf32> to vector<8x160xf32>
    %49 = math.tanh %48 : vector<8x160xf32>
    %50 = arith.mulf %46, %14 : vector<8x160xf32>
    %51 = arith.mulf %45, %49 : vector<8x160xf32>
    %52 = arith.addf %50, %51 : vector<8x160xf32>
    %53 = math.tanh %52 : vector<8x160xf32>
    %54 = arith.mulf %47, %53 : vector<8x160xf32>
    %55 = vector.extract_strided_slice %5 {offsets = [8, 0], sizes = [8, 640], strides = [1, 1]} : vector<16x640xf32> to vector<8x640xf32>
    %c0_22 = arith.constant 0 : index
    %c0_23 = arith.constant 0 : index
    %56 = vector.load %arg2[%c0_22, %c0_23] : memref<160x640xf32, #tpu.memory_space<vmem>>, vector<160x640xf32>
    %cst_24 = arith.constant dense<0.000000e+00> : vector<8x640xf32>
    %57 = tpu.matmul %34, %56, %cst_24 {dimension_numbers = #tpu.dot_dimension_numbers<[1], [0], [0], [1], [0, 0, 1, 1], [], []>} : vector<8x160xf32>, vector<160x640xf32>, vector<8x640xf32> -> vector<8x640xf32>
    %58 = arith.addf %55, %57 : vector<8x640xf32>
    %59 = vector.extract_strided_slice %58 {offsets = [0, 0], sizes = [8, 480], strides = [1, 1]} : vector<8x640xf32> to vector<8x480xf32>
    %60 = arith.negf %59 : vector<8x480xf32>
    %61 = math.exp %60 : vector<8x480xf32>
    %cst_25 = arith.constant 1.000000e+00 : f32
    %62 = vector.broadcast %cst_25 : f32 to vector<8x480xf32>
    %63 = arith.addf %62, %61 : vector<8x480xf32>
    %64 = arith.divf %62, %63 : vector<8x480xf32>
    %65 = vector.extract_strided_slice %64 {offsets = [0, 0], sizes = [8, 160], strides = [1, 1]} : vector<8x480xf32> to vector<8x160xf32>
    %66 = vector.extract_strided_slice %64 {offsets = [0, 160], sizes = [8, 160], strides = [1, 1]} : vector<8x480xf32> to vector<8x160xf32>
    %67 = vector.extract_strided_slice %64 {offsets = [0, 320], sizes = [8, 160], strides = [1, 1]} : vector<8x480xf32> to vector<8x160xf32>
    %68 = vector.extract_strided_slice %58 {offsets = [0, 480], sizes = [8, 160], strides = [1, 1]} : vector<8x640xf32> to vector<8x160xf32>
    %69 = math.tanh %68 : vector<8x160xf32>
    %70 = arith.mulf %66, %32 : vector<8x160xf32>
    %71 = arith.mulf %65, %69 : vector<8x160xf32>
    %72 = arith.addf %70, %71 : vector<8x160xf32>
    %73 = math.tanh %72 : vector<8x160xf32>
    %74 = arith.mulf %67, %73 : vector<8x160xf32>
    %75 = vector.extract_strided_slice %10 {offsets = [0, 0], sizes = [8, 640], strides = [1, 1]} : vector<16x640xf32> to vector<8x640xf32>
    %c0_26 = arith.constant 0 : index
    %c0_27 = arith.constant 0 : index
    %76 = vector.load %arg5[%c0_26, %c0_27] : memref<160x640xf32, #tpu.memory_space<vmem>>, vector<160x640xf32>
    %cst_28 = arith.constant dense<0.000000e+00> : vector<8x640xf32>
    %77 = tpu.matmul %54, %76, %cst_28 {dimension_numbers = #tpu.dot_dimension_numbers<[1], [0], [0], [1], [0, 0, 1, 1], [], []>} : vector<8x160xf32>, vector<160x640xf32>, vector<8x640xf32> -> vector<8x640xf32>
    %78 = arith.addf %75, %77 : vector<8x640xf32>
    %79 = vector.extract_strided_slice %78 {offsets = [0, 0], sizes = [8, 480], strides = [1, 1]} : vector<8x640xf32> to vector<8x480xf32>
    %80 = arith.negf %79 : vector<8x480xf32>
    %81 = math.exp %80 : vector<8x480xf32>
    %cst_29 = arith.constant 1.000000e+00 : f32
    %82 = vector.broadcast %cst_29 : f32 to vector<8x480xf32>
    %83 = arith.addf %82, %81 : vector<8x480xf32>
    %84 = arith.divf %82, %83 : vector<8x480xf32>
    %85 = vector.extract_strided_slice %84 {offsets = [0, 0], sizes = [8, 160], strides = [1, 1]} : vector<8x480xf32> to vector<8x160xf32>
    %86 = vector.extract_strided_slice %84 {offsets = [0, 160], sizes = [8, 160], strides = [1, 1]} : vector<8x480xf32> to vector<8x160xf32>
    %87 = vector.extract_strided_slice %84 {offsets = [0, 320], sizes = [8, 160], strides = [1, 1]} : vector<8x480xf32> to vector<8x160xf32>
    %88 = vector.extract_strided_slice %78 {offsets = [0, 480], sizes = [8, 160], strides = [1, 1]} : vector<8x640xf32> to vector<8x160xf32>
    %89 = math.tanh %88 : vector<8x160xf32>
    %90 = arith.mulf %86, %52 : vector<8x160xf32>
    %91 = arith.mulf %85, %89 : vector<8x160xf32>
    %92 = arith.addf %90, %91 : vector<8x160xf32>
    %93 = math.tanh %92 : vector<8x160xf32>
    %94 = arith.mulf %87, %93 : vector<8x160xf32>
    %95 = tpu.concatenate %34, %74 in 0 : vector<8x160xf32>, vector<8x160xf32> -> vector<16x160xf32>
    %96 = tpu.concatenate %94, %54 in 0 : vector<8x160xf32>, vector<8x160xf32> -> vector<16x160xf32>
    %c0_30 = arith.constant 0 : index
    %c0_31 = arith.constant 0 : index
    %97 = vector.load %arg7[%c0_30, %c0_31] : memref<160x80xf32, #tpu.memory_space<vmem>>, vector<160x80xf32>
    %cst_32 = arith.constant dense<0.000000e+00> : vector<16x80xf32>
    %98 = tpu.matmul %95, %97, %cst_32 {dimension_numbers = #tpu.dot_dimension_numbers<[1], [0], [0], [1], [0, 0, 1, 1], [], []>} : vector<16x160xf32>, vector<160x80xf32>, vector<16x80xf32> -> vector<16x80xf32>
    %c0_33 = arith.constant 0 : index
    %c0_34 = arith.constant 0 : index
    %99 = vector.load %arg8[%c0_33, %c0_34] : memref<160x80xf32, #tpu.memory_space<vmem>>, vector<160x80xf32>
    %cst_35 = arith.constant dense<0.000000e+00> : vector<16x80xf32>
    %100 = tpu.matmul %96, %99, %cst_35 {dimension_numbers = #tpu.dot_dimension_numbers<[1], [0], [0], [1], [0, 0, 1, 1], [], []>} : vector<16x160xf32>, vector<160x80xf32>, vector<16x80xf32> -> vector<16x80xf32>
    %101 = arith.addf %98, %100 : vector<16x80xf32>
    %c0_36 = arith.constant 0 : index
    %c0_37 = arith.constant 0 : index
    %102 = vector.load %arg9[%c0_36, %c0_37] : memref<1x80xf32, #tpu.memory_space<vmem>>, vector<1x80xf32>
    %103 = vector.broadcast %102 : vector<1x80xf32> to vector<16x80xf32>
    %104 = arith.addf %101, %103 : vector<16x80xf32>
    %c0_38 = arith.constant 0 : index
    %c0_39 = arith.constant 0 : index
    %105 = vector.load %arg10[%c0_38, %c0_39] : memref<80x128xf32, #tpu.memory_space<vmem>>, vector<80x128xf32>
    %cst_40 = arith.constant dense<0.000000e+00> : vector<16x128xf32>
    %106 = tpu.matmul %104, %105, %cst_40 {dimension_numbers = #tpu.dot_dimension_numbers<[1], [0], [0], [1], [0, 0, 1, 1], [], []>} : vector<16x80xf32>, vector<80x128xf32>, vector<16x128xf32> -> vector<16x128xf32>
    %c0_41 = arith.constant 0 : index
    %c0_42 = arith.constant 0 : index
    %107 = vector.load %arg12[%c0_41, %c0_42] : memref<1x128xf32, #tpu.memory_space<vmem>>, vector<1x128xf32>
    %108 = vector.broadcast %107 : vector<1x128xf32> to vector<16x128xf32>
    %109 = arith.addf %106, %108 : vector<16x128xf32>
    %c0_43 = arith.constant 0 : index
    %c0_44 = arith.constant 0 : index
    %110 = vector.load %arg13[%c0_43, %c0_44] : memref<80x128xf32, #tpu.memory_space<vmem>>, vector<80x128xf32>
    %cst_45 = arith.constant dense<0.000000e+00> : vector<16x128xf32>
    %111 = tpu.matmul %104, %110, %cst_45 {dimension_numbers = #tpu.dot_dimension_numbers<[1], [0], [0], [1], [0, 0, 1, 1], [], []>} : vector<16x80xf32>, vector<80x128xf32>, vector<16x128xf32> -> vector<16x128xf32>
    %c0_46 = arith.constant 0 : index
    %c0_47 = arith.constant 0 : index
    %112 = vector.load %arg15[%c0_46, %c0_47] : memref<1x128xf32, #tpu.memory_space<vmem>>, vector<1x128xf32>
    %113 = vector.broadcast %112 : vector<1x128xf32> to vector<16x128xf32>
    %114 = arith.addf %111, %113 : vector<16x128xf32>
    %cst_48 = arith.constant 0.000000e+00 : f32
    %115 = vector.broadcast %cst_48 : f32 to vector<8x32xf32>
    %cst_49 = arith.constant 0.000000e+00 : f32
    %116 = vector.broadcast %cst_49 : f32 to vector<8x32xf32>
    %cst_50 = arith.constant 0.000000e+00 : f32
    %117 = vector.broadcast %cst_50 : f32 to vector<8x32xf32>
    %cst_51 = arith.constant 0.000000e+00 : f32
    %118 = vector.broadcast %cst_51 : f32 to vector<8x32xf32>
    %119 = vector.extract_strided_slice %109 {offsets = [0, 0], sizes = [8, 128], strides = [1, 1]} : vector<16x128xf32> to vector<8x128xf32>
    %c0_52 = arith.constant 0 : index
    %c0_53 = arith.constant 0 : index
    %120 = vector.load %arg11[%c0_52, %c0_53] : memref<32x128xf32, #tpu.memory_space<vmem>>, vector<32x128xf32>
    %cst_54 = arith.constant dense<0.000000e+00> : vector<8x128xf32>
    %121 = tpu.matmul %115, %120, %cst_54 {dimension_numbers = #tpu.dot_dimension_numbers<[1], [0], [0], [1], [0, 0, 1, 1], [], []>} : vector<8x32xf32>, vector<32x128xf32>, vector<8x128xf32> -> vector<8x128xf32>
    %122 = arith.addf %119, %121 : vector<8x128xf32>
    %123 = vector.extract_strided_slice %122 {offsets = [0, 0], sizes = [8, 96], strides = [1, 1]} : vector<8x128xf32> to vector<8x96xf32>
    %124 = arith.negf %123 : vector<8x96xf32>
    %125 = math.exp %124 : vector<8x96xf32>
    %cst_55 = arith.constant 1.000000e+00 : f32
    %126 = vector.broadcast %cst_55 : f32 to vector<8x96xf32>
    %127 = arith.addf %126, %125 : vector<8x96xf32>
    %128 = arith.divf %126, %127 : vector<8x96xf32>
    %129 = vector.extract_strided_slice %128 {offsets = [0, 0], sizes = [8, 32], strides = [1, 1]} : vector<8x96xf32> to vector<8x32xf32>
    %130 = vector.extract_strided_slice %128 {offsets = [0, 32], sizes = [8, 32], strides = [1, 1]} : vector<8x96xf32> to vector<8x32xf32>
    %131 = vector.extract_strided_slice %128 {offsets = [0, 64], sizes = [8, 32], strides = [1, 1]} : vector<8x96xf32> to vector<8x32xf32>
    %132 = vector.extract_strided_slice %122 {offsets = [0, 96], sizes = [8, 32], strides = [1, 1]} : vector<8x128xf32> to vector<8x32xf32>
    %133 = math.tanh %132 : vector<8x32xf32>
    %134 = arith.mulf %130, %116 : vector<8x32xf32>
    %135 = arith.mulf %129, %133 : vector<8x32xf32>
    %136 = arith.addf %134, %135 : vector<8x32xf32>
    %137 = math.tanh %136 : vector<8x32xf32>
    %138 = arith.mulf %131, %137 : vector<8x32xf32>
    %139 = vector.extract_strided_slice %114 {offsets = [8, 0], sizes = [8, 128], strides = [1, 1]} : vector<16x128xf32> to vector<8x128xf32>
    %c0_56 = arith.constant 0 : index
    %c0_57 = arith.constant 0 : index
    %140 = vector.load %arg14[%c0_56, %c0_57] : memref<32x128xf32, #tpu.memory_space<vmem>>, vector<32x128xf32>
    %cst_58 = arith.constant dense<0.000000e+00> : vector<8x128xf32>
    %141 = tpu.matmul %117, %140, %cst_58 {dimension_numbers = #tpu.dot_dimension_numbers<[1], [0], [0], [1], [0, 0, 1, 1], [], []>} : vector<8x32xf32>, vector<32x128xf32>, vector<8x128xf32> -> vector<8x128xf32>
    %142 = arith.addf %139, %141 : vector<8x128xf32>
    %143 = vector.extract_strided_slice %142 {offsets = [0, 0], sizes = [8, 96], strides = [1, 1]} : vector<8x128xf32> to vector<8x96xf32>
    %144 = arith.negf %143 : vector<8x96xf32>
    %145 = math.exp %144 : vector<8x96xf32>
    %cst_59 = arith.constant 1.000000e+00 : f32
    %146 = vector.broadcast %cst_59 : f32 to vector<8x96xf32>
    %147 = arith.addf %146, %145 : vector<8x96xf32>
    %148 = arith.divf %146, %147 : vector<8x96xf32>
    %149 = vector.extract_strided_slice %148 {offsets = [0, 0], sizes = [8, 32], strides = [1, 1]} : vector<8x96xf32> to vector<8x32xf32>
    %150 = vector.extract_strided_slice %148 {offsets = [0, 32], sizes = [8, 32], strides = [1, 1]} : vector<8x96xf32> to vector<8x32xf32>
    %151 = vector.extract_strided_slice %148 {offsets = [0, 64], sizes = [8, 32], strides = [1, 1]} : vector<8x96xf32> to vector<8x32xf32>
    %152 = vector.extract_strided_slice %142 {offsets = [0, 96], sizes = [8, 32], strides = [1, 1]} : vector<8x128xf32> to vector<8x32xf32>
    %153 = math.tanh %152 : vector<8x32xf32>
    %154 = arith.mulf %150, %118 : vector<8x32xf32>
    %155 = arith.mulf %149, %153 : vector<8x32xf32>
    %156 = arith.addf %154, %155 : vector<8x32xf32>
    %157 = math.tanh %156 : vector<8x32xf32>
    %158 = arith.mulf %151, %157 : vector<8x32xf32>
    %159 = vector.extract_strided_slice %109 {offsets = [8, 0], sizes = [8, 128], strides = [1, 1]} : vector<16x128xf32> to vector<8x128xf32>
    %c0_60 = arith.constant 0 : index
    %c0_61 = arith.constant 0 : index
    %160 = vector.load %arg11[%c0_60, %c0_61] : memref<32x128xf32, #tpu.memory_space<vmem>>, vector<32x128xf32>
    %cst_62 = arith.constant dense<0.000000e+00> : vector<8x128xf32>
    %161 = tpu.matmul %138, %160, %cst_62 {dimension_numbers = #tpu.dot_dimension_numbers<[1], [0], [0], [1], [0, 0, 1, 1], [], []>} : vector<8x32xf32>, vector<32x128xf32>, vector<8x128xf32> -> vector<8x128xf32>
    %162 = arith.addf %159, %161 : vector<8x128xf32>
    %163 = vector.extract_strided_slice %162 {offsets = [0, 0], sizes = [8, 96], strides = [1, 1]} : vector<8x128xf32> to vector<8x96xf32>
    %164 = arith.negf %163 : vector<8x96xf32>
    %165 = math.exp %164 : vector<8x96xf32>
    %cst_63 = arith.constant 1.000000e+00 : f32
    %166 = vector.broadcast %cst_63 : f32 to vector<8x96xf32>
    %167 = arith.addf %166, %165 : vector<8x96xf32>
    %168 = arith.divf %166, %167 : vector<8x96xf32>
    %169 = vector.extract_strided_slice %168 {offsets = [0, 0], sizes = [8, 32], strides = [1, 1]} : vector<8x96xf32> to vector<8x32xf32>
    %170 = vector.extract_strided_slice %168 {offsets = [0, 32], sizes = [8, 32], strides = [1, 1]} : vector<8x96xf32> to vector<8x32xf32>
    %171 = vector.extract_strided_slice %168 {offsets = [0, 64], sizes = [8, 32], strides = [1, 1]} : vector<8x96xf32> to vector<8x32xf32>
    %172 = vector.extract_strided_slice %162 {offsets = [0, 96], sizes = [8, 32], strides = [1, 1]} : vector<8x128xf32> to vector<8x32xf32>
    %173 = math.tanh %172 : vector<8x32xf32>
    %174 = arith.mulf %170, %136 : vector<8x32xf32>
    %175 = arith.mulf %169, %173 : vector<8x32xf32>
    %176 = arith.addf %174, %175 : vector<8x32xf32>
    %177 = math.tanh %176 : vector<8x32xf32>
    %178 = arith.mulf %171, %177 : vector<8x32xf32>
    %179 = vector.extract_strided_slice %114 {offsets = [0, 0], sizes = [8, 128], strides = [1, 1]} : vector<16x128xf32> to vector<8x128xf32>
    %c0_64 = arith.constant 0 : index
    %c0_65 = arith.constant 0 : index
    %180 = vector.load %arg14[%c0_64, %c0_65] : memref<32x128xf32, #tpu.memory_space<vmem>>, vector<32x128xf32>
    %cst_66 = arith.constant dense<0.000000e+00> : vector<8x128xf32>
    %181 = tpu.matmul %158, %180, %cst_66 {dimension_numbers = #tpu.dot_dimension_numbers<[1], [0], [0], [1], [0, 0, 1, 1], [], []>} : vector<8x32xf32>, vector<32x128xf32>, vector<8x128xf32> -> vector<8x128xf32>
    %182 = arith.addf %179, %181 : vector<8x128xf32>
    %183 = vector.extract_strided_slice %182 {offsets = [0, 0], sizes = [8, 96], strides = [1, 1]} : vector<8x128xf32> to vector<8x96xf32>
    %184 = arith.negf %183 : vector<8x96xf32>
    %185 = math.exp %184 : vector<8x96xf32>
    %cst_67 = arith.constant 1.000000e+00 : f32
    %186 = vector.broadcast %cst_67 : f32 to vector<8x96xf32>
    %187 = arith.addf %186, %185 : vector<8x96xf32>
    %188 = arith.divf %186, %187 : vector<8x96xf32>
    %189 = vector.extract_strided_slice %188 {offsets = [0, 0], sizes = [8, 32], strides = [1, 1]} : vector<8x96xf32> to vector<8x32xf32>
    %190 = vector.extract_strided_slice %188 {offsets = [0, 32], sizes = [8, 32], strides = [1, 1]} : vector<8x96xf32> to vector<8x32xf32>
    %191 = vector.extract_strided_slice %188 {offsets = [0, 64], sizes = [8, 32], strides = [1, 1]} : vector<8x96xf32> to vector<8x32xf32>
    %192 = vector.extract_strided_slice %182 {offsets = [0, 96], sizes = [8, 32], strides = [1, 1]} : vector<8x128xf32> to vector<8x32xf32>
    %193 = math.tanh %192 : vector<8x32xf32>
    %194 = arith.mulf %190, %156 : vector<8x32xf32>
    %195 = arith.mulf %189, %193 : vector<8x32xf32>
    %196 = arith.addf %194, %195 : vector<8x32xf32>
    %197 = math.tanh %196 : vector<8x32xf32>
    %198 = arith.mulf %191, %197 : vector<8x32xf32>
    %199 = tpu.concatenate %138, %178 in 0 : vector<8x32xf32>, vector<8x32xf32> -> vector<16x32xf32>
    %200 = tpu.concatenate %198, %158 in 0 : vector<8x32xf32>, vector<8x32xf32> -> vector<16x32xf32>
    %c0_68 = arith.constant 0 : index
    %c0_69 = arith.constant 0 : index
    %201 = vector.load %arg16[%c0_68, %c0_69] : memref<32x16xf32, #tpu.memory_space<vmem>>, vector<32x16xf32>
    %cst_70 = arith.constant dense<0.000000e+00> : vector<16x16xf32>
    %202 = tpu.matmul %199, %201, %cst_70 {dimension_numbers = #tpu.dot_dimension_numbers<[1], [0], [0], [1], [0, 0, 1, 1], [], []>} : vector<16x32xf32>, vector<32x16xf32>, vector<16x16xf32> -> vector<16x16xf32>
    %c0_71 = arith.constant 0 : index
    %c0_72 = arith.constant 0 : index
    %203 = vector.load %arg17[%c0_71, %c0_72] : memref<32x16xf32, #tpu.memory_space<vmem>>, vector<32x16xf32>
    %cst_73 = arith.constant dense<0.000000e+00> : vector<16x16xf32>
    %204 = tpu.matmul %200, %203, %cst_73 {dimension_numbers = #tpu.dot_dimension_numbers<[1], [0], [0], [1], [0, 0, 1, 1], [], []>} : vector<16x32xf32>, vector<32x16xf32>, vector<16x16xf32> -> vector<16x16xf32>
    %205 = arith.addf %202, %204 : vector<16x16xf32>
    %c0_74 = arith.constant 0 : index
    %c0_75 = arith.constant 0 : index
    %206 = vector.load %arg18[%c0_74, %c0_75] : memref<1x16xf32, #tpu.memory_space<vmem>>, vector<1x16xf32>
    %207 = vector.broadcast %206 : vector<1x16xf32> to vector<16x16xf32>
    %208 = arith.addf %205, %207 : vector<16x16xf32>
    %c0_76 = arith.constant 0 : index
    %c0_77 = arith.constant 0 : index
    %209 = vector.load %arg22[%c0_76, %c0_77] : memref<16x16xf32, #tpu.memory_space<vmem>>, vector<16x16xf32>
    tpu.vector_store %arg22[%c0_76, %c0_77], %208 {strides = array<i32>} : memref<16x16xf32, #tpu.memory_space<vmem>>, vector<16x16xf32>,
    %cst_78 = arith.constant 0.000000e+00 : f32
    %210 = vector.broadcast %cst_78 : f32 to vector<2x3xf32>
    %c0_79 = arith.constant 0 : index
    %c0_80 = arith.constant 0 : index
    %211 = vector.load %arg20[%c0_79, %c0_80] : memref<1x3xf32, #tpu.memory_space<vmem>>, vector<1x3xf32>
    %212 = vector.broadcast %211 : vector<1x3xf32> to vector<2x3xf32>
    %213 = arith.addf %210, %212 : vector<2x3xf32>
    %c0_81 = arith.constant 0 : index
    %c0_82 = arith.constant 0 : index
    %214 = tpu.strided_load %arg22[%c0_81, %c0_82] {strides = array<i32: 8, 1>} : memref<16x16xf32, #tpu.memory_space<vmem>>, vector<2x16xf32>
    %c0_83 = arith.constant 0 : index
    %c0_84 = arith.constant 0 : index
    %c0_85 = arith.constant 0 : index
    %215 = vector.load %arg19[%c0_83, %c0_84, %c0_85] : memref<8x16x3xf32, #tpu.memory_space<vmem>>, vector<1x16x3xf32>
    %216 = vector.shape_cast %215 : vector<1x16x3xf32> to vector<16x3xf32>
    %cst_86 = arith.constant dense<0.000000e+00> : vector<2x3xf32>
    %217 = tpu.matmul %214, %216, %cst_86 {dimension_numbers = #tpu.dot_dimension_numbers<[1], [0], [0], [1], [0, 0, 1, 1], [], []>} : vector<2x16xf32>, vector<16x3xf32>, vector<2x3xf32> -> vector<2x3xf32>
    %218 = arith.addf %213, %217 : vector<2x3xf32>
    %c1 = arith.constant 1 : index
    %c0_87 = arith.constant 0 : index
    %219 = tpu.strided_load %arg22[%c1, %c0_87] {strides = array<i32: 8, 1>} : memref<16x16xf32, #tpu.memory_space<vmem>>, vector<2x16xf32>
    %c1_88 = arith.constant 1 : index
    %c0_89 = arith.constant 0 : index
    %c0_90 = arith.constant 0 : index
    %220 = vector.load %arg19[%c1_88, %c0_89, %c0_90] : memref<8x16x3xf32, #tpu.memory_space<vmem>>, vector<1x16x3xf32>
    %221 = vector.shape_cast %220 : vector<1x16x3xf32> to vector<16x3xf32>
    %cst_91 = arith.constant dense<0.000000e+00> : vector<2x3xf32>
    %222 = tpu.matmul %219, %221, %cst_91 {dimension_numbers = #tpu.dot_dimension_numbers<[1], [0], [0], [1], [0, 0, 1, 1], [], []>} : vector<2x16xf32>, vector<16x3xf32>, vector<2x3xf32> -> vector<2x3xf32>
    %223 = arith.addf %218, %222 : vector<2x3xf32>
    %c2 = arith.constant 2 : index
    %c0_92 = arith.constant 0 : index
    %224 = tpu.strided_load %arg22[%c2, %c0_92] {strides = array<i32: 8, 1>} : memref<16x16xf32, #tpu.memory_space<vmem>>, vector<2x16xf32>
    %c2_93 = arith.constant 2 : index
    %c0_94 = arith.constant 0 : index
    %c0_95 = arith.constant 0 : index
    %225 = vector.load %arg19[%c2_93, %c0_94, %c0_95] : memref<8x16x3xf32, #tpu.memory_space<vmem>>, vector<1x16x3xf32>
    %226 = vector.shape_cast %225 : vector<1x16x3xf32> to vector<16x3xf32>
    %cst_96 = arith.constant dense<0.000000e+00> : vector<2x3xf32>
    %227 = tpu.matmul %224, %226, %cst_96 {dimension_numbers = #tpu.dot_dimension_numbers<[1], [0], [0], [1], [0, 0, 1, 1], [], []>} : vector<2x16xf32>, vector<16x3xf32>, vector<2x3xf32> -> vector<2x3xf32>
    %228 = arith.addf %223, %227 : vector<2x3xf32>
    %c3 = arith.constant 3 : index
    %c0_97 = arith.constant 0 : index
    %229 = tpu.strided_load %arg22[%c3, %c0_97] {strides = array<i32: 8, 1>} : memref<16x16xf32, #tpu.memory_space<vmem>>, vector<2x16xf32>
    %c3_98 = arith.constant 3 : index
    %c0_99 = arith.constant 0 : index
    %c0_100 = arith.constant 0 : index
    %230 = vector.load %arg19[%c3_98, %c0_99, %c0_100] : memref<8x16x3xf32, #tpu.memory_space<vmem>>, vector<1x16x3xf32>
    %231 = vector.shape_cast %230 : vector<1x16x3xf32> to vector<16x3xf32>
    %cst_101 = arith.constant dense<0.000000e+00> : vector<2x3xf32>
    %232 = tpu.matmul %229, %231, %cst_101 {dimension_numbers = #tpu.dot_dimension_numbers<[1], [0], [0], [1], [0, 0, 1, 1], [], []>} : vector<2x16xf32>, vector<16x3xf32>, vector<2x3xf32> -> vector<2x3xf32>
    %233 = arith.addf %228, %232 : vector<2x3xf32>
    %c4 = arith.constant 4 : index
    %c0_102 = arith.constant 0 : index
    %234 = tpu.strided_load %arg22[%c4, %c0_102] {strides = array<i32: 8, 1>} : memref<16x16xf32, #tpu.memory_space<vmem>>, vector<2x16xf32>
    %c4_103 = arith.constant 4 : index
    %c0_104 = arith.constant 0 : index
    %c0_105 = arith.constant 0 : index
    %235 = vector.load %arg19[%c4_103, %c0_104, %c0_105] : memref<8x16x3xf32, #tpu.memory_space<vmem>>, vector<1x16x3xf32>
    %236 = vector.shape_cast %235 : vector<1x16x3xf32> to vector<16x3xf32>
    %cst_106 = arith.constant dense<0.000000e+00> : vector<2x3xf32>
    %237 = tpu.matmul %234, %236, %cst_106 {dimension_numbers = #tpu.dot_dimension_numbers<[1], [0], [0], [1], [0, 0, 1, 1], [], []>} : vector<2x16xf32>, vector<16x3xf32>, vector<2x3xf32> -> vector<2x3xf32>
    %238 = arith.addf %233, %237 : vector<2x3xf32>
    %c5 = arith.constant 5 : index
    %c0_107 = arith.constant 0 : index
    %239 = tpu.strided_load %arg22[%c5, %c0_107] {strides = array<i32: 8, 1>} : memref<16x16xf32, #tpu.memory_space<vmem>>, vector<2x16xf32>
    %c5_108 = arith.constant 5 : index
    %c0_109 = arith.constant 0 : index
    %c0_110 = arith.constant 0 : index
    %240 = vector.load %arg19[%c5_108, %c0_109, %c0_110] : memref<8x16x3xf32, #tpu.memory_space<vmem>>, vector<1x16x3xf32>
    %241 = vector.shape_cast %240 : vector<1x16x3xf32> to vector<16x3xf32>
    %cst_111 = arith.constant dense<0.000000e+00> : vector<2x3xf32>
    %242 = tpu.matmul %239, %241, %cst_111 {dimension_numbers = #tpu.dot_dimension_numbers<[1], [0], [0], [1], [0, 0, 1, 1], [], []>} : vector<2x16xf32>, vector<16x3xf32>, vector<2x3xf32> -> vector<2x3xf32>
    %243 = arith.addf %238, %242 : vector<2x3xf32>
    %c6 = arith.constant 6 : index
    %c0_112 = arith.constant 0 : index
    %244 = tpu.strided_load %arg22[%c6, %c0_112] {strides = array<i32: 8, 1>} : memref<16x16xf32, #tpu.memory_space<vmem>>, vector<2x16xf32>
    %c6_113 = arith.constant 6 : index
    %c0_114 = arith.constant 0 : index
    %c0_115 = arith.constant 0 : index
    %245 = vector.load %arg19[%c6_113, %c0_114, %c0_115] : memref<8x16x3xf32, #tpu.memory_space<vmem>>, vector<1x16x3xf32>
    %246 = vector.shape_cast %245 : vector<1x16x3xf32> to vector<16x3xf32>
    %cst_116 = arith.constant dense<0.000000e+00> : vector<2x3xf32>
    %247 = tpu.matmul %244, %246, %cst_116 {dimension_numbers = #tpu.dot_dimension_numbers<[1], [0], [0], [1], [0, 0, 1, 1], [], []>} : vector<2x16xf32>, vector<16x3xf32>, vector<2x3xf32> -> vector<2x3xf32>
    %248 = arith.addf %243, %247 : vector<2x3xf32>
    %c7 = arith.constant 7 : index
    %c0_117 = arith.constant 0 : index
    %249 = tpu.strided_load %arg22[%c7, %c0_117] {strides = array<i32: 8, 1>} : memref<16x16xf32, #tpu.memory_space<vmem>>, vector<2x16xf32>
    %c7_118 = arith.constant 7 : index
    %c0_119 = arith.constant 0 : index
    %c0_120 = arith.constant 0 : index
    %250 = vector.load %arg19[%c7_118, %c0_119, %c0_120] : memref<8x16x3xf32, #tpu.memory_space<vmem>>, vector<1x16x3xf32>
    %251 = vector.shape_cast %250 : vector<1x16x3xf32> to vector<16x3xf32>
    %cst_121 = arith.constant dense<0.000000e+00> : vector<2x3xf32>
    %252 = tpu.matmul %249, %251, %cst_121 {dimension_numbers = #tpu.dot_dimension_numbers<[1], [0], [0], [1], [0, 0, 1, 1], [], []>} : vector<2x16xf32>, vector<16x3xf32>, vector<2x3xf32> -> vector<2x3xf32>
    %253 = arith.addf %248, %252 : vector<2x3xf32>
    %c0_122 = arith.constant 0 : index
    %c0_123 = arith.constant 0 : index
    %254 = vector.load %arg21[%c0_122, %c0_123] : memref<2x3xf32, #tpu.memory_space<vmem>>, vector<2x3xf32>
    tpu.vector_store %arg21[%c0_122, %c0_123], %253 {strides = array<i32>} : memref<2x3xf32, #tpu.memory_space<vmem>>, vector<2x3xf32>,
    return
  }
}

</mosaic_0001>

<bundles_post_ra>
// kernel: two_level_lstm_forward.1
= control target key start
LH: loop header
LB: loop body
LE: loop exit
PB: predicated region body
PF: predicated region fallthrough
CT: control target
= control target key end

     0   :  { %s6716_s0 = inlined_call_operand.vmem [shape: f32[16,20], index: 0, kind: input, shape index: {}]   ;;  %s6717_s1 = inlined_call_operand.vmem [shape: f32[20,640], index: 1, kind: input, shape index: {}]   ;;  %s6718_s2 = inlined_call_operand.hbm [shape: f32[160,640], index: 2, kind: input, shape index: {}]   ;;  %s6719_s3 = inlined_call_operand.hbm [shape: f32[1,640], index: 3, kind: input, shape index: {}]   ;;  %s6720_s4 = inlined_call_operand.hbm [shape: f32[20,640], index: 4, kind: input, shape index: {}]   ;;  %s6721_s5 = inlined_call_operand.hbm [shape: f32[160,640], index: 5, kind: input, shape index: {}]   ;;  %s6722_s6 = inlined_call_operand.hbm [shape: f32[1,640], index: 6, kind: input, shape index: {}]   ;;  %s6723_s7 = inlined_call_operand.vmem [shape: f32[160,80], index: 7, kind: input, shape index: {}]   ;;  %s6724_s8 = inlined_call_operand.vmem [shape: f32[160,80], index: 8, kind: input, shape index: {}]   ;;  %s6725_s9 = inlined_call_operand.hbm [shape: f32[1,80], index: 9, kind: input, shape index: {}]   ;;  %s6726_s10 = inlined_call_operand.hbm [shape: f32[80,128], index: 10, kind: input, shape index: {}]   ;;  %s6727_s11 = inlined_call_operand.vmem [shape: f32[32,128], index: 11, kind: input, shape index: {}]   ;;  %s6728_s12 = inlined_call_operand.hbm [shape: f32[1,128], index: 12, kind: input, shape index: {}]   ;;  %s6729_s13 = inlined_call_operand.hbm [shape: f32[80,128], index: 13, kind: input, shape index: {}]   ;;  %s6730_s14 = inlined_call_operand.hbm [shape: f32[32,128], index: 14, kind: input, shape index: {}]   ;;  %s6731_s15 = inlined_call_operand.hbm [shape: f32[1,128], index: 15, kind: input, shape index: {}]   ;;  %s6732_s16 = inlined_call_operand.vmem [shape: f32[32,16], index: 16, kind: input, shape index: {}]   ;;  %s6733_s17 = inlined_call_operand.vmem [shape: f32[32,16], index: 17, kind: input, shape index: {}]   ;;  %s6734_s18 = inlined_call_operand.hbm [shape: f32[1,16], index: 18, kind: input, shape index: {}]   ;;  %s6735_s19 = inlined_call_operand.vmem [shape: f32[8,16,3], index: 19, kind: input, shape index: {}]   ;;  %s6736_s20 = inlined_call_operand.hbm [shape: f32[1,3], index: 20, kind: input, shape index: {}]   ;;  %s6737_s21 = inlined_call_operand.hbm [shape: f32[2,3], index: 21, kind: output, shape index: {}]  }
   0x1   :  { %6793 = sst [smem:[#allocation77_spill]] %s6716_s0 }
   0x2   :  { %6794 = sst [smem:[#allocation78_spill]] %s6717_s1 }
   0x3   :  { %6795 = sst [smem:[#allocation79_spill]] %s6718_s2 }
   0x4   :  { %6796 = sst [smem:[#allocation80_spill]] %s6719_s3 }
   0x5   :  { %6797 = sst [smem:[#allocation81_spill]] %s6720_s4 }
   0x6   :  { %6798 = sst [smem:[#allocation82_spill]] %s6721_s5 }
   0x7   :  { %6799 = sst [smem:[#allocation83_spill]] %s6737_s21 }
   0x8   :  { %26 = vsyncpa [#allocation4], 0 }
   0x9   :  { %27 = vsyncpa [#allocation7], 0 }
   0xa   :  { %28 = vsyncpa [#allocation10], 0 }
   0xb   :  { %29 = vsyncpa [#allocation13], 0 }
   0xc   :  { %30 = vsyncpa [#allocation16], 0 }
   0xd   :  { %31 = vsyncpa [#allocation19], 0 }
   0xe   :  { %32 = vsyncpa [#allocation22], 0 }
   0xf   :  { %33 = vsyncpa [#allocation5], 0  ;;  %s5324_s2 = smov [#allocation6]   ;;  %s6800_s3 = sld [smem:[#allocation80_spill]] }
  0x10   :  { %s56_s25 = sshll.u32 %s5324_s2, 4  ;;  %s57_s25 = int_to_ptr.vmem [resolvable:$true] %s56_s25 }
  0x15   :  { %s5000_s28 = scalar_lea.hbm %s6800_s3, 80 }
  0x16   :  { %p5001_p0 = scmp.ne.s32.totalorder %s6800_s3, %s5000_s28  ;;  %p5004_p1 = scmp.lt.u32.totalorder %s5000_s28, %s6800_s3 }
  0x18   :  { %p5006_p2 = pnand %p5004_p1, %p5001_p0 }
  0x1a   :  { %5009 = shalt.err (!%p5006_p2)
}
  0x1b   :  { %s5010_s5 = scalar_lea.vmem %s57_s25, 80  ;;  %s5014_s22 = scalar_lea.vmem %s57_s25, 96 }
  0x1c   :  { %p5011_p3 = scmp.ne.s32.totalorder %s57_s25, %s5010_s5  ;;  %p5015_p4 = scmp.lt.s32.totalorder %s57_s25, %s57_s25 }
  0x1d   :  { %p5016_p5 = scmp.lt.s32.totalorder %s5014_s22, %s5010_s5 }
  0x1f   :  { %p5017_p6 = por %p5016_p5, %p5015_p4 }
  0x21   :  { %p5018_p7 = pnand %p5017_p6, %p5011_p3 }
  0x23   :  { %5021 = shalt.err (!%p5018_p7)
}
  0x24   :  { %59 = dma.hbm_to_vmem [thread:$0]  %s6800_s3, 80, %s57_s25, [#allocation7]  }
  0x25   :  { %s5325_s24 = smov [#allocation9]   ;;  %s5326_s26 = smov [#allocation12]  }
  0x26   :  { %s77_s2 = sshll.u32 %s5325_s24, 4  ;;  %s104_s27 = sshll.u32 %s5326_s26, 4  ;;  %s78_s2 = int_to_ptr.vmem [resolvable:$true] %s77_s2  ;;  %s105_s27 = int_to_ptr.vmem [resolvable:$true] %s104_s27 }
  0x27   :  { %s6801_s0 = sld [smem:[#allocation82_spill]] }
  0x2d   :  { %s5022_s4 = scalar_lea.hbm %s6801_s0, 12800 }
  0x2e   :  { %p5023_p8 = scmp.ne.s32.totalorder %s6801_s0, %s5022_s4  ;;  %p5026_p9 = scmp.lt.u32.totalorder %s5022_s4, %s6801_s0 }
  0x30   :  { %p5028_p10 = pnand %p5026_p9, %p5023_p8 }
  0x32   :  { %5031 = shalt.err (!%p5028_p10)
}
  0x33   :  { %s5032_s25 = scalar_lea.vmem %s78_s2, 12800  ;;  %p5037_p12 = scmp.lt.s32.totalorder %s78_s2, %s78_s2 }
  0x34   :  { %p5033_p11 = scmp.ne.s32.totalorder %s78_s2, %s5032_s25  ;;  %p5038_p13 = scmp.lt.s32.totalorder %s5032_s25, %s5032_s25 }
  0x36   :  { %p5039_p0 = por %p5038_p13, %p5037_p12 }
  0x38   :  { %p5040_p1 = pnand %p5039_p0, %p5033_p11 }
  0x3a   :  { %5043 = shalt.err (!%p5040_p1)
}
  0x3b   :  { %s5327_s3 = smov 640   ;;  %s5328_s23 = smov 40  }
  0x3c   :  { %83 = dma.hbm_to_vmem [thread:$0]  %s6801_s0, 12800, %s78_s2, [#allocation10], %s5327_s3, %s5327_s3, %s5328_s23  }
  0x3d   :  { %s5044_s28 = scalar_lea.hbm %s6725_s9, 16 }
  0x3e   :  { %p5045_p2 = scmp.ne.s32.totalorder %s6725_s9, %s5044_s28  ;;  %p5048_p3 = scmp.lt.u32.totalorder %s5044_s28, %s6725_s9 }
  0x40   :  { %p5050_p4 = pnand %p5048_p3, %p5045_p2 }
  0x42   :  { %5053 = shalt.err (!%p5050_p4)
}
  0x43   :  { %s5054_s22 = scalar_lea.vmem %s105_s27, 16  ;;  %s5058_s25 = scalar_lea.vmem %s105_s27, 32 }
  0x44   :  { %p5055_p5 = scmp.ne.s32.totalorder %s105_s27, %s5054_s22  ;;  %p5059_p6 = scmp.lt.s32.totalorder %s105_s27, %s105_s27 }
  0x45   :  { %p5060_p7 = scmp.lt.s32.totalorder %s5058_s25, %s5054_s22 }
  0x47   :  { %p5061_p8 = por %p5060_p7, %p5059_p6 }
  0x49   :  { %p5062_p9 = pnand %p5061_p8, %p5055_p5 }
  0x4b   :  { %5065 = shalt.err (!%p5062_p9)
}
  0x4c   :  { %107 = dma.hbm_to_vmem [thread:$0]  %s6725_s9, 16, %s105_s27, [#allocation13]  }
  0x4d   :  { %s5329_s21 = smov [#allocation15]   ;;  %s5066_s28 = scalar_lea.hbm %s6728_s12, 16 }
  0x4e   :  { %s128_s1 = sshll.u32 %s5329_s21, 4  ;;  %p5067_p10 = scmp.ne.s32.totalorder %s6728_s12, %s5066_s28  ;;  %s129_s1 = int_to_ptr.vmem [resolvable:$true] %s128_s1 }
  0x4f   :  { %p5070_p11 = scmp.lt.u32.totalorder %s5066_s28, %s6728_s12 }
  0x51   :  { %p5072_p12 = pnand %p5070_p11, %p5067_p10 }
  0x53   :  { %5075 = shalt.err (!%p5072_p12)
}
  0x54   :  { %s5076_s22 = scalar_lea.vmem %s129_s1, 16  ;;  %s5080_s9 = scalar_lea.vmem %s129_s1, 32 }
  0x55   :  { %p5077_p13 = scmp.ne.s32.totalorder %s129_s1, %s5076_s22  ;;  %p5081_p0 = scmp.lt.s32.totalorder %s129_s1, %s129_s1 }
  0x56   :  { %p5082_p1 = scmp.lt.s32.totalorder %s5080_s9, %s5076_s22 }
  0x58   :  { %p5083_p2 = por %p5082_p1, %p5081_p0 }
  0x5a   :  { %p5084_p3 = pnand %p5083_p2, %p5077_p13 }
  0x5c   :  { %5087 = shalt.err (!%p5084_p3)
}
  0x5d   :  { %131 = dma.hbm_to_vmem [thread:$0]  %s6728_s12, 16, %s129_s1, [#allocation16]  }
  0x5e   :  { %s5330_s2 = smov [#allocation18]   ;;  %s5331_s21 = smov [#allocation21]  }
  0x5f   :  { %s149_s0 = sshll.u32 %s5330_s2, 4  ;;  %s176_s24 = sshll.u32 %s5331_s21, 4  ;;  %s150_s0 = int_to_ptr.vmem [resolvable:$true] %s149_s0  ;;  %s5508_s24 = int_to_ptr.vmem [resolvable:$true] %s176_s24 }
  0x60   :  { %s5088_s29 = scalar_lea.hbm %s6730_s14, 512 }
  0x61   :  { %p5089_p4 = scmp.ne.s32.totalorder %s6730_s14, %s5088_s29  ;;  %p5092_p5 = scmp.lt.u32.totalorder %s5088_s29, %s6730_s14 }
  0x63   :  { %p5094_p6 = pnand %p5092_p5, %p5089_p4 }
  0x65   :  { %5097 = shalt.err (!%p5094_p6)
}
  0x66   :  { %s5098_s12 = scalar_lea.vmem %s150_s0, 512  ;;  %p5103_p8 = scmp.lt.s32.totalorder %s150_s0, %s150_s0 }
  0x67   :  { %p5099_p7 = scmp.ne.s32.totalorder %s150_s0, %s5098_s12  ;;  %p5104_p9 = scmp.lt.s32.totalorder %s5098_s12, %s5098_s12 }
  0x69   :  { %p5105_p10 = por %p5104_p9, %p5103_p8 }
  0x6b   :  { %p5106_p11 = pnand %p5105_p10, %p5099_p7 }
  0x6d   :  { %5109 = shalt.err (!%p5106_p11)
}
  0x6e   :  { %s5332_s1 = smov 128   ;;  %s5333_s9 = smov 8  }
  0x6f   :  { %155 = dma.hbm_to_vmem [thread:$0]  %s6730_s14, 512, %s150_s0, [#allocation19], %s5332_s1, %s5332_s1, %s5333_s9  }
  0x70   :  { %s5110_s26 = scalar_lea.hbm %s6734_s18, 16 }
  0x71   :  { %p5111_p12 = scmp.ne.s32.totalorder %s6734_s18, %s5110_s26  ;;  %p5114_p13 = scmp.lt.u32.totalorder %s5110_s26, %s6734_s18 }
  0x73   :  { %p5116_p0 = pnand %p5114_p13, %p5111_p12 }
  0x75   :  { %5119 = shalt.err (!%p5116_p0)
}
  0x76   :  { %s5120_s5 = scalar_lea.vmem %s5508_s24, 16  ;;  %s5124_s14 = scalar_lea.vmem %s5508_s24, 32 }
  0x77   :  { %p5121_p1 = scmp.ne.s32.totalorder %s5508_s24, %s5120_s5  ;;  %p5125_p2 = scmp.lt.s32.totalorder %s5508_s24, %s5508_s24 }
  0x78   :  { %p5126_p3 = scmp.lt.s32.totalorder %s5124_s14, %s5120_s5 }
  0x7a   :  { %p5127_p4 = por %p5126_p3, %p5125_p2 }
  0x7c   :  { %p5128_p5 = pnand %p5127_p4, %p5121_p1 }
  0x7e   :  { %5131 = shalt.err (!%p5128_p5)
}
  0x7f   :  { %179 = dma.hbm_to_vmem [thread:$0]  %s6734_s18, 16, %s5508_s24, [#allocation22]  }
  0x80   :  { %s5334_s12 = smov [#allocation3]   ;;  %s5335_s25 = smov [#allocation8]  }
  0x81   :  { %s43_s27 = sshll.u32 %s5334_s12, 4  ;;  %s65_s2 = sshll.u32 %s5335_s25, 4  ;;  %s44_s27 = int_to_ptr.vmem [resolvable:$true] %s43_s27  ;;  %s5543_s2 = int_to_ptr.vmem [resolvable:$true] %s65_s2 }
  0x82   :  { %s6802_s28 = sld [smem:[#allocation79_spill]] }
  0x88   :  { %s5132_s29 = scalar_lea.hbm %s6802_s28, 12800 }
  0x89   :  { %p5133_p6 = scmp.ne.s32.totalorder %s6802_s28, %s5132_s29  ;;  %p5136_p7 = scmp.lt.u32.totalorder %s5132_s29, %s6802_s28 }
  0x8b   :  { %p5138_p8 = pnand %p5136_p7, %p5133_p6 }
  0x8d   :  { %5141 = shalt.err (!%p5138_p8)
}
  0x8e   :  { %s5142_s18 = scalar_lea.vmem %s44_s27, 12800  ;;  %p5147_p10 = scmp.lt.s32.totalorder %s44_s27, %s44_s27 }
  0x8f   :  { %p5143_p9 = scmp.ne.s32.totalorder %s44_s27, %s5142_s18  ;;  %p5148_p11 = scmp.lt.s32.totalorder %s5142_s18, %s5142_s18 }
  0x91   :  { %p5149_p12 = por %p5148_p11, %p5147_p10 }
  0x93   :  { %p5150_p13 = pnand %p5149_p12, %p5143_p9 }
  0x95   :  { %5153 = shalt.err (!%p5150_p13)
}
  0x96   :  { %49 = dma.hbm_to_vmem [thread:$0]  %s6802_s28, 12800, %s44_s27, [#allocation4], %s5327_s3, %s5327_s3, %s5328_s23  }
  0x97   :  { %s6803_s25 = sld [smem:[#allocation81_spill]] }
  0x9d   :  { %s5154_s21 = scalar_lea.hbm %s6803_s25, 1920 }
  0x9e   :  { %p5155_p0 = scmp.ne.s32.totalorder %s6803_s25, %s5154_s21  ;;  %p5158_p1 = scmp.lt.u32.totalorder %s5154_s21, %s6803_s25 }
  0xa0   :  { %p5160_p2 = pnand %p5158_p1, %p5155_p0 }
  0xa2   :  { %5163 = shalt.err (!%p5160_p2)
}
  0xa3   :  { %s5164_s5 = scalar_lea.vmem %s5543_s2, 1920  ;;  %p5169_p4 = scmp.lt.s32.totalorder %s5543_s2, %s5543_s2 }
  0xa4   :  { %p5165_p3 = scmp.ne.s32.totalorder %s5543_s2, %s5164_s5  ;;  %p5170_p5 = scmp.lt.s32.totalorder %s5164_s5, %s5164_s5 }
  0xa6   :  { %p5171_p6 = por %p5170_p5, %p5169_p4 }
  0xa8   :  { %p5172_p7 = pnand %p5171_p6, %p5165_p3 }
  0xaa   :  { %5175 = shalt.err (!%p5172_p7)
}
  0xab   :  { %71 = dma.hbm_to_vmem [thread:$0]  %s6803_s25, 1920, %s5543_s2, [#allocation7], %s5327_s3, %s5327_s3, %s5328_s23  }
  0xac   :  { %s5336_s14 = smov [#allocation11]   ;;  %s5337_s24 = smov [#allocation14]  }
  0xad   :  { %s90_s18 = sshll.u32 %s5336_s14, 4  ;;  %s113_s0 = sshll.u32 %s5337_s24, 4  ;;  %s91_s18 = int_to_ptr.vmem [resolvable:$true] %s90_s18  ;;  %s5580_s0 = int_to_ptr.vmem [resolvable:$true] %s113_s0 }
  0xae   :  { %s5176_s21 = scalar_lea.hbm %s6722_s6, 80 }
  0xaf   :  { %p5177_p8 = scmp.ne.s32.totalorder %s6722_s6, %s5176_s21  ;;  %p5180_p9 = scmp.lt.u32.totalorder %s5176_s21, %s6722_s6 }
  0xb1   :  { %p5182_p10 = pnand %p5180_p9, %p5177_p8 }
  0xb3   :  { %5185 = shalt.err (!%p5182_p10)
}
  0xb4   :  { %s5186_s3 = scalar_lea.vmem %s91_s18, 80  ;;  %s5190_s23 = scalar_lea.vmem %s91_s18, 96 }
  0xb5   :  { %p5187_p11 = scmp.ne.s32.totalorder %s91_s18, %s5186_s3  ;;  %p5191_p12 = scmp.lt.s32.totalorder %s91_s18, %s91_s18 }
  0xb6   :  { %p5192_p13 = scmp.lt.s32.totalorder %s5190_s23, %s5186_s3 }
  0xb8   :  { %p5193_p0 = por %p5192_p13, %p5191_p12 }
  0xba   :  { %p5194_p1 = pnand %p5193_p0, %p5187_p11 }
  0xbc   :  { %5197 = shalt.err (!%p5194_p1)
}
  0xbd   :  { %93 = dma.hbm_to_vmem [thread:$0]  %s6722_s6, 80, %s91_s18, [#allocation10]  }
  0xbe   :  { %s5198_s28 = scalar_lea.hbm %s6726_s10, 1280 }
  0xbf   :  { %p5199_p2 = scmp.ne.s32.totalorder %s6726_s10, %s5198_s28  ;;  %p5202_p3 = scmp.lt.u32.totalorder %s5198_s28, %s6726_s10 }
  0xc1   :  { %p5204_p4 = pnand %p5202_p3, %p5199_p2 }
  0xc3   :  { %5207 = shalt.err (!%p5204_p4)
}
  0xc4   :  { %s5208_s21 = scalar_lea.vmem %s5580_s0, 1280  ;;  %p5213_p6 = scmp.lt.s32.totalorder %s5580_s0, %s5580_s0 }
  0xc5   :  { %p5209_p5 = scmp.ne.s32.totalorder %s5580_s0, %s5208_s21  ;;  %p5214_p7 = scmp.lt.s32.totalorder %s5208_s21, %s5208_s21 }
  0xc7   :  { %p5215_p8 = por %p5214_p7, %p5213_p6 }
  0xc9   :  { %p5216_p9 = pnand %p5215_p8, %p5209_p5 }
  0xcb   :  { %5219 = shalt.err (!%p5216_p9)
}
  0xcc   :  { %119 = dma.hbm_to_vmem [thread:$0]  %s6726_s10, 1280, %s5580_s0, [#allocation13], %s5332_s1, %s5332_s1, %s5333_s9  }
  0xcd   :  { %s5338_s26 = smov [#allocation17]   ;;  %s5339_s4 = smov [#allocation20]  }
  0xce   :  { %s137_s29 = sshll.u32 %s5338_s26, 4  ;;  %s162_s30 = sshll.u32 %s5339_s4, 4  ;;  %s138_s29 = int_to_ptr.vmem [resolvable:$true] %s137_s29  ;;  %s163_s30 = int_to_ptr.vmem [resolvable:$true] %s162_s30 }
  0xcf   :  { %s5220_s2 = scalar_lea.hbm %s6729_s13, 1280 }
  0xd0   :  { %p5221_p10 = scmp.ne.s32.totalorder %s6729_s13, %s5220_s2  ;;  %p5224_p11 = scmp.lt.u32.totalorder %s5220_s2, %s6729_s13 }
  0xd2   :  { %p5226_p12 = pnand %p5224_p11, %p5221_p10 }
  0xd4   :  { %5229 = shalt.err (!%p5226_p12)
}
  0xd5   :  { %s5230_s10 = scalar_lea.vmem %s138_s29, 1280  ;;  %p5235_p0 = scmp.lt.s32.totalorder %s138_s29, %s138_s29 }
  0xd6   :  { %p5231_p13 = scmp.ne.s32.totalorder %s138_s29, %s5230_s10  ;;  %p5236_p1 = scmp.lt.s32.totalorder %s5230_s10, %s5230_s10 }
  0xd8   :  { %p5237_p2 = por %p5236_p1, %p5235_p0 }
  0xda   :  { %p5238_p3 = pnand %p5237_p2, %p5231_p13 }
  0xdc   :  { %5241 = shalt.err (!%p5238_p3)
}
  0xdd   :  { %143 = dma.hbm_to_vmem [thread:$0]  %s6729_s13, 1280, %s138_s29, [#allocation16], %s5332_s1, %s5332_s1, %s5333_s9  }
  0xde   :  { %s5242_s12 = scalar_lea.hbm %s6731_s15, 16 }
  0xdf   :  { %p5243_p4 = scmp.ne.s32.totalorder %s6731_s15, %s5242_s12  ;;  %p5246_p5 = scmp.lt.u32.totalorder %s5242_s12, %s6731_s15 }
  0xe1   :  { %p5248_p6 = pnand %p5246_p5, %p5243_p4 }
  0xe3   :  { %5251 = shalt.err (!%p5248_p6)
}
  0xe4   :  { %s5252_s4 = scalar_lea.vmem %s163_s30, 16  ;;  %s5256_s3 = scalar_lea.vmem %s163_s30, 32 }
  0xe5   :  { %p5253_p7 = scmp.ne.s32.totalorder %s163_s30, %s5252_s4  ;;  %p5257_p8 = scmp.lt.s32.totalorder %s163_s30, %s163_s30 }
  0xe6   :  { %p5258_p9 = scmp.lt.s32.totalorder %s5256_s3, %s5252_s4 }
  0xe8   :  { %p5259_p10 = por %p5258_p9, %p5257_p8 }
  0xea   :  { %p5260_p11 = pnand %p5259_p10, %p5253_p7 }
  0xec   :  { %5263 = shalt.err (!%p5260_p11)
}
  0xed   :  { %165 = dma.hbm_to_vmem [thread:$0]  %s6731_s15, 16, %s163_s30, [#allocation19]  }
  0xee   :  { %s5340_s9 = smov [#allocation23]   ;;  %s5264_s25 = scalar_lea.hbm %s6736_s20, 16 }
  0xef   :  { %s188_s29 = sshll.u32 %s5340_s9, 4  ;;  %p5265_p12 = scmp.ne.s32.totalorder %s6736_s20, %s5264_s25  ;;  %s189_s29 = int_to_ptr.vmem [resolvable:$true] %s188_s29 }
  0xf0   :  { %p5268_p13 = scmp.lt.u32.totalorder %s5264_s25, %s6736_s20 }
  0xf2   :  { %p5270_p0 = pnand %p5268_p13, %p5265_p12 }
  0xf4   :  { %5273 = shalt.err (!%p5270_p0)
}
  0xf5   :  { %s5274_s0 = scalar_lea.vmem %s189_s29, 16  ;;  %s5278_s15 = scalar_lea.vmem %s189_s29, 32 }
  0xf6   :  { %p5275_p1 = scmp.ne.s32.totalorder %s189_s29, %s5274_s0  ;;  %p5279_p2 = scmp.lt.s32.totalorder %s189_s29, %s189_s29 }
  0xf7   :  { %p5280_p3 = scmp.lt.s32.totalorder %s5278_s15, %s5274_s0 }
  0xf9   :  { %p5281_p4 = por %p5280_p3, %p5279_p2 }
  0xfb   :  { %p5282_p5 = pnand %p5281_p4, %p5275_p1 }
  0xfd   :  { %5285 = shalt.err (!%p5282_p5)
}
  0xfe   :  { %191 = dma.hbm_to_vmem [thread:$0]  %s6736_s20, 16, %s189_s29, [#allocation22]  }
  0xff   :  { %5308 = dma.done.wait [#allocation4], 12800  }
 0x100   :  { %5309 = vsyncadd [#allocation4], 4294954496 }
 0x101   :  { %5310 = dma.done.wait [#allocation7], 2000  }
 0x102   :  { %5311 = vsyncadd [#allocation7], 4294965296 }
 0x103   :  { %5312 = dma.done.wait [#allocation10], 12880  }
 0x104   :  { %5313 = vsyncadd [#allocation10], 4294954416 }
 0x105   :  { %5314 = dma.done.wait [#allocation13], 1296  }
 0x106   :  { %5315 = vsyncadd [#allocation13], 4294966000 }
 0x107   :  { %5316 = dma.done.wait [#allocation16], 1296  }
 0x108   :  { %5317 = vsyncadd [#allocation16], 4294966000 }
 0x109   :  { %5318 = dma.done.wait [#allocation19], 528  }
 0x10a   :  { %5319 = vsyncadd [#allocation19], 4294966768 }
 0x10b   :  { %5320 = dma.done.wait [#allocation22], 32  }
 0x10c   :  { %5321 = vsyncadd [#allocation22], 4294967264  ;;  %v6750_v0 = vmov 0.0   ;;  %s6804_s22 = sld [smem:[#allocation78_spill]]  ;;  %v528_v3 = vld [vmem:[#allocation8 + $0x8] sm:$0xff]  ;;  %v533_v5 = vld [vmem:[#allocation8 + $0x30] sm:$0xff] }
 0x10d   :  { %362 = vmatprep.mubr.f32.mxu0 %v6750_v0  ;;  %648 = vmatprep.mubr.f32.mxu1 %v6750_v0  ;;  %v4184_v8 = vpack.c.bf16 %v533_v5, %v528_v3  ;;  %v527_v10 = vld [vmem:[#allocation8] sm:$0xff]  ;;  %v532_v11 = vld [vmem:[#allocation8 + $0x28] sm:$0xff]  ;;  %vm282_vm0 = vcmask 1043456   ;;  %v538_v14 = vld [vmem:[#allocation8 + $0x58] sm:$0xf]  ;;  %s6805_s30 = sld [smem:[#allocation77_spill]] }
 0x10e   :  { %v4186_v13 = vpack.c.bf16 %v532_v11, %v527_v10  ;;  %v531_v20 = vld [vmem:[#allocation8 + $0x20] sm:$0xff]  ;;  %v537_v21 = vld [vmem:[#allocation8 + $0x50] sm:$0xf]  ;;  %vm275_vm1 = vcmask 162816   ;;  %v536_v24 = vld [vmem:[#allocation8 + $0x48] sm:$0xff]  ;;  %vm913_vm2 = vcmask 261120  }
 0x10f   :  { %4185 = vmatprep.subr.bf16.mxu1 %v4184_v8  ;;  %v4192_v26 = vpack.c.bf16 %v536_v24, %v531_v20  ;;  %v816_v28 = vld [vmem:[#allocation3 + $0x18] sm:$0xff]  ;;  %v821_v29 = vld [vmem:[#allocation3 + $0x40] sm:$0xff]  ;;  %v815_v36 = vld [vmem:[#allocation3 + $0x10] sm:$0xff]  ;;  %s5344_s9 = smov 64   ;;  %vm1583_vm3 = vcmask 523264   ;;  %vm2394_vm4 = vcmask 654336  }
 0x110   :  { %4187 = vmatpush1.bf16.msra.mxu1 %v4186_v13  ;;  %v541_v34 = vld [vmem:[#allocation8 + $0x70] sm:$0xf]  ;;  %v5719_v35 = vpack.c.bf16 %v821_v29, %v816_v28  ;;  %v826_v39 = vld [vmem:[#allocation3 + $0x68] sm:$0xff]  ;;  %v825_v42 = vld [vmem:[#allocation3 + $0x60] sm:$0xff]  ;;  %vm5345_vm5 = vmmov 0   ;;  %vm3143_vm6 = vcmask 130048  }
 0x111   :  { %3818 = vmatprep.subr.msk.mxu1 %vm282_vm0, %v538_v14  ;;  %v820_v37 = vld [vmem:[#allocation3 + $0x38] sm:$0xff]  ;;  %v831_v40 = vld [vmem:[#allocation3 + $0x90] sm:$0xff]  ;;  %v830_v44 = vld [vmem:[#allocation3 + $0x88] sm:$0xff]  ;;  %vm3784_vm7 = vcmask 17408  }
 0x112   :  { %v234_v1 = vld [vmem:[%s6804_s22 + $0x8] sm:$0xff]  ;;  %v239_v2 = vld [vmem:[%s6804_s22 + $0x30] sm:$0xff]  ;;  %v233_v6 = vld [vmem:[%s6804_s22] sm:$0xff]  ;;  %v5728_v41 = vpack.c.bf16 %v820_v37, %v815_v36  ;;  %v5733_v43 = vpack.c.bf16 %v831_v40, %v826_v39  ;;  %v5744_v50 = vpack.c.bf16 %v830_v44, %v825_v42 }
 0x113   :  { %v4172_v4 = vpack.c.bf16 %v239_v2, %v234_v1  ;;  %v238_v7 = vld [vmem:[%s6804_s22 + $0x28] sm:$0xff]  ;;  %v244_v12 = vld [vmem:[%s6804_s22 + $0x58] sm:$0xf]  ;;  %v243_v15 = vld [vmem:[%s6804_s22 + $0x50] sm:$0xf] }
 0x114   :  { %v4174_v9 = vpack.c.bf16 %v238_v7, %v233_v6  ;;  %v236_v16 = vld [vmem:[%s6804_s22 + $0x18] sm:$0xff]  ;;  %v241_v17 = vld [vmem:[%s6804_s22 + $0x40] sm:$0xff]  ;;  %v235_v18 = vld [vmem:[%s6804_s22 + $0x10] sm:$0xff]  ;;  %3819 = vmatpush1.msk.msra.mxu1 %vm282_vm0, %v537_v21 }
 0x115   :  { %4173 = vmatprep.subr.bf16.mxu0 %v4172_v4  ;;  %v240_v19 = vld [vmem:[%s6804_s22 + $0x38] sm:$0xff]  ;;  %v5690_v22 = vld [vmem:[%s6805_s30] sm:$0xff]  ;;  %v4176_v23 = vpack.c.bf16 %v241_v17, %v236_v16  ;;  %v5701_v27 = vld [vmem:[%s6805_s30 + $0x8] sm:$0xff]  ;;  %4193 = vmatprep.subr.bf16.mxu1 %v4192_v26 }
 0x116   :  { %4175 = vmatpush1.bf16.msra.mxu0 %v4174_v9  ;;  %v4178_v25 = vpack.c.bf16 %v240_v19, %v235_v18  ;;  %3820 = vmatmul.mubr.msk.f32.vlgmr.msra.gmra.mrb[0].mxu1 %vm275_vm1, %v5690_v22  ;;  %v246_v30 = vld [vmem:[%s6804_s22 + $0x68] sm:$0xf]  ;;  %v237_v31 = vld [vmem:[%s6804_s22 + $0x20] sm:$0xff]  ;;  %v530_v45 = vld [vmem:[#allocation8 + $0x18] sm:$0xff] }
 0x117   :  { %3807 = vmatprep.subr.msk.mxu0 %vm282_vm0, %v244_v12  ;;  %v242_v32 = vld [vmem:[%s6804_s22 + $0x48] sm:$0xff]  ;;  %4195 = vmatpush3.bf16.msra.mxu1 %v4192_v26  ;;  %v245_v33 = vld [vmem:[%s6804_s22 + $0x60] sm:$0xf]  ;;  %v535_v46 = vld [vmem:[#allocation8 + $0x40] sm:$0xff] }
 0x118   :  { %654 = vmatprep.mubr.f32.mxu1 %v6750_v0  ;;  %v4180_v38 = vpack.c.bf16 %v242_v32, %v237_v31  ;;  %3999 = vmatprep.subr.msk.mxu1 %vm282_vm0, %v541_v34  ;;  %v247_v47 = vld [vmem:[%s6804_s22 + $0x70] sm:$0xf]  ;;  %v836_v48 = vld [vmem:[#allocation3 + $0xb8] sm:$0xff]  ;;  %v4188_v51 = vpack.c.bf16 %v535_v46, %v530_v45  ;;  %v835_v55 = vld [vmem:[#allocation3 + $0xb0] sm:$0xff]  ;;  %s5343_s22 = smov 32  }
 0x119   :  { %v841_v49 = vld [vmem:[#allocation3 + $0xe0] sm:$0xff]  ;;  %v529_v52 = vld [vmem:[#allocation8 + $0x10] sm:$0xff]  ;;  %v846_v57 = vld [vmem:[#allocation3 + $0x108] sm:$0xff] }
 0x11a   :  { %3808 = vmatpush1.msk.msra.mxu0 %vm282_vm0, %v243_v15  ;;  %3821 = vmatmul.mubr.msk.f32.gmra.mrb[2].mxu1 %vm275_vm1, %v5701_v27  ;;  %v534_v53 = vld [vmem:[#allocation8 + $0x38] sm:$0xff]  ;;  %v5748_v54 = vpack.c.bf16 %v841_v49, %v836_v48  ;;  %v851_v58 = vld [vmem:[#allocation3 + $0x130] sm:$0xff]  ;;  %v850_v1 = vld [vmem:[#allocation3 + $0x128] sm:$0xff] }
 0x11b   :  { %3809 = vmatmul.mubr.msk.f32.vlgmr.msra.gmra.mrb[0].mxu0 %vm275_vm1, %v5690_v22  ;;  %4177 = vmatprep.subr.bf16.mxu0 %v4176_v23  ;;  %v840_v56 = vld [vmem:[#allocation3 + $0xd8] sm:$0xff]  ;;  %v4190_v59 = vpack.c.bf16 %v534_v53, %v529_v52  ;;  %v540_v61 = vld [vmem:[#allocation8 + $0x68] sm:$0xf]  ;;  %v845_v62 = vld [vmem:[#allocation3 + $0x100] sm:$0xff]  ;;  %v5760_v63 = vpack.c.bf16 %v851_v58, %v846_v57 }
 0x11c   :  { %4179 = vmatpush1.bf16.msra.mxu0 %v4178_v25  ;;  %368 = vmatprep.mubr.f32.mxu0 %v6750_v0  ;;  %v5757_v60 = vpack.c.bf16 %v840_v56, %v835_v55  ;;  %v814_v2 = vld [vmem:[#allocation3 + $0x8] sm:$0xff]  ;;  %v819_v3 = vld [vmem:[#allocation3 + $0x30] sm:$0xff]  ;;  %v856_v4 = vld [vmem:[#allocation3 + $0x158] sm:$0xff]  ;;  %v5767_v9 = vpack.c.bf16 %v850_v1, %v845_v62 }
 0x11d   :  { %3811 = vmatprep.subr.msk.mxu0 %vm282_vm0, %v246_v30  ;;  %4000 = vmatpush3.msk.msra.mxu1 %vm282_vm0, %v541_v34  ;;  %v861_v5 = vld [vmem:[#allocation3 + $0x180] sm:$0xff]  ;;  %v818_v7 = vld [vmem:[#allocation3 + $0x28] sm:$0xff]  ;;  %v5769_v10 = vpack.c.bf16 %v819_v3, %v814_v2  ;;  %v824_v11 = vld [vmem:[#allocation3 + $0x58] sm:$0xff] }
 0x11e   :  { %4001 = vmatprep.mubr.msk.f32.mxu1 %vm275_vm1, %v5690_v22  ;;  %4237 = vmatprep.subr.bf16.mxu1 %v5719_v35  ;;  %v813_v6 = vld [vmem:[#allocation3] sm:$0xff]  ;;  %v5772_v13 = vpack.c.bf16 %v861_v5, %v856_v4  ;;  %v855_v14 = vld [vmem:[#allocation3 + $0x150] sm:$0xff]  ;;  %v860_v15 = vld [vmem:[#allocation3 + $0x178] sm:$0xff] }
 0x11f   :  { %3810 = vmatmul.mubr.msk.f32.gmra.mrb[2].mxu0 %vm275_vm1, %v5701_v27  ;;  %4002 = vmatmul.mubr.msk.f32.vlgmr.msra.gmra.mrb[4].mxu1 %vm275_vm1, %v5701_v27  ;;  %v539_v8 = vld [vmem:[#allocation8 + $0x60] sm:$0xf]  ;;  %v5774_v16 = vpack.c.bf16 %v818_v7, %v813_v6  ;;  %v871_v18 = vld [vmem:[#allocation3 + $0x1d0] sm:$0xff]  ;;  %v828_v21 = vld [vmem:[#allocation3 + $0x78] sm:$0xff]  ;;  %v5781_v23 = vpack.c.bf16 %v860_v15, %v855_v14 }
 0x120   :  { %3812 = vmatpush1.msk.msra.mxu0 %vm282_vm0, %v245_v33  ;;  %439 = vmatprep.mubr.f32.mxu0 %v6750_v0  ;;  %v829_v12 = vld [vmem:[#allocation3 + $0x80] sm:$0xff]  ;;  %v866_v17 = vld [vmem:[#allocation3 + $0x1a8] sm:$0xff]  ;;  %v823_v20 = vld [vmem:[#allocation3 + $0x50] sm:$0xff] }
 0x121   :  { %4181 = vmatprep.subr.bf16.mxu0 %v4180_v38  ;;  %4239 = vmatpush1.bf16.msra.mxu1 %v5728_v41  ;;  %v5777_v19 = vpack.c.bf16 %v829_v12, %v824_v11  ;;  %v834_v24 = vld [vmem:[#allocation3 + $0xa8] sm:$0xff]  ;;  %v839_v25 = vld [vmem:[#allocation3 + $0xd0] sm:$0xff]  ;;  %v5786_v26 = vpack.c.bf16 %v871_v18, %v866_v17  ;;  %v865_v28 = vld [vmem:[#allocation3 + $0x1a0] sm:$0xff]  ;;  %v5789_v30 = vpack.c.bf16 %v828_v21, %v823_v20 }
 0x122   :  { %4241 = vmatprep.subr.bf16.mxu1 %v5733_v43  ;;  %1052 = vmatprep.mubr.f32.mxu1 %v6750_v0  ;;  %v870_v29 = vld [vmem:[#allocation3 + $0x1c8] sm:$0xff]  ;;  %v876_v31 = vld [vmem:[#allocation3 + $0x1f8] sm:$0xff]  ;;  %v881_v32 = vld [vmem:[#allocation3 + $0x220] sm:$0xff]  ;;  %v5793_v33 = vpack.c.bf16 %v839_v25, %v834_v24 }
 0x123   :  { %3813 = vmatmul.mubr.msk.f32.vlgmr.msra.gmra.mrb[4].mxu0 %vm275_vm1, %v5690_v22  ;;  %v833_v34 = vld [vmem:[#allocation3 + $0xa0] sm:$0xff]  ;;  %v5796_v36 = vpack.c.bf16 %v870_v29, %v865_v28  ;;  %v844_v37 = vld [vmem:[#allocation3 + $0xf8] sm:$0xff]  ;;  %v5799_v39 = vpack.c.bf16 %v881_v32, %v876_v31  ;;  %v875_v40 = vld [vmem:[#allocation3 + $0x1f0] sm:$0xff] }
 0x124   :  { %4183 = vmatpush3.bf16.msra.mxu0 %v4180_v38  ;;  %445 = vmatprep.mubr.f32.mxu0 %v6750_v0  ;;  %v849_v38 = vld [vmem:[#allocation3 + $0x120] sm:$0xff]  ;;  %v880_v42 = vld [vmem:[#allocation3 + $0x218] sm:$0xff]  ;;  %v886_v45 = vld [vmem:[#allocation3 + $0x248] sm:$0xff] }
 0x125   :  { %3990 = vmatprep.subr.msk.mxu0 %vm282_vm0, %v247_v47  ;;  %4243 = vmatpush1.bf16.msra.mxu1 %v5744_v50  ;;  %v891_v46 = vld [vmem:[#allocation3 + $0x270] sm:$0xff]  ;;  %v848_v49 = vld [vmem:[#allocation3 + $0x118] sm:$0xff]  ;;  %v854_v52 = vld [vmem:[#allocation3 + $0x148] sm:$0xff] }
 0x126   :  { %4245 = vmatprep.subr.bf16.mxu1 %v5748_v54  ;;  %v843_v48 = vld [vmem:[#allocation3 + $0xf0] sm:$0xff]  ;;  %v5814_v53 = vpack.c.bf16 %v891_v46, %v886_v45  ;;  %v885_v55 = vld [vmem:[#allocation3 + $0x240] sm:$0xff]  ;;  %v890_v56 = vld [vmem:[#allocation3 + $0x268] sm:$0xff] }
 0x127   :  { %3814 = vmatmul.mubr.msk.f32.gmra.mrb[6].mxu0 %vm275_vm1, %v5701_v27  ;;  %v5817_v57 = vpack.c.bf16 %v848_v49, %v843_v48  ;;  %v896_v58 = vld [vmem:[#allocation3 + $0x298] sm:$0xff]  ;;  %v853_v62 = vld [vmem:[#allocation3 + $0x140] sm:$0xff]  ;;  %v858_v1 = vld [vmem:[#allocation3 + $0x168] sm:$0xff]  ;;  %v5823_v2 = vpack.c.bf16 %v890_v56, %v885_v55 }
 0x128   :  { %3991 = vmatpush3.msk.msra.mxu0 %vm282_vm0, %v247_v47  ;;  %3992 = vmatprep.mubr.msk.f32.mxu0 %vm275_vm1, %v5690_v22  ;;  %v5808_v47 = vpack.c.bf16 %v849_v38, %v844_v37  ;;  %v864_v3 = vld [vmem:[#allocation3 + $0x198] sm:$0xff]  ;;  %v869_v4 = vld [vmem:[#allocation3 + $0x1c0] sm:$0xff]  ;;  %v895_v6 = vld [vmem:[#allocation3 + $0x290] sm:$0xff] }
 0x129   :  { %4189 = vmatprep.subr.bf16.mxu0 %v4188_v51  ;;  %4247 = vmatpush1.bf16.msra.mxu1 %v5757_v60  ;;  %v5811_v51 = vpack.c.bf16 %v880_v42, %v875_v40  ;;  %v900_v7 = vld [vmem:[#allocation3 + $0x2b8] sm:$0xff]  ;;  %v906_v11 = vld [vmem:[#allocation3 + $0x2e8] sm:$0xff]  ;;  %v911_v12 = vld [vmem:[#allocation3 + $0x310] sm:$0xff]  ;;  %v5832_v14 = vpack.c.bf16 %v869_v4, %v864_v3 }
 0x12a   :  { %4249 = vmatprep.subr.bf16.mxu1 %v5760_v63  ;;  %v863_v15 = vld [vmem:[#allocation3 + $0x190] sm:$0xff]  ;;  %v868_v17 = vld [vmem:[#allocation3 + $0x1b8] sm:$0xff]  ;;  %v5835_v18 = vpack.c.bf16 %v900_v7, %v895_v6  ;;  %v874_v20 = vld [vmem:[#allocation3 + $0x1e8] sm:$0xff]  ;;  %v5838_v24 = vpack.c.bf16 %v911_v12, %v906_v11 }
 0x12b   :  { %3993 = vmatmul.mubr.msk.f32.vlgmr.msra.gmra.mrb[8].mxu0 %vm275_vm1, %v5701_v27  ;;  %v879_v21 = vld [vmem:[#allocation3 + $0x210] sm:$0xff]  ;;  %v905_v25 = vld [vmem:[#allocation3 + $0x2e0] sm:$0xff]  ;;  %v910_v28 = vld [vmem:[#allocation3 + $0x308] sm:$0xff]  ;;  %v5841_v29 = vpack.c.bf16 %v868_v17, %v863_v15 }
 0x12c   :  { %4191 = vmatpush1.bf16.msra.mxu0 %v4190_v59  ;;  %725 = vmatprep.mubr.f32.mxu0 %v6750_v0  ;;  %v901_v59 = vld [vmem:[#allocation3 + $0x2c0] sm:$0xff]  ;;  %v1203_v32 = vld [vmem:[#allocation9 + $0x30] sm:$0xff]  ;;  %v5847_v38 = vpack.c.bf16 %v910_v28, %v905_v25  ;;  %v884_v40 = vld [vmem:[#allocation3 + $0x238] sm:$0xff] }
 0x12d   :  { %3822 = vmatprep.subr.msk.mxu0 %vm282_vm0, %v540_v61  ;;  %4251 = vmatpush1.bf16.msra.mxu1 %v5767_v9  ;;  %v5826_v5 = vpack.c.bf16 %v901_v59, %v896_v58  ;;  %v1198_v31 = vld [vmem:[#allocation9 + $0x8] sm:$0xff]  ;;  %v1197_v46 = vld [vmem:[#allocation9] sm:$0xff]  ;;  %v883_v56 = vld [vmem:[#allocation3 + $0x230] sm:$0xff] }
 0x12e   :  { %4253 = vmatprep.subr.bf16.mxu1 %v5772_v13  ;;  %v878_v37 = vld [vmem:[#allocation3 + $0x208] sm:$0xff]  ;;  %v889_v42 = vld [vmem:[#allocation3 + $0x260] sm:$0xff]  ;;  %v5850_v45 = vpack.c.bf16 %v1203_v32, %v1198_v31  ;;  %v888_v58 = vld [vmem:[#allocation3 + $0x258] sm:$0xff] }
 0x12f   :  { %v1202_v48 = vld [vmem:[#allocation9 + $0x28] sm:$0xff]  ;;  %v5856_v55 = vpack.c.bf16 %v889_v42, %v884_v40  ;;  %v1207_v4 = vld [vmem:[#allocation9 + $0x50] sm:$0xff]  ;;  %v1212_v6 = vld [vmem:[#allocation9 + $0x78] sm:$0xff]  ;;  %v5865_v7 = vpack.c.bf16 %v888_v58, %v883_v56 }
 0x130   :  { %3823 = vmatpush1.msk.msra.mxu0 %vm282_vm0, %v539_v8  ;;  %v5829_v8 = vpack.c.bf16 %v858_v1, %v853_v62  ;;  %v5859_v59 = vpack.c.bf16 %v1202_v48, %v1197_v46  ;;  %v894_v62 = vld [vmem:[#allocation3 + $0x288] sm:$0xff]  ;;  %v899_v1 = vld [vmem:[#allocation3 + $0x2b0] sm:$0xff]  ;;  %v893_v17 = vld [vmem:[#allocation3 + $0x280] sm:$0xff] }
 0x131   :  { %4197 = vmatprep.subr.bf16.mxu0 %v5769_v10  ;;  %3824 = vmatmul.mubr.msk.f32.vlgmr.msra.gmra.mrb[10].mxu0 %vm275_vm1, %v5690_v22  ;;  %v838_v22 = vld [vmem:[#allocation3 + $0xc8] sm:$0xff]  ;;  %v5869_v15 = vpack.c.bf16 %v899_v1, %v894_v62  ;;  %v904_v25 = vld [vmem:[#allocation3 + $0x2d8] sm:$0xff]  ;;  %v909_v28 = vld [vmem:[#allocation3 + $0x300] sm:$0xff] }
 0x132   :  { %4199 = vmatpush1.bf16.msra.mxu0 %v5774_v16  ;;  %731 = vmatprep.mubr.f32.mxu0 %v6750_v0  ;;  %v5804_v44 = vpack.c.bf16 %v838_v22, %v833_v34  ;;  %v5844_v34 = vpack.c.bf16 %v879_v21, %v874_v20  ;;  %v873_v22 = vld [vmem:[#allocation3 + $0x1e0] sm:$0xff]  ;;  %v1223_v12 = vld [vmem:[#allocation9 + $0xd0] sm:$0xff]  ;;  %v5872_v21 = vpack.c.bf16 %v1212_v6, %v1207_v4  ;;  %v1228_v40 = vld [vmem:[#allocation9 + $0xf8] sm:$0xff] }
 0x133   :  { %4201 = vmatprep.subr.bf16.mxu0 %v5777_v19  ;;  %4255 = vmatpush1.bf16.msra.mxu1 %v5781_v23  ;;  %v5853_v49 = vpack.c.bf16 %v878_v37, %v873_v22  ;;  %v1218_v11 = vld [vmem:[#allocation9 + $0xa8] sm:$0xff]  ;;  %v1217_v32 = vld [vmem:[#allocation9 + $0xa0] sm:$0xff]  ;;  %v5882_v46 = vpack.c.bf16 %v909_v28, %v904_v25  ;;  %v903_v48 = vld [vmem:[#allocation3 + $0x2d0] sm:$0xff] }
 0x134   :  { %4257 = vmatprep.subr.bf16.mxu1 %v5786_v26  ;;  %v898_v20 = vld [vmem:[#allocation3 + $0x2a8] sm:$0xff]  ;;  %6806 = vst [vmem:[#allocation33_spill] sm:$0xff] %v5872_v21  ;;  %v5876_v31 = vpack.c.bf16 %v1223_v12, %v1218_v11  ;;  %v1233_v42 = vld [vmem:[#allocation9 + $0x120] sm:$0xff]  ;;  %v1232_v62 = vld [vmem:[#allocation9 + $0x118] sm:$0xff] }
 0x135   :  { %3825 = vmatmul.mubr.msk.f32.gmra.mrb[12].mxu0 %vm275_vm1, %v5701_v27  ;;  %v859_v27 = vld [vmem:[#allocation3 + $0x170] sm:$0xff]  ;;  %v1222_v22 = vld [vmem:[#allocation9 + $0xc8] sm:$0xff]  ;;  %v5879_v37 = vpack.c.bf16 %v898_v20, %v893_v17  ;;  %v5888_v56 = vpack.c.bf16 %v1233_v42, %v1228_v40  ;;  %v1237_v25 = vld [vmem:[#allocation9 + $0x140] sm:$0xff]  ;;  %v6745_v42 = vmov 0.0|0.0  }
 0x136   :  { %4203 = vmatpush1.bf16.msra.mxu0 %v5789_v30  ;;  %981 = vmatprep.mubr.f32.mxu0 %v6750_v0  ;;  %v5820_v61 = vpack.c.bf16 %v859_v27, %v854_v52  ;;  %v1208_v52 = vld [vmem:[#allocation9 + $0x58] sm:$0xff]  ;;  %v1213_v27 = vld [vmem:[#allocation9 + $0x80] sm:$0xff]  ;;  %6807 = vst [vmem:[#allocation34_spill] sm:$0xff] %v5876_v31  ;;  %v1227_v58 = vld [vmem:[#allocation9 + $0xf0] sm:$0xff] }
 0x137   :  { %4205 = vmatprep.subr.bf16.mxu0 %v5793_v33  ;;  %4259 = vmatpush1.bf16.msra.mxu1 %v5796_v36  ;;  %v5862_v3 = vpack.c.bf16 %v1213_v27, %v1208_v52  ;;  %v908_v52 = vld [vmem:[#allocation3 + $0x2f8] sm:$0xff]  ;;  %v5885_v27 = vpack.c.bf16 %v1222_v22, %v1217_v32  ;;  %6809 = vst [vmem:[#allocation36_spill] sm:$0xff] %v5888_v56  ;;  %v1238_v4 = vld [vmem:[#allocation9 + $0x148] sm:$0xff]  ;;  %v1243_v6 = vld [vmem:[#allocation9 + $0x170] sm:$0xff] }
 0x138   :  { %4261 = vmatprep.subr.bf16.mxu1 %v5799_v39  ;;  %v5891_v1 = vpack.c.bf16 %v908_v52, %v903_v48  ;;  %v817_v11 = vld [vmem:[#allocation3 + $0x20] sm:$0xff]  ;;  %v822_v12 = vld [vmem:[#allocation3 + $0x48] sm:$0xff]  ;;  %v5895_v17 = vpack.c.bf16 %v1232_v62, %v1227_v58  ;;  %v5898_v20 = vpack.c.bf16 %v1243_v6, %v1238_v4  ;;  %v1248_v22 = vld [vmem:[#allocation9 + $0x198] sm:$0xff] }
 0x139   :  { %6808 = vst [vmem:[#allocation35_spill] sm:$0xff] %v5885_v27  ;;  %v1242_v28 = vld [vmem:[#allocation9 + $0x168] sm:$0xff]  ;;  %v5901_v32 = vpack.c.bf16 %v822_v12, %v817_v11  ;;  %v1253_v40 = vld [vmem:[#allocation9 + $0x1c0] sm:$0xff]  ;;  %v827_v48 = vld [vmem:[#allocation3 + $0x70] sm:$0xff] }
 0x13a   :  { %4207 = vmatpush1.bf16.msra.mxu0 %v5804_v44  ;;  %6810 = vst [vmem:[#allocation37_spill] sm:$0xff] %v5895_v17  ;;  %6811 = vst [vmem:[#allocation38_spill] sm:$0xff] %v5898_v20  ;;  %v832_v52 = vld [vmem:[#allocation3 + $0x98] sm:$0xff]  ;;  %v5905_v58 = vpack.c.bf16 %v1242_v28, %v1237_v25  ;;  %v5909_v62 = vpack.c.bf16 %v1253_v40, %v1248_v22  ;;  %v1247_v4 = vld [vmem:[#allocation9 + $0x190] sm:$0xff] }
 0x13b   :  { %4209 = vmatprep.subr.bf16.mxu0 %v5808_v47  ;;  %4263 = vmatpush1.bf16.msra.mxu1 %v5811_v51  ;;  %v1252_v6 = vld [vmem:[#allocation9 + $0x1b8] sm:$0xff]  ;;  %v5912_v11 = vpack.c.bf16 %v832_v52, %v827_v48  ;;  %v1258_v12 = vld [vmem:[#allocation9 + $0x1e8] sm:$0xff]  ;;  %v1257_v40 = vld [vmem:[#allocation9 + $0x1e0] sm:$0xff] }
 0x13c   :  { %4265 = vmatprep.subr.bf16.mxu1 %v5814_v53  ;;  %6812 = vst [vmem:[#allocation39_spill] sm:$0xff] %v5905_v58  ;;  %6813 = vst [vmem:[#allocation40_spill] sm:$0xff] %v5909_v62  ;;  %v837_v25 = vld [vmem:[#allocation3 + $0xc0] sm:$0xff]  ;;  %v842_v28 = vld [vmem:[#allocation3 + $0xe8] sm:$0xff] }
 0x13d   :  { %6814 = vst [vmem:[#allocation41_spill] sm:$0xff] %v5912_v11  ;;  %v5923_v48 = vpack.c.bf16 %v842_v28, %v837_v25  ;;  %v1268_v52 = vld [vmem:[#allocation9 + $0x238] sm:$0xff]  ;;  %v1278_v28 = vld [vmem:[#allocation9 + $0x288] sm:$0xff] }
 0x13e   :  { %4211 = vmatpush1.bf16.msra.mxu0 %v5817_v57 }
 0x13f   :  { %4213 = vmatprep.subr.bf16.mxu0 %v5820_v61  ;;  %4267 = vmatpush1.bf16.msra.mxu1 %v5823_v2  ;;  %6818 = vst [vmem:[#allocation44_spill] sm:$0xff] %v5923_v48 }
 0x140   :  { %4269 = vmatprep.subr.bf16.mxu1 %v5826_v5 }
 0x142   :  { %4215 = vmatpush1.bf16.msra.mxu0 %v5829_v8 }
 0x143   :  { %4217 = vmatprep.subr.bf16.mxu0 %v5832_v14  ;;  %4271 = vmatpush1.bf16.msra.mxu1 %v5835_v18 }
 0x144   :  { %4273 = vmatprep.subr.bf16.mxu1 %v5838_v24 }
 0x146   :  { %4219 = vmatpush1.bf16.msra.mxu0 %v5841_v29 }
 0x147   :  { %4221 = vmatprep.subr.bf16.mxu0 %v5844_v34  ;;  %4275 = vmatpush1.bf16.msra.mxu1 %v5847_v38 }
 0x148   :  { %4307 = vmatprep.subr.bf16.mxu1 %v5850_v45 }
 0x14a   :  { %4223 = vmatpush1.bf16.msra.mxu0 %v5853_v49  ;;  %1053 = vmatmul.mubr.f32.vlgmr.msra.gmra.mrb[6].mxu1 %v6750_v0 }
 0x14b   :  { %4225 = vmatprep.subr.bf16.mxu0 %v5856_v55  ;;  %4309 = vmatpush1.bf16.msra.mxu1 %v5859_v59 }
 0x14c   :  { %1361 = vmatprep.mubr.f32.mxu1 %v6750_v0  ;;  %4311 = vmatprep.subr.bf16.mxu1 %v5862_v3 }
 0x14e   :  { %4227 = vmatpush1.bf16.msra.mxu0 %v5865_v7 }
 0x14f   :  { %4229 = vmatprep.subr.bf16.mxu0 %v5869_v15  ;;  %4313 = vmatpush1.bf16.msra.mxu1 %v5872_v21  ;;  %v862_v21 = vld [vmem:[#allocation3 + $0x188] sm:$0xff] }
 0x150   :  { %4315 = vmatprep.subr.bf16.mxu1 %v5876_v31  ;;  %v852_v31 = vld [vmem:[#allocation3 + $0x138] sm:$0xff] }
 0x152   :  { %4231 = vmatpush1.bf16.msra.mxu0 %v5879_v37 }
 0x153   :  { %4233 = vmatprep.subr.bf16.mxu0 %v5882_v46  ;;  %4317 = vmatpush1.bf16.msra.mxu1 %v5885_v27  ;;  %v847_v27 = vld [vmem:[#allocation3 + $0x110] sm:$0xff] }
 0x154   :  { %4319 = vmatprep.subr.bf16.mxu1 %v5888_v56  ;;  %v6815_v56 = vmov 0.0|0.0   ;;  %v5933_v25 = vpack.c.bf16 %v852_v31, %v847_v27  ;;  %v1288_v27 = vld [vmem:[#allocation9 + $0x2d8] sm:$0xff] }
 0x156   :  { %4235 = vmatpush1.bf16.msra.mxu0 %v5891_v1  ;;  %6821 = vst [vmem:[#allocation47_spill] sm:$0xff] %v5933_v25 }
 0x157   :  { %4276 = vmatprep.subr.bf16.mxu0 %v6745_v42  ;;  %4321 = vmatpush1.bf16.msra.mxu1 %v5895_v17  ;;  %v1263_v42 = vld [vmem:[#allocation9 + $0x210] sm:$0xff]  ;;  %v5917_v17 = vpack.c.bf16 %v1252_v6, %v1247_v4 }
 0x158   :  { %4323 = vmatprep.subr.bf16.mxu1 %v5898_v20  ;;  %v5920_v22 = vpack.c.bf16 %v1263_v42, %v1258_v12  ;;  %v1262_v20 = vld [vmem:[#allocation9 + $0x208] sm:$0xff]  ;;  %v1267_v6 = vld [vmem:[#allocation9 + $0x230] sm:$0xff]  ;;  %v1272_v12 = vld [vmem:[#allocation9 + $0x258] sm:$0xff] }
 0x159   :  { %982 = vmatmul.mubr.f32.vlgmr.msra.gmra.mrb[0].mxu0 %v6750_v0  ;;  %6816 = vst [vmem:[#allocation42_spill] sm:$0xff] %v5917_v17  ;;  %v5927_v4 = vpack.c.bf16 %v1262_v20, %v1257_v40  ;;  %v5937_v20 = vpack.c.bf16 %v1272_v12, %v1267_v6  ;;  %v1277_v40 = vld [vmem:[#allocation9 + $0x280] sm:$0xff]  ;;  %v1287_v12 = vld [vmem:[#allocation9 + $0x2d0] sm:$0xff] }
 0x15a   :  { %4278 = vmatpush1.bf16.msra.mxu0 %v5901_v32  ;;  %1123 = vmatprep.mubr.f32.mxu0 %v6750_v0  ;;  %6817 = vst [vmem:[#allocation43_spill] sm:$0xff] %v5920_v22  ;;  %v1273_v0 = vld [vmem:[#allocation9 + $0x260] sm:$0xff] }
 0x15b   :  { %4279 = vmatprep.subr.bf16.mxu0 %v6815_v56  ;;  %4325 = vmatpush1.bf16.msra.mxu1 %v5905_v58  ;;  %6819 = vst [vmem:[#allocation45_spill] sm:$0xff] %v5927_v4  ;;  %v5930_v42 = vpack.c.bf16 %v1273_v0, %v1268_v52  ;;  %v857_v58 = vld [vmem:[#allocation3 + $0x160] sm:$0xff]  ;;  %6822 = vst [vmem:[#allocation48_spill] sm:$0xff] %v5937_v20 }
 0x15c   :  { %4327 = vmatprep.subr.bf16.mxu1 %v5909_v62  ;;  %v1283_v62 = vld [vmem:[#allocation9 + $0x2b0] sm:$0xff]  ;;  %v1282_v52 = vld [vmem:[#allocation9 + $0x2a8] sm:$0xff]  ;;  %v5943_v31 = vpack.c.bf16 %v862_v21, %v857_v58 }
 0x15d   :  { %6820 = vst [vmem:[#allocation46_spill] sm:$0xff] %v5930_v42  ;;  %v5940_v0 = vpack.c.bf16 %v1283_v62, %v1278_v28  ;;  %v5947_v6 = vpack.c.bf16 %v1282_v52, %v1277_v40  ;;  %v1292_v28 = vld [vmem:[#allocation9 + $0x2f8] sm:$0xff]  ;;  %v877_v58 = vld [vmem:[#allocation3 + $0x200] sm:$0xff] }
 0x15e   :  { %4281 = vmatpush1.bf16.msra.mxu0 %v5912_v11  ;;  %6824 = vst [vmem:[#allocation50_spill] sm:$0xff] %v5943_v31  ;;  %v1201_v40 = vld [vmem:[#allocation9 + $0x20] sm:$0xff]  ;;  %v1206_v52 = vld [vmem:[#allocation9 + $0x48] sm:$0xff]  ;;  %v1276_v11 = vld [vmem:[#allocation9 + $0x278] sm:$0xff] }
 0x15f   :  { %4282 = vmatprep.subr.bf16.mxu0 %v6815_v56  ;;  %4329 = vmatpush1.bf16.msra.mxu1 %v5917_v17  ;;  %6823 = vst [vmem:[#allocation49_spill] sm:$0xff] %v5940_v0  ;;  %v867_v17 = vld [vmem:[#allocation3 + $0x1b0] sm:$0xff]  ;;  %6825 = vst [vmem:[#allocation51_spill] sm:$0xff] %v5947_v6 }
 0x160   :  { %4331 = vmatprep.subr.bf16.mxu1 %v5920_v22  ;;  %v1293_v22 = vld [vmem:[#allocation9 + $0x300] sm:$0xff] }
 0x161   :  { %v5950_v62 = vpack.c.bf16 %v1293_v22, %v1288_v27  ;;  %v5965_v27 = vpack.c.bf16 %v1206_v52, %v1201_v40  ;;  %v1221_v40 = vld [vmem:[#allocation9 + $0xc0] sm:$0xff]  ;;  %v1226_v52 = vld [vmem:[#allocation9 + $0xe8] sm:$0xff] }
 0x162   :  { %4284 = vmatpush1.bf16.msra.mxu0 %v5923_v48  ;;  %v872_v48 = vld [vmem:[#allocation3 + $0x1d8] sm:$0xff] }
 0x163   :  { %4285 = vmatprep.subr.bf16.mxu0 %v6815_v56  ;;  %4333 = vmatpush1.bf16.msra.mxu1 %v5927_v4  ;;  %6826 = vst [vmem:[#allocation52_spill] sm:$0xff] %v5950_v62  ;;  %v5953_v21 = vpack.c.bf16 %v872_v48, %v867_v17  ;;  %v5957_v4 = vpack.c.bf16 %v1292_v28, %v1287_v12  ;;  %v887_v17 = vld [vmem:[#allocation3 + $0x250] sm:$0xff]  ;;  %v892_v48 = vld [vmem:[#allocation3 + $0x278] sm:$0xff]  ;;  %6830 = vst [vmem:[#allocation56_spill] sm:$0xff] %v5965_v27 }
 0x164   :  { %4335 = vmatprep.subr.bf16.mxu1 %v5930_v42  ;;  %v882_v42 = vld [vmem:[#allocation3 + $0x228] sm:$0xff]  ;;  %v1216_v28 = vld [vmem:[#allocation9 + $0x98] sm:$0xff] }
 0x165   :  { %6827 = vst [vmem:[#allocation53_spill] sm:$0xff] %v5953_v21  ;;  %6828 = vst [vmem:[#allocation54_spill] sm:$0xff] %v5957_v4  ;;  %v5961_v22 = vpack.c.bf16 %v882_v42, %v877_v58  ;;  %v1211_v12 = vld [vmem:[#allocation9 + $0x70] sm:$0xff]  ;;  %v897_v42 = vld [vmem:[#allocation3 + $0x2a0] sm:$0xff] }
 0x166   :  { %4287 = vmatpush1.bf16.msra.mxu0 %v5933_v25  ;;  %v902_v58 = vld [vmem:[#allocation3 + $0x2c8] sm:$0xff] }
 0x167   :  { %4288 = vmatprep.subr.bf16.mxu0 %v6815_v56  ;;  %4337 = vmatpush1.bf16.msra.mxu1 %v5937_v20  ;;  %6829 = vst [vmem:[#allocation55_spill] sm:$0xff] %v5961_v22  ;;  %v5983_v20 = vpack.c.bf16 %v1226_v52, %v1221_v40  ;;  %v1210_v52 = vld [vmem:[#allocation9 + $0x68] sm:$0xff] }
 0x168   :  { %4339 = vmatprep.subr.bf16.mxu1 %v5940_v0  ;;  %v5974_v0 = vpack.c.bf16 %v1216_v28, %v1211_v12  ;;  %v1200_v12 = vld [vmem:[#allocation9 + $0x18] sm:$0xff]  ;;  %v1205_v28 = vld [vmem:[#allocation9 + $0x40] sm:$0xff]  ;;  %v1246_v25 = vld [vmem:[#allocation9 + $0x188] sm:$0xff] }
 0x169   :  { %6835 = vst [vmem:[#allocation60_spill] sm:$0xff] %v5983_v20 }
 0x16a   :  { %4290 = vmatpush1.bf16.msra.mxu0 %v5943_v31  ;;  %6833 = vst [vmem:[#allocation58_spill] sm:$0xff] %v5974_v0  ;;  %v1241_v31 = vld [vmem:[#allocation9 + $0x160] sm:$0xff] }
 0x16b   :  { %4291 = vmatprep.subr.bf16.mxu0 %v6815_v56  ;;  %4341 = vmatpush1.bf16.msra.mxu1 %v5947_v6  ;;  %v6832_v6 = vmov 0.0  }
 0x16c   :  { %4343 = vmatprep.subr.bf16.mxu1 %v5950_v62  ;;  %v5969_v62 = vpack.c.bf16 %v892_v48, %v887_v17  ;;  %v5979_v17 = vpack.c.bf16 %v902_v58, %v897_v42  ;;  %v907_v48 = vld [vmem:[#allocation3 + $0x2f0] sm:$0xff]  ;;  %v5990_v42 = vpack.c.bf16 %v1205_v28, %v1200_v12  ;;  %v1209_v12 = vld [vmem:[#allocation9 + $0x60] sm:$0xff]  ;;  %v1214_v28 = vld [vmem:[#allocation9 + $0x88] sm:$0xff] }
 0x16d   :  { %v1199_v58 = vld [vmem:[#allocation9 + $0x10] sm:$0xff] }
 0x16e   :  { %4293 = vmatpush1.bf16.msra.mxu0 %v5953_v21  ;;  %6831 = vst [vmem:[#allocation57_spill] sm:$0xff] %v5969_v62  ;;  %6834 = vst [vmem:[#allocation59_spill] sm:$0xff] %v5979_v17 }
 0x16f   :  { %4294 = vmatprep.subr.bf16.mxu0 %v6815_v56  ;;  %4345 = vmatpush1.bf16.msra.mxu1 %v5957_v4  ;;  %v912_v4 = vld [vmem:[#allocation3 + $0x318] sm:$0xff]  ;;  %6837 = vst [vmem:[#allocation62_spill] sm:$0xff] %v5990_v42 }
 0x170   :  { %4386 = vmatprep.subr.bf16.mxu1 %v6815_v56  ;;  %v5987_v21 = vpack.c.bf16 %v912_v4, %v907_v48 }
 0x172   :  { %4296 = vmatpush1.bf16.msra.mxu0 %v5961_v22  ;;  %1362 = vmatmul.mubr.f32.vlgmr.msra.gmra.mrb[2].mxu1 %v6832_v6  ;;  %v1236_v22 = vld [vmem:[#allocation9 + $0x138] sm:$0xff]  ;;  %6836 = vst [vmem:[#allocation61_spill] sm:$0xff] %v5987_v21 }
 0x173   :  { %4297 = vmatprep.subr.bf16.mxu0 %v6815_v56  ;;  %4388 = vmatpush1.bf16.msra.mxu1 %v5965_v27  ;;  %v1231_v27 = vld [vmem:[#allocation9 + $0x110] sm:$0xff] }
 0x174   :  { %1503 = vmatprep.mubr.f32.mxu1 %v6832_v6  ;;  %4389 = vmatprep.subr.bf16.mxu1 %v6815_v56  ;;  %v5993_v40 = vpack.c.bf16 %v1236_v22, %v1231_v27  ;;  %v6003_v22 = vpack.c.bf16 %v1246_v25, %v1241_v31  ;;  %v1220_v27 = vld [vmem:[#allocation9 + $0xb8] sm:$0xff]  ;;  %v1219_v25 = vld [vmem:[#allocation9 + $0xb0] sm:$0xff] }
 0x175   :  { %v1224_v31 = vld [vmem:[#allocation9 + $0xd8] sm:$0xff] }
 0x176   :  { %4299 = vmatpush1.bf16.msra.mxu0 %v5969_v62  ;;  %v1204_v62 = vld [vmem:[#allocation9 + $0x38] sm:$0xff]  ;;  %6838 = vst [vmem:[#allocation63_spill] sm:$0xff] %v5993_v40  ;;  %6841 = vst [vmem:[#allocation66_spill] sm:$0xff] %v6003_v22 }
 0x177   :  { %4300 = vmatprep.subr.bf16.mxu0 %v6815_v56  ;;  %4391 = vmatpush1.bf16.msra.mxu1 %v5974_v0  ;;  %v1215_v0 = vld [vmem:[#allocation9 + $0x90] sm:$0xff]  ;;  %v5997_v4 = vpack.c.bf16 %v1204_v62, %v1199_v58  ;;  %v6008_v62 = vpack.c.bf16 %v1214_v28, %v1209_v12  ;;  %v6019_v12 = vpack.c.bf16 %v1224_v31, %v1219_v25  ;;  %v1229_v28 = vld [vmem:[#allocation9 + $0x100] sm:$0xff] }
 0x178   :  { %4392 = vmatprep.subr.bf16.mxu1 %v6815_v56  ;;  %v6000_v48 = vpack.c.bf16 %v1215_v0, %v1210_v52  ;;  %v1230_v52 = vld [vmem:[#allocation9 + $0x108] sm:$0xff]  ;;  %v1239_v31 = vld [vmem:[#allocation9 + $0x150] sm:$0xff] }
 0x179   :  { %6839 = vst [vmem:[#allocation64_spill] sm:$0xff] %v5997_v4  ;;  %6842 = vst [vmem:[#allocation67_spill] sm:$0xff] %v6008_v62 }
 0x17a   :  { %4302 = vmatpush1.bf16.msra.mxu0 %v5979_v17  ;;  %6840 = vst [vmem:[#allocation65_spill] sm:$0xff] %v6000_v48  ;;  %v1251_v17 = vld [vmem:[#allocation9 + $0x1b0] sm:$0xff]  ;;  %6845 = vst [vmem:[#allocation70_spill] sm:$0xff] %v6019_v12 }
 0x17b   :  { %4303 = vmatprep.subr.bf16.mxu0 %v6815_v56  ;;  %4394 = vmatpush1.bf16.msra.mxu1 %v5983_v20  ;;  %v1225_v20 = vld [vmem:[#allocation9 + $0xe0] sm:$0xff] }
 0x17c   :  { %4395 = vmatprep.subr.bf16.mxu1 %v6815_v56  ;;  %v6012_v0 = vpack.c.bf16 %v1225_v20, %v1220_v27  ;;  %v1234_v27 = vld [vmem:[#allocation9 + $0x128] sm:$0xff] }
 0x17d   :  { %v6029_v25 = vpack.c.bf16 %v1234_v27, %v1229_v28  ;;  %v1249_v27 = vld [vmem:[#allocation9 + $0x1a0] sm:$0xff] }
 0x17e   :  { %4305 = vmatpush1.bf16.msra.mxu0 %v5987_v21  ;;  %v1256_v21 = vld [vmem:[#allocation9 + $0x1d8] sm:$0xff]  ;;  %6843 = vst [vmem:[#allocation68_spill] sm:$0xff] %v6012_v0 }
 0x17f   :  { %4347 = vmatprep.subr.bf16.mxu0 %v5990_v42  ;;  %4397 = vmatpush1.bf16.msra.mxu1 %v5993_v40  ;;  %v6015_v58 = vpack.c.bf16 %v1256_v21, %v1251_v17  ;;  %v1235_v40 = vld [vmem:[#allocation9 + $0x130] sm:$0xff]  ;;  %v1261_v42 = vld [vmem:[#allocation9 + $0x200] sm:$0xff]  ;;  %v1240_v17 = vld [vmem:[#allocation9 + $0x158] sm:$0xff] }
 0x180   :  { %4398 = vmatprep.subr.bf16.mxu1 %v6815_v56  ;;  %v6022_v20 = vpack.c.bf16 %v1235_v40, %v1230_v52  ;;  %v1244_v52 = vld [vmem:[#allocation9 + $0x178] sm:$0xff] }
 0x181   :  { %1124 = vmatmul.mubr.f32.vlgmr.msra.gmra.mrb[14].mxu0 %v6832_v6  ;;  %6844 = vst [vmem:[#allocation69_spill] sm:$0xff] %v6015_v58  ;;  %v6039_v28 = vpack.c.bf16 %v1244_v52, %v1239_v31  ;;  %v1259_v52 = vld [vmem:[#allocation9 + $0x1f0] sm:$0xff] }
 0x182   :  { %4349 = vmatpush1.bf16.msra.mxu0 %v5997_v4  ;;  %1432 = vmatprep.mubr.f32.mxu0 %v6832_v6  ;;  %v1266_v4 = vld [vmem:[#allocation9 + $0x228] sm:$0xff]  ;;  %6846 = vst [vmem:[#allocation71_spill] sm:$0xff] %v6022_v20 }
 0x183   :  { %4351 = vmatprep.subr.bf16.mxu0 %v6000_v48  ;;  %4400 = vmatpush1.bf16.msra.mxu1 %v6003_v22  ;;  %v6025_v21 = vpack.c.bf16 %v1266_v4, %v1261_v42  ;;  %v1245_v22 = vld [vmem:[#allocation9 + $0x180] sm:$0xff]  ;;  %v1271_v48 = vld [vmem:[#allocation9 + $0x250] sm:$0xff]  ;;  %v1250_v4 = vld [vmem:[#allocation9 + $0x1a8] sm:$0xff] }
 0x184   :  { %4401 = vmatprep.subr.bf16.mxu1 %v6815_v56  ;;  %v6032_v40 = vpack.c.bf16 %v1245_v22, %v1240_v17  ;;  %v6035_v42 = vpack.c.bf16 %v1276_v11, %v1271_v48  ;;  %v1254_v17 = vld [vmem:[#allocation9 + $0x1c8] sm:$0xff]  ;;  %v1260_v48 = vld [vmem:[#allocation9 + $0x1f8] sm:$0xff] }
 0x185   :  { %6847 = vst [vmem:[#allocation72_spill] sm:$0xff] %v6025_v21  ;;  %v6049_v31 = vpack.c.bf16 %v1254_v17, %v1249_v27  ;;  %v1274_v17 = vld [vmem:[#allocation9 + $0x268] sm:$0xff] }
 0x186   :  { %4353 = vmatpush1.bf16.msra.mxu0 %v6008_v62  ;;  %6848 = vst [vmem:[#allocation73_spill] sm:$0xff] %v6032_v40  ;;  %6849 = vst [vmem:[#allocation74_spill] sm:$0xff] %v6035_v42  ;;  %v1286_v62 = vld [vmem:[#allocation9 + $0x2c8] sm:$0xff] }
 0x187   :  { %4355 = vmatprep.subr.bf16.mxu0 %v6012_v0  ;;  %4403 = vmatpush1.bf16.msra.mxu1 %v6015_v58  ;;  %v1255_v58 = vld [vmem:[#allocation9 + $0x1d0] sm:$0xff]  ;;  %v1281_v0 = vld [vmem:[#allocation9 + $0x2a0] sm:$0xff] }
 0x188   :  { %4404 = vmatprep.subr.bf16.mxu1 %v6815_v56  ;;  %v6042_v22 = vpack.c.bf16 %v1255_v58, %v1250_v4  ;;  %v6045_v11 = vpack.c.bf16 %v1286_v62, %v1281_v0  ;;  %v1264_v4 = vld [vmem:[#allocation9 + $0x218] sm:$0xff]  ;;  %v1270_v0 = vld [vmem:[#allocation9 + $0x248] sm:$0xff] }
 0x18a   :  { %4357 = vmatpush1.bf16.msra.mxu0 %v6019_v12  ;;  %6850 = vst [vmem:[#allocation75_spill] sm:$0xff] %v6045_v11  ;;  %v1296_v12 = vld [vmem:[#allocation9 + $0x318] sm:$0xff] }
 0x18b   :  { %4359 = vmatprep.subr.bf16.mxu0 %v6022_v20  ;;  %4406 = vmatpush1.bf16.msra.mxu1 %v6025_v21  ;;  %v1265_v21 = vld [vmem:[#allocation9 + $0x220] sm:$0xff]  ;;  %v1291_v20 = vld [vmem:[#allocation9 + $0x2f0] sm:$0xff] }
 0x18c   :  { %4407 = vmatprep.subr.bf16.mxu1 %v6815_v56  ;;  %v6052_v58 = vpack.c.bf16 %v1265_v21, %v1260_v48  ;;  %v6055_v62 = vpack.c.bf16 %v1296_v12, %v1291_v20  ;;  %v1269_v21 = vld [vmem:[#allocation9 + $0x240] sm:$0xff]  ;;  %v1280_v48 = vld [vmem:[#allocation9 + $0x298] sm:$0xff] }
 0x18d   :  { %v6067_v12 = vpack.c.bf16 %v1274_v17, %v1269_v21  ;;  %v1289_v17 = vld [vmem:[#allocation9 + $0x2e0] sm:$0xff] }
 0x18e   :  { %4361 = vmatpush1.bf16.msra.mxu0 %v6029_v25  ;;  %6851 = vst [vmem:[#allocation76_spill] sm:$0xff] %v6055_v62 }
 0x18f   :  { %4363 = vmatprep.subr.bf16.mxu0 %v6032_v40  ;;  %4409 = vmatpush1.bf16.msra.mxu1 %v6035_v42  ;;  %v1275_v42 = vld [vmem:[#allocation9 + $0x270] sm:$0xff]  ;;  %v6059_v40 = vpack.c.bf16 %v1264_v4, %v1259_v52  ;;  %v1284_v52 = vld [vmem:[#allocation9 + $0x2b8] sm:$0xff]  ;;  %v1290_v4 = vld [vmem:[#allocation9 + $0x2e8] sm:$0xff] }
 0x190   :  { %4410 = vmatprep.subr.bf16.mxu1 %v6815_v56  ;;  %v6062_v27 = vpack.c.bf16 %v1275_v42, %v1270_v0  ;;  %v1279_v42 = vld [vmem:[#allocation9 + $0x290] sm:$0xff] }
 0x191   :  { %v1295_v0 = vld [vmem:[#allocation9 + $0x310] sm:$0xff] }
 0x192   :  { %4365 = vmatpush1.bf16.msra.mxu0 %v6039_v28  ;;  %v6079_v21 = vpack.c.bf16 %v1295_v0, %v1290_v4 }
 0x193   :  { %4367 = vmatprep.subr.bf16.mxu0 %v6042_v22  ;;  %4412 = vmatpush1.bf16.msra.mxu1 %v6045_v11  ;;  %v1285_v11 = vld [vmem:[#allocation9 + $0x2c0] sm:$0xff] }
 0x194   :  { %4413 = vmatprep.subr.bf16.mxu1 %v6815_v56  ;;  %v6071_v20 = vpack.c.bf16 %v1285_v11, %v1280_v48 }
 0x196   :  { %4369 = vmatpush1.bf16.msra.mxu0 %v6049_v31 }
 0x197   :  { %4371 = vmatprep.subr.bf16.mxu0 %v6052_v58  ;;  %4415 = vmatpush1.bf16.msra.mxu1 %v6055_v62  ;;  %v1294_v62 = vld [vmem:[#allocation9 + $0x308] sm:$0xff] }
 0x198   :  { %4457 = vmatprep.subr.bf16.mxu1 %v5719_v35  ;;  %v6076_v35 = vpack.c.bf16 %v1284_v52, %v1279_v42  ;;  %v6084_v11 = vpack.c.bf16 %v1294_v62, %v1289_v17 }
 0x19a   :  { %4373 = vmatpush1.bf16.msra.mxu0 %v6059_v40  ;;  %1504 = vmatmul.mubr.f32.vlgmr.msra.gmra.mrb[8].mxu1 %v6832_v6 }
 0x19b   :  { %4375 = vmatprep.subr.bf16.mxu0 %v6062_v27  ;;  %4459 = vmatpush1.bf16.msra.mxu1 %v5728_v41  ;;  %v250_v41 = vlaneseq }
 0x19c   :  { %4461 = vmatprep.subr.bf16.mxu1 %v5733_v43 }
 0x19d   :  { %v6126_v43 = vshrl.u32 %v250_v41, 7 }
 0x19e   :  { %4377 = vmatpush1.bf16.msra.mxu0 %v6067_v12 }
 0x19f   :  { %4379 = vmatprep.subr.bf16.mxu0 %v6071_v20  ;;  %4463 = vmatpush1.bf16.msra.mxu1 %v5744_v50  ;;  %v6128_v50 = vld [vmem:[#allocation11] sm:$0x1f] }
 0x1a0   :  { %4465 = vmatprep.subr.bf16.mxu1 %v5748_v54  ;;  %v268_v54 = vsub.s32 4, %v6126_v43 }
 0x1a2   :  { %4381 = vmatpush1.bf16.msra.mxu0 %v6076_v35 }
 0x1a3   :  { %4383 = vmatprep.subr.bf16.mxu0 %v6079_v21  ;;  %4467 = vmatpush1.bf16.msra.mxu1 %v5757_v60  ;;  %v260_v60 = vsub.s32 2, %v6126_v43 }
 0x1a4   :  { %4469 = vmatprep.subr.bf16.mxu1 %v5760_v63  ;;  %v563_v63 = vrot.slane %v6128_v50, %v268_v54 }
 0x1a6   :  { %4385 = vmatpush1.bf16.msra.mxu0 %v6084_v11 }
 0x1a7   :  { %4417 = vmatprep.subr.bf16.mxu0 %v5769_v10  ;;  %4471 = vmatpush1.bf16.msra.mxu1 %v5767_v9  ;;  %v248_v9 = vld [vmem:[#allocation6] sm:$0x1f] }
 0x1a8   :  { %4473 = vmatprep.subr.bf16.mxu1 %v5772_v13  ;;  %v264_v13 = vsub.s32 3, %v6126_v43 }
 0x1a9   :  { %1433 = vmatmul.mubr.f32.vlgmr.msra.gmra.mrb[12].mxu0 %v6832_v6 }
 0x1aa   :  { %4419 = vmatpush1.bf16.msra.mxu0 %v5774_v16  ;;  %v6152_v52 = vrot.slane %v6128_v50, %v264_v13 }
 0x1ab   :  { %4421 = vmatprep.subr.bf16.mxu0 %v5777_v19  ;;  %4475 = vmatpush1.bf16.msra.mxu1 %v5781_v23 }
 0x1ac   :  { %4477 = vmatprep.subr.bf16.mxu1 %v5786_v26  ;;  %v261_v26 = vrot.slane %v248_v9, %v260_v60 }
 0x1ae   :  { %4423 = vmatpush1.bf16.msra.mxu0 %v5789_v30 }
 0x1af   :  { %4425 = vmatprep.subr.bf16.mxu0 %v5793_v33  ;;  %4479 = vmatpush1.bf16.msra.mxu1 %v5796_v36  ;;  %v265_v33 = vrot.slane %v248_v9, %v264_v13 }
 0x1b0   :  { %4481 = vmatprep.subr.bf16.mxu1 %v5799_v39 }
 0x1b2   :  { %4427 = vmatpush1.bf16.msra.mxu0 %v5804_v44 }
 0x1b3   :  { %4429 = vmatprep.subr.bf16.mxu0 %v5808_v47  ;;  %4483 = vmatpush1.bf16.msra.mxu1 %v5811_v51  ;;  %v269_v47 = vrot.slane %v248_v9, %v268_v54 }
 0x1b4   :  { %4485 = vmatprep.subr.bf16.mxu1 %v5814_v53 }
 0x1b6   :  { %4431 = vmatpush1.bf16.msra.mxu0 %v5817_v57 }
 0x1b7   :  { %4433 = vmatprep.subr.bf16.mxu0 %v5820_v61  ;;  %4487 = vmatpush1.bf16.msra.mxu1 %v5823_v2 }
 0x1b8   :  { %4489 = vmatprep.subr.bf16.mxu1 %v5826_v5 }
 0x1ba   :  { %4435 = vmatpush1.bf16.msra.mxu0 %v5829_v8 }
 0x1bb   :  { %4437 = vmatprep.subr.bf16.mxu0 %v5832_v14  ;;  %4491 = vmatpush1.bf16.msra.mxu1 %v5835_v18 }
 0x1bc   :  { %4493 = vmatprep.subr.bf16.mxu1 %v5838_v24 }
 0x1be   :  { %4439 = vmatpush1.bf16.msra.mxu0 %v5841_v29 }
 0x1bf   :  { %4441 = vmatprep.subr.bf16.mxu0 %v5844_v34  ;;  %4495 = vmatpush1.bf16.msra.mxu1 %v5847_v38 }
 0x1c0   :  { %4527 = vmatprep.subr.bf16.mxu1 %v5850_v45 }
 0x1c2   :  { %4443 = vmatpush1.bf16.msra.mxu0 %v5853_v49 }
 0x1c3   :  { %4445 = vmatprep.subr.bf16.mxu0 %v5856_v55 }
 0x1c6   :  { %4447 = vmatpush1.bf16.msra.mxu0 %v5865_v7 }
 0x1c7   :  { %4449 = vmatprep.subr.bf16.mxu0 %v5869_v15 }
 0x1ca   :  { %4451 = vmatpush1.bf16.msra.mxu0 %v5879_v37 }
 0x1cb   :  { %4453 = vmatprep.subr.bf16.mxu0 %v5882_v46 }
 0x1ce   :  { %4455 = vmatpush1.bf16.msra.mxu0 %v5891_v1 }
 0x1cf   :  { %4496 = vmatprep.subr.bf16.mxu0 %v6815_v56 }
 0x1f2   :  { %v4003_v19 = vpop.f32.mrb[4].mxu1 }
 0x1f3   :  { %v804_v23 = vpop.f32.mrb[5].mxu1  ;;  %v810_v1 = vadd.f32 %v4003_v19, %v563_v63 }
 0x1f4   :  { %v6136_v30 = vadd.f32 %v804_v23, %v563_v63  ;;  %v256_v63 = vsub.s32 1, %v6126_v43 }
 0x1f6   :  { %v441_v10 = vpop.f32.mrb[4].mxu0  ;;  %v6164_v13 = vrot.slane %v248_v9, %v256_v63 }
 0x1f7   :  { %v443_v16 = vpop.f32.mrb[5].mxu0  ;;  %v442_v2 = vadd.f32 %v441_v10, %v261_v26  ;;  %v252_v10 = vsub.s32 0, %v6126_v43 }
 0x1f8   :  { %v444_v5 = vadd.f32 %v443_v16, %v265_v33 }
 0x1f9   :  { %v6166_v16 = vrot.slane %v248_v9, %v252_v10 }
 0x1fa   :  { %v447_v36 = vpop.f32.mrb[6].mxu0 }
 0x1fb   :  { %v6138_v39 = vadd.f32 %v447_v36, %v261_v26  ;;  %v449_v44 = vpop.f32.mrb[7].mxu0 }
 0x1fc   :  { %v6140_v51 = vadd.f32 %v449_v44, %v265_v33 }
 0x1fe   :  { %v3994_v53 = vpop.f32.mrb[8].mxu0 }
 0x1ff   :  { %v6142_v57 = vadd.f32 %v3994_v53, %v269_v47  ;;  %v518_v61 = vpop.f32.mrb[9].mxu0 }
 0x200   :  { %v519_v55 = vadd.f32 %v518_v61, %v269_v47 }
 0x21d   :  { %v1054_v8 = vpop.f32.mrb[6].mxu1 }
 0x21e   :  { %v6144_v14 = vadd.f32 %v1054_v8, %v442_v2  ;;  %v1056_v18 = vpop.f32.mrb[7].mxu1 }
 0x21f   :  { %v6146_v24 = vadd.f32 %v1056_v18, %v444_v5 }
 0x221   :  { %4872 = vtanh.f32 %v6146_v24 }
 0x22b   :  { %v4873_v29 = vpop.eup %4872 }
 0x22c   :  { %v983_v34 = vpop.f32.mrb[0].mxu0  ;;  %1164 = vrot.lane.b32.xlu0 %v4873_v29, %s5343_s22 }
 0x22d   :  { %v985_v38 = vpop.f32.mrb[1].mxu0  ;;  %v4800_v23 = vadd.f32 %v983_v34, %v6166_v16  ;;  %v6174_v34 = vrot.slane %v6128_v50, %v256_v63 }
 0x22e   :  { %v4801_v19 = vadd.f32 %v985_v38, %v6164_v13  ;;  %v6177_v38 = vrot.slane %v6128_v50, %v252_v10 }
 0x22f   :  { %v3829_v33 = vmul.f32 -1.442695, %v4800_v23 }
 0x230   :  { %v3830_v26 = vmul.f32 -1.442695, %v4801_v19 }
 0x245   :  { %v1363_v45 = vpop.f32.mrb[2].mxu1 }
 0x246   :  { %v1365_v49 = vpop.f32.mrb[3].mxu1 }
 0x254   :  { %v1125_v7 = vpop.f32.mrb[14].mxu0 }
 0x255   :  { %v1133_v15 = vadd.f32 %v1125_v7, %v519_v55  ;;  %v1127_v37 = vpop.f32.mrb[15].mxu0  ;;  %v4815_v55 = vadd.f32 %v1365_v49, %v6174_v34  ;;  %v4814_v7 = vadd.f32 %v1363_v45, %v6177_v38  ;;  %v3831_v45 = vmul.f32 -1.442695, %v6144_v14 }
 0x257   :  { %4874 = vtanh.f32 %v1133_v15  ;;  %v3834_v15 = vmul.f32 -1.442695, %v4815_v55  ;;  %v3833_v37 = vmul.f32 -1.442695, %v4814_v7 }
 0x261   :  { %v4875_v46 = vpop.eup %4874 }
 0x262   :  { %1166 = vrot.lane.b32.xlu0 %v4875_v46, %s5343_s22 }
 0x26d   :  { %v1505_v62 = vpop.f32.mrb[8].mxu1 }
 0x26e   :  { %v1513_v48 = vadd.f32 %v1505_v62, %v810_v1  ;;  %v1507_v42 = vpop.f32.mrb[9].mxu1 }
 0x27c   :  { %v6154_v4 = vpop.f32.mrb[12].mxu0 }
 0x27d   :  { %v1436_v0 = vpop.f32.mrb[13].mxu0 }
 0x27e   :  { %v6157_v17 = vadd.f32 %v1436_v0, %v6152_v52 }
 0x280   :  { %4876 = vtanh.f32 %v6157_v17 }
 0x281   :  { %4878 = vtanh.f32 %v1513_v48 }
 0x282   :  { %4880 = vpow2.f32 %v3830_v26 }
 0x283   :  { %4882 = vpow2.f32 %v3829_v33 }
 0x28a   :  { %v4877_v41 = vpop.eup %4876 }
 0x28b   :  { %1544 = vrot.lane.b32.xlu1 %v4877_v41, %s5343_s22  ;;  %v4879_v54 = vpop.eup %4878 }
 0x28c   :  { %v4881_v36 = vpop.eup %4880 }
 0x28d   :  { %v4883_v44 = vpop.eup %4882  ;;  %v1147_v47 = vadd.f32 1.0, %v4881_v36 }
 0x28e   :  { %v1146_v53 = vadd.f32 1.0, %v4883_v44 }
 0x28f   :  { %1546 = vrot.lane.b32.xlu1 %v4879_v54, %s5343_s22  ;;  %4884 = vrcp.f32 %v1147_v47 }
 0x290   :  { %4886 = vrcp.f32 %v1146_v53 }
 0x291   :  { %4888 = vpow2.f32 %v3834_v15 }
 0x292   :  { %4890 = vpow2.f32 %v3833_v37 }
 0x299   :  { %v4885_v2 = vpop.eup %4884 }
 0x29a   :  { %v4887_v9 = vpop.eup %4886  ;;  %v1160_v36 = vmul.f32 0.0, %v4885_v2 }
 0x29b   :  { %v4889_v46 = vpop.eup %4888 }
 0x29c   :  { %v4891_v1 = vpop.eup %4890  ;;  %v1527_v62 = vadd.f32 1.0, %v4889_v46 }
 0x29d   :  { %v1526_v48 = vadd.f32 1.0, %v4891_v1 }
 0x29e   :  { %v1165_v61 = vpop.permute.xlu0 %1164  ;;  %4892 = vrcp.f32 %v1527_v62 }
 0x29f   :  { %4894 = vrcp.f32 %v1526_v48  ;;  %v3832_v48 = vmul.f32 -1.442695, %v6146_v24 }
 0x2a0   :  { %4896 = vpow2.f32 %v3831_v45 }
 0x2a8   :  { %v4893_v0 = vpop.eup %4892 }
 0x2a9   :  { %v4895_v54 = vpop.eup %4894  ;;  %v1540_v55 = vmul.f32 0.0, %v4893_v0 }
 0x2aa   :  { %v4897_v19 = vpop.eup %4896 }
 0x2ab   :  { %v1148_v23 = vadd.f32 1.0, %v4897_v19  ;;  %v3836_v19 = vmul.f32 -1.442695, %v6157_v17 }
 0x2ad   :  { %4898 = vrcp.f32 %v1148_v23 }
 0x2b7   :  { %v4899_v26 = vpop.eup %4898 }
 0x2b8   :  { %v1161_v47 = vmul.f32 0.0, %v4899_v26 }
 0x2d4   :  { %v1167_v5 = vpop.permute.xlu0 %1166 }
 0x2d5   :  { %v1168_v8 = vsel %vm913_vm2, %v1165_v61, %v1167_v5  ;;  %v1172_v18 = vmul.f32 %v4885_v2, %v1167_v5 }
 0x2d6   :  { %v1171_v29 = vmul.f32 %v4887_v9, %v1168_v8  ;;  %v6193_v9 = vrot.slane %v6128_v50, %v260_v60 }
 0x2d7   :  { %1177 = vrot.lane.b32.xlu1 %v1172_v18, %s5343_s22 }
 0x2d8   :  { %1175 = vrot.lane.b32.xlu0 %v1171_v29, %s5343_s22  ;;  %v4818_v14 = vadd.f32 %v6154_v4, %v6193_v9 }
 0x2da   :  { %v3835_v2 = vmul.f32 -1.442695, %v4818_v14 }
 0x2fd   :  { %v1545_v42 = vpop.permute.xlu1 %1544 }
 0x301   :  { %v1547_v41 = vpop.permute.xlu1 %1546 }
 0x302   :  { %v1548_v63 = vsel %vm913_vm2, %v1545_v42, %v1547_v41  ;;  %v1552_v10 = vmul.f32 %v4893_v0, %v1547_v41 }
 0x303   :  { %v1551_v49 = vmul.f32 %v4895_v54, %v1548_v63 }
 0x304   :  { %1557 = vrot.lane.b32.xlu1 %v1552_v10, %s5343_s22 }
 0x305   :  { %1555 = vrot.lane.b32.xlu0 %v1551_v49, %s5343_s22 }
 0x349   :  { %v1178_v33 = vpop.permute.xlu1 %1177 }
 0x34a   :  { %v1176_v44 = vpop.permute.xlu0 %1175 }
 0x34b   :  { %v1179_v53 = vsel %vm913_vm2, %v1176_v44, %v1178_v33  ;;  %v6186_v61 = vadd.f32 %v1176_v44, %v1160_v36 }
 0x34c   :  { %v6188_v5 = vadd.f32 %v1179_v53, %v1161_v47 }
 0x34d   :  { %4900 = vtanh.f32 %v6186_v61 }
 0x34e   :  { %4902 = vtanh.f32 %v6188_v5 }
 0x34f   :  { %4904 = vpow2.f32 %v3835_v2 }
 0x357   :  { %v4901_v8 = vpop.eup %4900 }
 0x358   :  { %v4903_v18 = vpop.eup %4902  ;;  %1188 = vrot.lane.b32.xlu0 %v4901_v8, %s5343_s22  ;;  %v6852_v8 = vld [vmem:[#allocation41_spill] sm:$0xff] }
 0x359   :  { %1190 = vrot.lane.b32.xlu1 %v4903_v18, %s5343_s22  ;;  %v4905_v29 = vpop.eup %4904  ;;  %v6853_v18 = vld [vmem:[#allocation33_spill] sm:$0xff] }
 0x35a   :  { %v1528_v43 = vadd.f32 1.0, %v4905_v29  ;;  %v6854_v29 = vld [vmem:[#allocation34_spill] sm:$0xff] }
 0x35c   :  { %4906 = vrcp.f32 %v1528_v43  ;;  %v6855_v43 = vld [vmem:[#allocation44_spill] sm:$0xff] }
 0x366   :  { %v4907_v50 = vpop.eup %4906 }
 0x367   :  { %v1541_v7 = vmul.f32 0.0, %v4907_v50 }
 0x376   :  { %v1558_v60 = vpop.permute.xlu1 %1557 }
 0x377   :  { %v1556_v15 = vpop.permute.xlu0 %1555 }
 0x378   :  { %v1559_v37 = vsel %vm913_vm2, %v1556_v15, %v1558_v60  ;;  %v6202_v46 = vadd.f32 %v1556_v15, %v1540_v55  ;;  %v6858_v60 = vld [vmem:[#allocation47_spill] sm:$0xff]  ;;  %v6861_v55 = vld [vmem:[#allocation50_spill] sm:$0xff]  ;;  %v6863_v15 = vld [vmem:[#allocation40_spill] sm:$0xff] }
 0x379   :  { %v6204_v4 = vadd.f32 %v1559_v37, %v1541_v7  ;;  %v6862_v7 = vld [vmem:[#allocation39_spill] sm:$0xff]  ;;  %v6864_v37 = vld [vmem:[#allocation53_spill] sm:$0xff] }
 0x37a   :  { %4908 = vtanh.f32 %v6202_v46 }
 0x37b   :  { %4910 = vtanh.f32 %v6204_v4 }
 0x37c   :  { %4912 = vpow2.f32 %v3832_v48  ;;  %v6867_v48 = vld [vmem:[#allocation55_spill] sm:$0xff] }
 0x384   :  { %v4909_v1 = vpop.eup %4908 }
 0x385   :  { %v4911_v62 = vpop.eup %4910  ;;  %1568 = vrot.lane.b32.xlu0 %v4909_v1, %s5343_s22  ;;  %v6865_v1 = vld [vmem:[#allocation42_spill] sm:$0xff] }
 0x386   :  { %1570 = vrot.lane.b32.xlu1 %v4911_v62, %s5343_s22  ;;  %v4913_v42 = vpop.eup %4912  ;;  %v6866_v62 = vld [vmem:[#allocation43_spill] sm:$0xff] }
 0x387   :  { %v1149_v0 = vadd.f32 1.0, %v4913_v42  ;;  %v6868_v42 = vld [vmem:[#allocation45_spill] sm:$0xff] }
 0x389   :  { %4914 = vrcp.f32 %v1149_v0  ;;  %v6869_v0 = vld [vmem:[#allocation46_spill] sm:$0xff] }
 0x38a   :  { %4916 = vpow2.f32 %v3836_v19  ;;  %v6876_v19 = vld [vmem:[#allocation61_spill] sm:$0xff] }
 0x393   :  { %v4915_v10 = vpop.eup %4914 }
 0x394   :  { %v4917_v24 = vpop.eup %4916 }
 0x395   :  { %v1529_v23 = vadd.f32 1.0, %v4917_v24  ;;  %v6877_v24 = vld [vmem:[#allocation62_spill] sm:$0xff] }
 0x397   :  { %4918 = vrcp.f32 %v1529_v23  ;;  %v6878_v23 = vld [vmem:[#allocation54_spill] sm:$0xff] }
 0x3ca   :  { %v1189_v41 = vpop.permute.xlu0 %1188 }
 0x3cb   :  { %v1195_v54 = vmul.f32 %v4899_v26, %v1189_v41  ;;  %v1191_v63 = vpop.permute.xlu1 %1190  ;;  %v4919_v26 = vpop.eup %4918 }
 0x3cc   :  { %v1192_v49 = vsel %vm913_vm2, %v1189_v41, %v1191_v63  ;;  %v6870_v41 = vld [vmem:[#allocation57_spill] sm:$0xff] }
 0x3cd   :  { %v1196_v45 = vmul.f32 %v4915_v10, %v1192_v49  ;;  %1579 = vrot.lane.b32.xlu0 %v1195_v54, %s5344_s9  ;;  %v6871_v54 = vld [vmem:[#allocation48_spill] sm:$0xff]  ;;  %v6872_v63 = vld [vmem:[#allocation49_spill] sm:$0xff]  ;;  %v6873_v10 = vld [vmem:[#allocation59_spill] sm:$0xff] }
 0x3ce   :  { %v6874_v49 = vld [vmem:[#allocation51_spill] sm:$0xff] }
 0x3cf   :  { %1581 = vrot.lane.b32.xlu1 %v1196_v45, %s5344_s9  ;;  %v6875_v45 = vld [vmem:[#allocation52_spill] sm:$0xff] }
 0x3f7   :  { %v1569_v33 = vpop.permute.xlu0 %1568 }
 0x3f8   :  { %v1575_v36 = vmul.f32 %v4907_v50, %v1569_v33  ;;  %v1571_v44 = vpop.permute.xlu1 %1570  ;;  %v6857_v50 = vld [vmem:[#allocation36_spill] sm:$0xff] }
 0x3f9   :  { %v1572_v47 = vsel %vm913_vm2, %v1569_v33, %v1571_v44  ;;  %v6879_v33 = vld [vmem:[#allocation64_spill] sm:$0xff] }
 0x3fa   :  { %v1576_v53 = vmul.f32 %v4919_v26, %v1572_v47  ;;  %1870 = vrot.lane.b32.xlu0 %v1575_v36, %s5344_s9  ;;  %v6880_v36 = vld [vmem:[#allocation65_spill] sm:$0xff] }
 0x3fc   :  { %1872 = vrot.lane.b32.xlu1 %v1576_v53, %s5344_s9  ;;  %v6881_v53 = vld [vmem:[#allocation67_spill] sm:$0xff] }
 0x43f   :  { %v1580_v14 = vpop.permute.xlu0 %1579 }
 0x441   :  { %v6218_v2 = vpop.permute.xlu1 %1581 }
 0x442   :  { %3837 = vmatprep.mubr.msk.f32.mxu0 %vm913_vm2, %v6218_v2  ;;  %3838 = vmatprep.mubr.msk.f32.mxu1 %vm913_vm2, %v6218_v2  ;;  %v6226_v17 = vsel %vm1583_vm3, %v1580_v14, %v6218_v2  ;;  %v6882_v14 = vld [vmem:[#allocation56_spill] sm:$0xff] }
 0x443   :  { %1653 = vmatmul.mubr.f32.vlgmr.msra.gmra.mrb[2].mxu0 %v6226_v17  ;;  %1724 = vmatmul.mubr.f32.vlgmr.msra.gmra.mrb[10].mxu1 %v6226_v17 }
 0x444   :  { %4498 = vmatpush1.bf16.msra.mxu0 %v5901_v32  ;;  %3839 = vmatprep.mubr.msk.f32.mxu0 %vm913_vm2, %v6218_v2  ;;  %v6856_v32 = vld [vmem:[#allocation35_spill] sm:$0xff] }
 0x445   :  { %4499 = vmatprep.subr.bf16.mxu0 %v6815_v56  ;;  %4529 = vmatpush1.bf16.msra.mxu1 %v5859_v59  ;;  %v6859_v59 = vld [vmem:[#allocation37_spill] sm:$0xff] }
 0x446   :  { %4531 = vmatprep.subr.bf16.mxu1 %v5862_v3  ;;  %v6860_v3 = vld [vmem:[#allocation38_spill] sm:$0xff] }
 0x448   :  { %4501 = vmatpush1.bf16.msra.mxu0 %v6852_v8  ;;  %v6883_v8 = vld [vmem:[#allocation68_spill] sm:$0xff] }
 0x449   :  { %4502 = vmatprep.subr.bf16.mxu0 %v6815_v56  ;;  %4533 = vmatpush1.bf16.msra.mxu1 %v6853_v18  ;;  %v6884_v18 = vld [vmem:[#allocation70_spill] sm:$0xff] }
 0x44a   :  { %4535 = vmatprep.subr.bf16.mxu1 %v6854_v29  ;;  %v6885_v29 = vld [vmem:[#allocation58_spill] sm:$0xff] }
 0x44c   :  { %4504 = vmatpush1.bf16.msra.mxu0 %v6855_v43  ;;  %v6886_v43 = vld [vmem:[#allocation71_spill] sm:$0xff] }
 0x44d   :  { %4505 = vmatprep.subr.bf16.mxu0 %v6815_v56  ;;  %4537 = vmatpush1.bf16.msra.mxu1 %v6856_v32  ;;  %v6887_v32 = vld [vmem:[#allocation60_spill] sm:$0xff] }
 0x44e   :  { %4539 = vmatprep.subr.bf16.mxu1 %v6857_v50  ;;  %v6888_v50 = vld [vmem:[#allocation73_spill] sm:$0xff] }
 0x450   :  { %4507 = vmatpush1.bf16.msra.mxu0 %v6858_v60  ;;  %v6889_v60 = vld [vmem:[#allocation63_spill] sm:$0xff] }
 0x451   :  { %4508 = vmatprep.subr.bf16.mxu0 %v6815_v56  ;;  %4541 = vmatpush1.bf16.msra.mxu1 %v6859_v59  ;;  %v6890_v59 = vld [vmem:[#allocation66_spill] sm:$0xff] }
 0x452   :  { %4543 = vmatprep.subr.bf16.mxu1 %v6860_v3  ;;  %v2163_v3 = vld [vmem:[%s6723_s7 + $0x28] sm:$0xff] }
 0x454   :  { %4510 = vmatpush1.bf16.msra.mxu0 %v6861_v55 }
 0x455   :  { %4511 = vmatprep.subr.bf16.mxu0 %v6815_v56  ;;  %4545 = vmatpush1.bf16.msra.mxu1 %v6862_v7  ;;  %v2164_v7 = vld [vmem:[%s6723_s7 + $0x30] sm:$0xff] }
 0x456   :  { %4547 = vmatprep.subr.bf16.mxu1 %v6863_v15 }
 0x458   :  { %4513 = vmatpush1.bf16.msra.mxu0 %v6864_v37  ;;  %v2166_v37 = vld [vmem:[%s6723_s7 + $0x40] sm:$0xff] }
 0x459   :  { %4514 = vmatprep.subr.bf16.mxu0 %v6815_v56  ;;  %4549 = vmatpush1.bf16.msra.mxu1 %v6865_v1  ;;  %v2167_v1 = vld [vmem:[%s6723_s7 + $0x48] sm:$0xff] }
 0x45a   :  { %4551 = vmatprep.subr.bf16.mxu1 %v6866_v62  ;;  %v4679_v62 = vpack.c.bf16 %v2167_v1, %v2166_v37 }
 0x45c   :  { %4516 = vmatpush1.bf16.msra.mxu0 %v6867_v48  ;;  %v2168_v48 = vld [vmem:[%s6723_s7 + $0x50] sm:$0xff] }
 0x45d   :  { %4517 = vmatprep.subr.bf16.mxu0 %v6815_v56  ;;  %4553 = vmatpush1.bf16.msra.mxu1 %v6868_v42  ;;  %v2169_v42 = vld [vmem:[%s6723_s7 + $0x58] sm:$0xff] }
 0x45e   :  { %4555 = vmatprep.subr.bf16.mxu1 %v6869_v0  ;;  %v4682_v0 = vpack.c.bf16 %v2169_v42, %v2168_v48 }
 0x460   :  { %4519 = vmatpush1.bf16.msra.mxu0 %v6870_v41  ;;  %v2170_v41 = vld [vmem:[%s6723_s7 + $0x60] sm:$0xff] }
 0x461   :  { %4520 = vmatprep.subr.bf16.mxu0 %v6815_v56  ;;  %4557 = vmatpush1.bf16.msra.mxu1 %v6871_v54  ;;  %v2171_v54 = vld [vmem:[%s6723_s7 + $0x68] sm:$0xff] }
 0x462   :  { %4559 = vmatprep.subr.bf16.mxu1 %v6872_v63  ;;  %v4685_v63 = vpack.c.bf16 %v2171_v54, %v2170_v41 }
 0x464   :  { %4522 = vmatpush1.bf16.msra.mxu0 %v6873_v10  ;;  %v2172_v10 = vld [vmem:[%s6723_s7 + $0x70] sm:$0xff] }
 0x465   :  { %4523 = vmatprep.subr.bf16.mxu0 %v6815_v56  ;;  %4561 = vmatpush1.bf16.msra.mxu1 %v6874_v49  ;;  %v2173_v49 = vld [vmem:[%s6723_s7 + $0x78] sm:$0xff] }
 0x466   :  { %4563 = vmatprep.subr.bf16.mxu1 %v6875_v45  ;;  %v4688_v45 = vpack.c.bf16 %v2173_v49, %v2172_v10 }
 0x468   :  { %4525 = vmatpush1.bf16.msra.mxu0 %v6876_v19  ;;  %v2174_v19 = vld [vmem:[%s6723_s7 + $0x80] sm:$0xff] }
 0x469   :  { %4567 = vmatprep.subr.bf16.mxu0 %v6877_v24  ;;  %4565 = vmatpush1.bf16.msra.mxu1 %v6878_v23  ;;  %v2175_v24 = vld [vmem:[%s6723_s7 + $0x88] sm:$0xff] }
 0x46a   :  { %4606 = vmatprep.subr.bf16.mxu1 %v6815_v56  ;;  %v4691_v23 = vpack.c.bf16 %v2175_v24, %v2174_v19 }
 0x46b   :  { %1795 = vmatmul.mubr.f32.vlgmr.msra.gmra.mrb[16].mxu0 %v6226_v17 }
 0x46c   :  { %4569 = vmatpush1.bf16.msra.mxu0 %v6879_v33  ;;  %v1871_v44 = vpop.permute.xlu0 %1870  ;;  %v2176_v33 = vld [vmem:[%s6723_s7 + $0x90] sm:$0xff] }
 0x46d   :  { %4571 = vmatprep.subr.bf16.mxu0 %v6880_v36  ;;  %v2177_v36 = vld [vmem:[%s6723_s7 + $0x98] sm:$0xff] }
 0x46e   :  { %v6275_v26 = vpop.permute.xlu1 %1872 }
 0x46f   :  { %3844 = vmatprep.mubr.msk.f32.mxu1 %vm913_vm2, %v6275_v26  ;;  %3845 = vmatprep.mubr.msk.f32.mxu0 %vm913_vm2, %v6275_v26  ;;  %v6283_v47 = vsel %vm1583_vm3, %v1871_v44, %v6275_v26  ;;  %v4694_v44 = vpack.c.bf16 %v2177_v36, %v2176_v33 }
 0x470   :  { %4573 = vmatpush1.bf16.msra.mxu0 %v6881_v53  ;;  %1943 = vmatmul.mubr.f32.vlgmr.msra.gmra.mrb[0].mxu1 %v6283_v47 }
 0x471   :  { %4608 = vmatpush1.bf16.msra.mxu1 %v6882_v14  ;;  %3846 = vmatprep.mubr.msk.f32.mxu1 %vm913_vm2, %v6275_v26 }
 0x472   :  { %4575 = vmatprep.subr.bf16.mxu0 %v6883_v8  ;;  %4609 = vmatprep.subr.bf16.mxu1 %v6815_v56 }
 0x474   :  { %4577 = vmatpush1.bf16.msra.mxu0 %v6884_v18 }
 0x475   :  { %4611 = vmatpush1.bf16.msra.mxu1 %v6885_v29  ;;  %4579 = vmatprep.subr.bf16.mxu0 %v6886_v43 }
 0x476   :  { %4612 = vmatprep.subr.bf16.mxu1 %v6815_v56 }
 0x478   :  { %4581 = vmatpush1.bf16.msra.mxu0 %v6029_v25  ;;  %v6891_v25 = vld [vmem:[#allocation69_spill] sm:$0xff] }
 0x479   :  { %4614 = vmatpush1.bf16.msra.mxu1 %v6887_v32  ;;  %4583 = vmatprep.subr.bf16.mxu0 %v6888_v50 }
 0x47a   :  { %4615 = vmatprep.subr.bf16.mxu1 %v6815_v56 }
 0x47c   :  { %4585 = vmatpush1.bf16.msra.mxu0 %v6039_v28  ;;  %v6892_v28 = vld [vmem:[#allocation72_spill] sm:$0xff] }
 0x47d   :  { %4617 = vmatpush1.bf16.msra.mxu1 %v6889_v60  ;;  %4587 = vmatprep.subr.bf16.mxu0 %v6042_v22  ;;  %v6893_v22 = vld [vmem:[#allocation74_spill] sm:$0xff] }
 0x47e   :  { %4618 = vmatprep.subr.bf16.mxu1 %v6815_v56 }
 0x480   :  { %4589 = vmatpush1.bf16.msra.mxu0 %v6049_v31  ;;  %v2158_v31 = vld [vmem:[%s6723_s7] sm:$0xff] }
 0x481   :  { %4620 = vmatpush1.bf16.msra.mxu1 %v6890_v59  ;;  %4591 = vmatprep.subr.bf16.mxu0 %v6052_v58  ;;  %v2159_v58 = vld [vmem:[%s6723_s7 + $0x8] sm:$0xff] }
 0x482   :  { %4621 = vmatprep.subr.bf16.mxu1 %v6815_v56 }
 0x484   :  { %4593 = vmatpush1.bf16.msra.mxu0 %v6059_v40  ;;  %v6894_v40 = vld [vmem:[#allocation75_spill] sm:$0xff] }
 0x485   :  { %4623 = vmatpush1.bf16.msra.mxu1 %v6891_v25  ;;  %4595 = vmatprep.subr.bf16.mxu0 %v6062_v27  ;;  %v6895_v27 = vld [vmem:[#allocation76_spill] sm:$0xff] }
 0x486   :  { %4624 = vmatprep.subr.bf16.mxu1 %v6815_v56 }
 0x488   :  { %4597 = vmatpush1.bf16.msra.mxu0 %v6067_v12  ;;  %v4667_v12 = vpack.c.bf16 %v2159_v58, %v2158_v31 }
 0x489   :  { %4626 = vmatpush1.bf16.msra.mxu1 %v6892_v28  ;;  %4599 = vmatprep.subr.bf16.mxu0 %v6071_v20  ;;  %v2160_v20 = vld [vmem:[%s6723_s7 + $0x10] sm:$0xff] }
 0x48a   :  { %4627 = vmatprep.subr.bf16.mxu1 %v6815_v56 }
 0x48c   :  { %4601 = vmatpush1.bf16.msra.mxu0 %v6076_v35  ;;  %v2161_v35 = vld [vmem:[%s6723_s7 + $0x18] sm:$0xff] }
 0x48d   :  { %4629 = vmatpush1.bf16.msra.mxu1 %v6893_v22  ;;  %4603 = vmatprep.subr.bf16.mxu0 %v6079_v21  ;;  %v4670_v21 = vpack.c.bf16 %v2161_v35, %v2160_v20 }
 0x48e   :  { %4630 = vmatprep.subr.bf16.mxu1 %v6815_v56 }
 0x490   :  { %4605 = vmatpush1.bf16.msra.mxu0 %v6084_v11  ;;  %v2162_v11 = vld [vmem:[%s6723_s7 + $0x20] sm:$0xff] }
 0x491   :  { %4632 = vmatpush1.bf16.msra.mxu1 %v6894_v40  ;;  %4636 = vmatprep.subr.bf16.mxu0 %v6815_v56  ;;  %v4673_v55 = vpack.c.bf16 %v2163_v3, %v2162_v11 }
 0x492   :  { %4633 = vmatprep.subr.bf16.mxu1 %v6815_v56 }
 0x493   :  { %2014 = vmatmul.mubr.f32.vlgmr.msra.gmra.mrb[10].mxu0 %v6283_v47 }
 0x495   :  { %4635 = vmatpush1.bf16.msra.mxu1 %v6895_v27 }
 0x496   :  { %4666 = vmatprep.subr.bf16.mxu1 %v6815_v56 }
 0x498   :  { %2085 = vmatmul.mubr.f32.vlgmr.msra.gmra.mrb[12].mxu1 %v6283_v47 }
 0x499   :  { %4668 = vmatpush1.bf16.msra.mxu1 %v4667_v12  ;;  %3853 = vmatprep.mubr.msk.f32.mxu1 %vm913_vm2, %v6218_v2  ;;  %v2165_v2 = vld [vmem:[%s6723_s7 + $0x38] sm:$0xff] }
 0x49a   :  { %4669 = vmatprep.subr.bf16.mxu1 %v6815_v56  ;;  %v4676_v15 = vpack.c.bf16 %v2165_v2, %v2164_v7 }
 0x49d   :  { %4671 = vmatpush1.bf16.msra.mxu1 %v4670_v21 }
 0x49e   :  { %4672 = vmatprep.subr.bf16.mxu1 %v6815_v56 }
 0x4a1   :  { %4674 = vmatpush1.bf16.msra.mxu1 %v4673_v55 }
 0x4a2   :  { %4675 = vmatprep.subr.bf16.mxu1 %v6815_v56 }
 0x4a5   :  { %4677 = vmatpush1.bf16.msra.mxu1 %v4676_v15 }
 0x4a6   :  { %4678 = vmatprep.subr.bf16.mxu1 %v6815_v56 }
 0x4a9   :  { %4680 = vmatpush1.bf16.msra.mxu1 %v4679_v62 }
 0x4aa   :  { %4681 = vmatprep.subr.bf16.mxu1 %v6815_v56 }
 0x4ad   :  { %4683 = vmatpush1.bf16.msra.mxu1 %v4682_v0 }
 0x4ae   :  { %4684 = vmatprep.subr.bf16.mxu1 %v6815_v56 }
 0x4b1   :  { %4686 = vmatpush1.bf16.msra.mxu1 %v4685_v63 }
 0x4b2   :  { %4687 = vmatprep.subr.bf16.mxu1 %v6815_v56 }
 0x4b5   :  { %4689 = vmatpush1.bf16.msra.mxu1 %v4688_v45 }
 0x4b6   :  { %4690 = vmatprep.subr.bf16.mxu1 %v6815_v56 }
 0x4b9   :  { %4692 = vmatpush1.bf16.msra.mxu1 %v4691_v23 }
 0x4ba   :  { %4693 = vmatprep.subr.bf16.mxu1 %v6815_v56 }
 0x4bd   :  { %4695 = vmatpush1.bf16.msra.mxu1 %v4694_v44 }
 0x4c0   :  { %2358 = vmatmul.mubr.f32.vlgmr.msra.gmra.mrb[14].mxu1 %v6226_v17 }
 0x516   :  { %v1654_v53 = vpop.f32.mrb[2].mxu0  ;;  %v1725_v14 = vpop.f32.mrb[10].mxu1 }
 0x517   :  { %v6401_v8 = vadd.f32 %v1725_v14, %v6138_v39  ;;  %v1656_v18 = vpop.f32.mrb[3].mxu0  ;;  %v1727_v29 = vpop.f32.mrb[11].mxu1  ;;  %v4802_v11 = vadd.f32 %v1654_v53, %v6166_v16 }
 0x518   :  { %v6404_v43 = vadd.f32 %v1727_v29, %v6140_v51  ;;  %v4803_v35 = vadd.f32 %v1656_v18, %v6164_v13 }
 0x519   :  { %v3840_v7 = vmul.f32 -1.442695, %v4802_v11  ;;  %v3842_v53 = vmul.f32 -1.442695, %v6401_v8  ;;  %v2183_v11 = vld [vmem:[%s6724_s8 + $0x28] sm:$0xff] }
 0x51a   :  { %v3841_v55 = vmul.f32 -1.442695, %v4803_v35 }
 0x53e   :  { %v1796_v32 = vpop.f32.mrb[16].mxu0 }
 0x53f   :  { %v1804_v50 = vadd.f32 %v1796_v32, %v6142_v57  ;;  %v1798_v60 = vpop.f32.mrb[17].mxu0 }
 0x543   :  { %v1944_v59 = vpop.f32.mrb[0].mxu1 }
 0x544   :  { %v1946_v25 = vpop.f32.mrb[1].mxu1  ;;  %v4812_v20 = vadd.f32 %v1944_v59, %v6177_v38 }
 0x545   :  { %v4813_v12 = vadd.f32 %v1946_v25, %v6174_v34 }
 0x546   :  { %v3847_v3 = vmul.f32 -1.442695, %v4812_v20 }
 0x547   :  { %v3848_v21 = vmul.f32 -1.442695, %v4813_v12  ;;  %v2181_v12 = vld [vmem:[%s6724_s8 + $0x18] sm:$0xff] }
 0x566   :  { %v2015_v28 = vpop.f32.mrb[10].mxu0 }
 0x567   :  { %v2017_v22 = vpop.f32.mrb[11].mxu0  ;;  %v4816_v36 = vadd.f32 %v2015_v28, %v6193_v9 }
 0x568   :  { %v6408_v17 = vadd.f32 %v2017_v22, %v6152_v52 }
 0x569   :  { %v3849_v44 = vmul.f32 -1.442695, %v4816_v36 }
 0x56a   :  { %4920 = vtanh.f32 %v6408_v17 }
 0x56b   :  { %v2086_v39 = vpop.f32.mrb[12].mxu1  ;;  %4922 = vtanh.f32 %v6404_v43 }
 0x56c   :  { %v2094_v40 = vadd.f32 %v2086_v39, %v6136_v30  ;;  %v2088_v31 = vpop.f32.mrb[13].mxu1 }
 0x56e   :  { %4924 = vtanh.f32 %v2094_v40 }
 0x56f   :  { %4926 = vtanh.f32 %v1804_v50 }
 0x570   :  { %4928 = vpow2.f32 %v3848_v21  ;;  %v2182_v21 = vld [vmem:[%s6724_s8 + $0x20] sm:$0xff] }
 0x571   :  { %4930 = vpow2.f32 %v3847_v3 }
 0x572   :  { %4932 = vpow2.f32 %v3841_v55  ;;  %v4643_v55 = vpack.c.bf16 %v2183_v11, %v2182_v21  ;;  %v2380_v21 = vld [vmem:[#allocation14 + $0x18] sm:$0xff] }
 0x573   :  { %4934 = vpow2.f32 %v3840_v7 }
 0x574   :  { %v4921_v51 = vpop.eup %4920 }
 0x575   :  { %2125 = vrot.lane.b32.xlu0 %v4921_v51, %s5343_s22  ;;  %v4923_v57 = vpop.eup %4922 }
 0x578   :  { %v4925_v58 = vpop.eup %4924 }
 0x579   :  { %1835 = vrot.lane.b32.xlu0 %v4923_v57, %s5343_s22  ;;  %2127 = vrot.lane.b32.xlu1 %v4925_v58, %s5343_s22  ;;  %v4927_v52 = vpop.eup %4926 }
 0x57a   :  { %v4929_v2 = vpop.eup %4928 }
 0x57b   :  { %v4931_v15 = vpop.eup %4930  ;;  %v2108_v37 = vadd.f32 1.0, %v4929_v2  ;;  %v2184_v2 = vld [vmem:[%s6724_s8 + $0x30] sm:$0xff] }
 0x57c   :  { %v4933_v1 = vpop.eup %4932  ;;  %v2107_v62 = vadd.f32 1.0, %v4931_v15  ;;  %v2185_v15 = vld [vmem:[%s6724_s8 + $0x38] sm:$0xff] }
 0x57d   :  { %1837 = vrot.lane.b32.xlu1 %v4927_v52, %s5343_s22  ;;  %v4935_v34 = vpop.eup %4934  ;;  %v1818_v48 = vadd.f32 1.0, %v4933_v1  ;;  %4936 = vrcp.f32 %v2108_v37  ;;  %v2178_v52 = vld [vmem:[%s6724_s8] sm:$0xff]  ;;  %v4646_v1 = vpack.c.bf16 %v2185_v15, %v2184_v2 }
 0x57e   :  { %v1817_v38 = vadd.f32 1.0, %v4935_v34  ;;  %4938 = vrcp.f32 %v2107_v62  ;;  %v2186_v62 = vld [vmem:[%s6724_s8 + $0x40] sm:$0xff]  ;;  %v2187_v34 = vld [vmem:[%s6724_s8 + $0x48] sm:$0xff] }
 0x57f   :  { %4940 = vrcp.f32 %v1818_v48  ;;  %v4649_v48 = vpack.c.bf16 %v2187_v34, %v2186_v62  ;;  %v2382_v2 = vld [vmem:[#allocation14 + $0x28] sm:$0xff]  ;;  %v2383_v34 = vld [vmem:[#allocation14 + $0x30] sm:$0xff] }
 0x580   :  { %4942 = vrcp.f32 %v1817_v38  ;;  %v2188_v38 = vld [vmem:[%s6724_s8 + $0x50] sm:$0xff] }
 0x581   :  { %4944 = vpow2.f32 %v3849_v44  ;;  %v2196_v44 = vld [vmem:[%s6724_s8 + $0x90] sm:$0xff] }
 0x582   :  { %4946 = vpow2.f32 %v3842_v53  ;;  %v2197_v53 = vld [vmem:[%s6724_s8 + $0x98] sm:$0xff] }
 0x587   :  { %v4937_v16 = vpop.eup %4936 }
 0x588   :  { %v4939_v0 = vpop.eup %4938  ;;  %v2121_v59 = vmul.f32 %v4937_v16, %v6202_v46 }
 0x589   :  { %v4941_v10 = vpop.eup %4940 }
 0x58a   :  { %v4943_v19 = vpop.eup %4942  ;;  %v1831_v31 = vmul.f32 %v4941_v10, %v6186_v61  ;;  %v2180_v61 = vld [vmem:[%s6724_s8 + $0x10] sm:$0xff] }
 0x58b   :  { %v4945_v14 = vpop.eup %4944  ;;  %v4640_v20 = vpack.c.bf16 %v2181_v12, %v2180_v61 }
 0x58c   :  { %v2109_v18 = vadd.f32 1.0, %v4945_v14  ;;  %v4947_v29 = vpop.eup %4946 }
 0x58d   :  { %v1819_v32 = vadd.f32 1.0, %v4947_v29 }
 0x58e   :  { %4948 = vrcp.f32 %v2109_v18  ;;  %v4664_v18 = vpack.c.bf16 %v2197_v53, %v2196_v44  ;;  %v2668_v44 = vld [vmem:[#allocation18 + $0x8] sm:$0xff] }
 0x58f   :  { %4950 = vrcp.f32 %v1819_v32  ;;  %v2476_v32 = vld [vmem:[#allocation17] sm:$0xff] }
 0x593   :  { %v6417_v27 = vpop.f32.mrb[14].mxu1 }
 0x594   :  { %v2361_v30 = vpop.f32.mrb[15].mxu1 }
 0x595   :  { %v2179_v30 = vld [vmem:[%s6724_s8 + $0x8] sm:$0xff] }
 0x598   :  { %v6431_v50 = vpop.eup %4948 }
 0x599   :  { %v2122_v25 = vmul.f32 %v6431_v50, %v6204_v4  ;;  %v6436_v28 = vpop.eup %4950 }
 0x59a   :  { %v1832_v51 = vmul.f32 %v6436_v28, %v6188_v5  ;;  %v4637_v5 = vpack.c.bf16 %v2179_v30, %v2178_v52 }
 0x59c   :  { %4638 = vmatpush1.bf16.msra.mxu0 %v4637_v5 }
 0x59d   :  { %4639 = vmatprep.subr.bf16.mxu0 %v6815_v56 }
 0x5a0   :  { %4641 = vmatpush1.bf16.msra.mxu0 %v4640_v20 }
 0x5a1   :  { %4642 = vmatprep.subr.bf16.mxu0 %v6815_v56 }
 0x5a4   :  { %4644 = vmatpush1.bf16.msra.mxu0 %v4643_v55 }
 0x5a5   :  { %4645 = vmatprep.subr.bf16.mxu0 %v6815_v56 }
 0x5a8   :  { %4647 = vmatpush1.bf16.msra.mxu0 %v4646_v1 }
 0x5a9   :  { %4648 = vmatprep.subr.bf16.mxu0 %v6815_v56 }
 0x5ac   :  { %4650 = vmatpush1.bf16.msra.mxu0 %v4649_v48  ;;  %v2384_v48 = vld [vmem:[#allocation14 + $0x38] sm:$0xff] }
 0x5ad   :  { %4651 = vmatprep.subr.bf16.mxu0 %v6815_v56 }
 0x5e7   :  { %v2126_v13 = vpop.permute.xlu0 %2125 }
 0x5eb   :  { %v2128_v42 = vpop.permute.xlu1 %2127  ;;  %v1836_v49 = vpop.permute.xlu0 %1835 }
 0x5ec   :  { %v2129_v41 = vsel %vm913_vm2, %v2126_v13, %v2128_v42  ;;  %v2133_v54 = vmul.f32 %v4937_v16, %v2128_v42  ;;  %v2189_v13 = vld [vmem:[%s6724_s8 + $0x58] sm:$0xff]  ;;  %v2190_v42 = vld [vmem:[%s6724_s8 + $0x60] sm:$0xff] }
 0x5ed   :  { %v2132_v63 = vmul.f32 %v4939_v0, %v2129_v41  ;;  %v4652_v16 = vpack.c.bf16 %v2189_v13, %v2188_v38  ;;  %v2191_v0 = vld [vmem:[%s6724_s8 + $0x68] sm:$0xff]  ;;  %v2482_v38 = vld [vmem:[#allocation17 + $0x30] sm:$0xff]  ;;  %v4708_v13 = vpack.c.bf16 %v2384_v48, %v2383_v34 }
 0x5ee   :  { %2138 = vrot.lane.b32.xlu1 %v2133_v54, %s5343_s22  ;;  %v4655_v41 = vpack.c.bf16 %v2191_v0, %v2190_v42  ;;  %v2192_v54 = vld [vmem:[%s6724_s8 + $0x70] sm:$0xff]  ;;  %v2386_v0 = vld [vmem:[#allocation14 + $0x48] sm:$0xff] }
 0x5ef   :  { %2136 = vrot.lane.b32.xlu0 %v2132_v63, %s5343_s22  ;;  %v1838_v45 = vpop.permute.xlu1 %1837  ;;  %4653 = vmatpush1.bf16.msra.mxu0 %v4652_v16  ;;  %v2193_v63 = vld [vmem:[%s6724_s8 + $0x78] sm:$0xff] }
 0x5f0   :  { %v1839_v24 = vsel %vm913_vm2, %v1836_v49, %v1838_v45  ;;  %v1843_v23 = vmul.f32 %v4941_v10, %v1838_v45  ;;  %4654 = vmatprep.subr.bf16.mxu0 %v6815_v56  ;;  %v4658_v10 = vpack.c.bf16 %v2193_v63, %v2192_v54  ;;  %v2194_v49 = vld [vmem:[%s6724_s8 + $0x80] sm:$0xff]  ;;  %v2195_v45 = vld [vmem:[%s6724_s8 + $0x88] sm:$0xff]  ;;  %v2385_v42 = vld [vmem:[#allocation14 + $0x40] sm:$0xff] }
 0x5f1   :  { %v1842_v33 = vmul.f32 %v4943_v19, %v1839_v24  ;;  %v4661_v19 = vpack.c.bf16 %v2195_v45, %v2194_v49  ;;  %v3850_v24 = vmul.f32 -1.442695, %v6408_v17  ;;  %v2377_v17 = vld [vmem:[#allocation14] sm:$0xff]  ;;  %v4712_v54 = vpack.c.bf16 %v2386_v0, %v2385_v42  ;;  %v3855_v49 = vld [vmem:[#allocation12] ss:$0 sm:$0xff] }
 0x5f2   :  { %1848 = vrot.lane.b32.xlu1 %v1843_v23, %s5343_s22  ;;  %v3843_v23 = vmul.f32 -1.442695, %v6404_v43  ;;  %v2378_v43 = vld [vmem:[#allocation14 + $0x8] sm:$0xff]  ;;  %v2485_v63 = vld [vmem:[#allocation17 + $0x48] sm:$0xff] }
 0x5f3   :  { %1846 = vrot.lane.b32.xlu0 %v1842_v33, %s5343_s22  ;;  %4656 = vmatpush1.bf16.msra.mxu0 %v4655_v41  ;;  %v2484_v41 = vld [vmem:[#allocation17 + $0x40] sm:$0xff] }
 0x5f4   :  { %4657 = vmatprep.subr.bf16.mxu0 %v6815_v56 }
 0x5f7   :  { %4659 = vmatpush1.bf16.msra.mxu0 %v4658_v10 }
 0x5f8   :  { %4660 = vmatprep.subr.bf16.mxu0 %v6815_v56 }
 0x5fb   :  { %4662 = vmatpush1.bf16.msra.mxu0 %v4661_v19 }
 0x5fc   :  { %4663 = vmatprep.subr.bf16.mxu0 %v6815_v56 }
 0x5ff   :  { %4665 = vmatpush1.bf16.msra.mxu0 %v4664_v18 }
 0x660   :  { %v2139_v60 = vpop.permute.xlu1 %2138 }
 0x661   :  { %v2137_v9 = vpop.permute.xlu0 %2136 }
 0x662   :  { %v2140_v8 = vsel %vm913_vm2, %v2137_v9, %v2139_v60  ;;  %v2143_v22 = vadd.f32 %v2137_v9, %v2121_v59  ;;  %v4696_v60 = vpack.c.bf16 %v2378_v43, %v2377_v17  ;;  %v2477_v59 = vld [vmem:[#allocation17 + $0x8] sm:$0xff]  ;;  %v2478_v9 = vld [vmem:[#allocation17 + $0x10] sm:$0xff] }
 0x663   :  { %v2144_v39 = vadd.f32 %v2140_v8, %v2122_v25  ;;  %v4716_v25 = vpack.c.bf16 %v2477_v59, %v2476_v32  ;;  %v2479_v8 = vld [vmem:[#allocation17 + $0x18] sm:$0xff]  ;;  %v2570_v32 = vld [vmem:[%s6727_s11 + $0x10] sm:$0xff]  ;;  %v2571_v59 = vld [vmem:[%s6727_s11 + $0x18] sm:$0xff] }
 0x664   :  { %4952 = vtanh.f32 %v2143_v22  ;;  %v1849_v40 = vpop.permute.xlu1 %1848  ;;  %4697 = vmatprep.subr.bf16.mxu0 %v4696_v60 }
 0x665   :  { %4954 = vtanh.f32 %v2144_v39  ;;  %v1847_v57 = vpop.permute.xlu0 %1846  ;;  %v4720_v39 = vpack.c.bf16 %v2479_v8, %v2478_v9  ;;  %4717 = vmatprep.subr.bf16.mxu1 %v4716_v25  ;;  %v2670_v9 = vld [vmem:[#allocation18 + $0x18] sm:$0xff]  ;;  %v4740_v8 = vpack.c.bf16 %v2571_v59, %v2570_v32 }
 0x666   :  { %v1850_v46 = vsel %vm913_vm2, %v1847_v57, %v1849_v40  ;;  %v1853_v58 = vadd.f32 %v1847_v57, %v1831_v31  ;;  %v2480_v40 = vld [vmem:[#allocation17 + $0x20] sm:$0xff]  ;;  %v2481_v31 = vld [vmem:[#allocation17 + $0x28] sm:$0xff]  ;;  %4719 = vmatpush3.bf16.msra.mxu1 %v4716_v25 }
 0x667   :  { %v1854_v4 = vadd.f32 %v1850_v46, %v1832_v51  ;;  %4721 = vmatprep.subr.bf16.mxu1 %v4720_v39  ;;  %v4724_v52 = vpack.c.bf16 %v2481_v31, %v2480_v40  ;;  %v2669_v25 = vld [vmem:[#allocation18 + $0x10] sm:$0xff]  ;;  %v3859_v40 = vld [vmem:[#allocation20] ss:$0 sm:$0xff] }
 0x668   :  { %4956 = vtanh.f32 %v1853_v58 }
 0x669   :  { %4958 = vtanh.f32 %v1854_v4 }
 0x66a   :  { %4960 = vpow2.f32 %v3850_v24  ;;  %4723 = vmatpush3.bf16.msra.mxu1 %v4720_v39  ;;  %v2568_v24 = vld [vmem:[%s6727_s11] sm:$0xff] }
 0x66b   :  { %4962 = vpow2.f32 %v3843_v23  ;;  %4725 = vmatprep.subr.bf16.mxu1 %v4724_v52  ;;  %v3856_v39 = vld [vmem:[#allocation15] ss:$0 sm:$0xff] }
 0x66e   :  { %v4953_v35 = vpop.eup %4952  ;;  %4727 = vmatpush3.bf16.msra.mxu1 %v4724_v52 }
 0x66f   :  { %v4955_v3 = vpop.eup %4954  ;;  %2149 = vrot.lane.b32.xlu0 %v4953_v35, %s5343_s22  ;;  %v2379_v35 = vld [vmem:[#allocation14 + $0x10] sm:$0xff] }
 0x670   :  { %2151 = vrot.lane.b32.xlu1 %v4955_v3, %s5343_s22  ;;  %v4700_v55 = vpack.c.bf16 %v2380_v21, %v2379_v35 }
 0x672   :  { %v4957_v7 = vpop.eup %4956 }
 0x673   :  { %v4959_v37 = vpop.eup %4958  ;;  %1859 = vrot.lane.b32.xlu0 %v4957_v7, %s5343_s22  ;;  %v2381_v7 = vld [vmem:[#allocation14 + $0x20] sm:$0xff] }
 0x674   :  { %1861 = vrot.lane.b32.xlu1 %v4959_v37, %s5343_s22  ;;  %v4961_v33 = vpop.eup %4960  ;;  %v4704_v1 = vpack.c.bf16 %v2382_v2, %v2381_v7 }
 0x675   :  { %v2110_v36 = vadd.f32 1.0, %v4961_v33  ;;  %v4963_v14 = vpop.eup %4962  ;;  %v2569_v33 = vld [vmem:[%s6727_s11 + $0x8] sm:$0xff] }
 0x676   :  { %v1820_v29 = vadd.f32 1.0, %v4963_v14 }
 0x677   :  { %4964 = vrcp.f32 %v2110_v36  ;;  %v2667_v36 = vld [vmem:[#allocation18] sm:$0xff] }
 0x678   :  { %4966 = vrcp.f32 %v1820_v29  ;;  %v4743_v43 = vpack.c.bf16 %v2668_v44, %v2667_v36 }
 0x681   :  { %v4965_v46 = vpop.eup %4964 }
 0x682   :  { %v4967_v12 = vpop.eup %4966 }
 0x6e1   :  { %v2150_v22 = vpop.permute.xlu0 %2149 }
 0x6e2   :  { %v2156_v51 = vmul.f32 %v6431_v50, %v2150_v22  ;;  %v2152_v57 = vpop.permute.xlu1 %2151 }
 0x6e3   :  { %v2153_v58 = vsel %vm913_vm2, %v2150_v22, %v2152_v57  ;;  %v4746_v22 = vpack.c.bf16 %v2670_v9, %v2669_v25 }
 0x6e4   :  { %v2157_v4 = vmul.f32 %v4965_v46, %v2153_v58  ;;  %2200 = vrot.lane.b32.xlu0 %v2156_v51, %s5344_s9 }
 0x6e5   :  { %v1860_v30 = vpop.permute.xlu0 %1859 }
 0x6e6   :  { %v1866_v61 = vmul.f32 %v6436_v28, %v1860_v30  ;;  %2202 = vrot.lane.b32.xlu1 %v2157_v4, %s5344_s9  ;;  %v1862_v5 = vpop.permute.xlu1 %1861 }
 0x6e7   :  { %v1863_v50 = vsel %vm913_vm2, %v1860_v30, %v1862_v5 }
 0x6e8   :  { %v1867_v20 = vmul.f32 %v4967_v12, %v1863_v50  ;;  %2285 = vrot.lane.b32.xlu0 %v1866_v61, %s5344_s9 }
 0x6ea   :  { %2287 = vrot.lane.b32.xlu1 %v1867_v20, %s5344_s9 }
 0x756   :  { %v2201_v11 = vpop.permute.xlu0 %2200 }
 0x758   :  { %v2203_v3 = vpop.permute.xlu1 %2202 }
 0x759   :  { %v2204_v28 = vsel %vm1583_vm3, %v2201_v11, %v2203_v3  ;;  %3851 = vmatprep.mubr.msk.f32.mxu0 %vm913_vm2, %v2203_v3 }
 0x75a   :  { %2273 = vmatmul.mubr.f32.vlgmr.msra.gmra.mrb[18].mxu0 %v2204_v28  ;;  %v2286_v15 = vpop.permute.xlu0 %2285 }
 0x75b   :  { %3852 = vmatprep.mubr.msk.f32.mxu0 %vm913_vm2, %v6275_v26  ;;  %4699 = vmatpush3.bf16.msra.mxu0 %v4696_v60  ;;  %v2483_v26 = vld [vmem:[#allocation17 + $0x38] sm:$0xff] }
 0x75c   :  { %v2288_v37 = vpop.permute.xlu1 %2287  ;;  %4701 = vmatprep.subr.bf16.mxu0 %v4700_v55  ;;  %v4728_v16 = vpack.c.bf16 %v2483_v26, %v2482_v38 }
 0x75d   :  { %3854 = vmatprep.mubr.msk.f32.mxu1 %vm913_vm2, %v2288_v37  ;;  %v2289_v62 = vsel %vm1583_vm3, %v2286_v15, %v2288_v37 }
 0x75e   :  { %2278 = vmatmul.mubr.f32.gmra.mrb[20].mxu0 %v6283_v47  ;;  %2363 = vmatmul.mubr.f32.gmra.mrb[16].mxu1 %v2289_v62  ;;  %v4732_v47 = vpack.c.bf16 %v2485_v63, %v2484_v41 }
 0x75f   :  { %4703 = vmatpush3.bf16.msra.mxu0 %v4700_v55  ;;  %4729 = vmatprep.subr.bf16.mxu1 %v4728_v16 }
 0x760   :  { %4705 = vmatprep.subr.bf16.mxu0 %v4704_v1  ;;  %4731 = vmatpush3.bf16.msra.mxu1 %v4728_v16 }
 0x761   :  { %4733 = vmatprep.subr.bf16.mxu1 %v4732_v47 }
 0x763   :  { %4707 = vmatpush3.bf16.msra.mxu0 %v4704_v1 }
 0x764   :  { %4709 = vmatprep.subr.bf16.mxu0 %v4708_v13  ;;  %4735 = vmatpush3.bf16.msra.mxu1 %v4732_v47 }
 0x765   :  { %4742 = vmatprep.subr.bf16.mxu1 %v6815_v56 }
 0x767   :  { %4711 = vmatpush3.bf16.msra.mxu0 %v4708_v13 }
 0x768   :  { %4713 = vmatprep.subr.bf16.mxu0 %v4712_v54 }
 0x76b   :  { %4715 = vmatpush3.bf16.msra.mxu0 %v4712_v54 }
 0x76c   :  { %4736 = vmatprep.subr.bf16.mxu0 %v6815_v56 }
 0x82d   :  { %v2274_v10 = vpop.f32.mrb[18].mxu0 }
 0x82e   :  { %v2360_v45 = vadd.f32 %v6417_v27, %v2274_v10  ;;  %v2276_v19 = vpop.f32.mrb[19].mxu0  ;;  %v4737_v27 = vpack.c.bf16 %v2569_v33, %v2568_v24 }
 0x830   :  { %v2375_v23 = vadd.f32 %v3855_v49, %v2360_v45 }
 0x831   :  { %v2279_v53 = vpop.f32.mrb[20].mxu0  ;;  %v2364_v14 = vpop.f32.mrb[16].mxu1 }
 0x832   :  { %v2365_v18 = vadd.f32 %v2364_v14, %v2279_v53  ;;  %v2281_v29 = vpop.f32.mrb[21].mxu0  ;;  %v2366_v17 = vpop.f32.mrb[17].mxu1  ;;  %4024 = vmatprep.mubr.msk.f32.mxu0 %vm2394_vm4, %v2375_v23  ;;  %4047 = vmatprep.mubr.msk.f32.mxu1 %vm2394_vm4, %v2375_v23 }
 0x834   :  { %v2376_v60 = vadd.f32 %v3855_v49, %v2365_v18 }
 0x836   :  { %4025 = vmatmul.mubr.msk.f32.vlgmr.msra.gmra.mrb[22].mxu0 %vm2394_vm4, %v2376_v60  ;;  %4048 = vmatmul.mubr.msk.f32.vlgmr.msra.gmra.mrb[18].mxu1 %vm2394_vm4, %v2376_v60 }
 0x837   :  { %4738 = vmatpush3.bf16.msra.mxu0 %v4737_v27  ;;  %4744 = vmatpush3.bf16.msra.mxu1 %v4743_v43 }
 0x838   :  { %4739 = vmatprep.subr.bf16.mxu0 %v6815_v56  ;;  %4745 = vmatprep.subr.bf16.mxu1 %v6815_v56 }
 0x839   :  { %4058 = vmatprep.mubr.msk.f32.mxu0 %vm5345_vm5, %v6832_v6  ;;  %4069 = vmatprep.mubr.msk.f32.mxu1 %vm5345_vm5, %v6832_v6 }
 0x83b   :  { %4741 = vmatpush3.bf16.msra.mxu0 %v4740_v8  ;;  %4747 = vmatpush3.bf16.msra.mxu1 %v4746_v22 }
 0x83c   :  { %4748 = vmatprep.subr.bf16.mxu0 %v6815_v56  ;;  %4754 = vmatprep.subr.bf16.mxu1 %v6815_v56 }
 0x83e   :  { %4059 = vmatmul.mubr.f32.vlgmr.msra.gmra.mrb[24].mxu0 %v6832_v6  ;;  %4070 = vmatmul.mubr.f32.vlgmr.msra.gmra.mrb[20].mxu1 %v6832_v6 }
 0x83f   :  { %4750 = vmatpush3.bf16.msra.mxu0 %v4737_v27  ;;  %4756 = vmatpush3.bf16.msra.mxu1 %v4743_v43 }
 0x840   :  { %4751 = vmatprep.subr.bf16.mxu0 %v6815_v56  ;;  %4757 = vmatprep.subr.bf16.mxu1 %v6815_v56 }
 0x841   :  { %4091 = vmatprep.mubr.msk.f32.mxu1 %vm5345_vm5, %v6832_v6  ;;  %4080 = vmatprep.mubr.msk.f32.mxu0 %vm5345_vm5, %v6832_v6 }
 0x843   :  { %4753 = vmatpush3.bf16.msra.mxu0 %v4740_v8  ;;  %4759 = vmatpush3.bf16.msra.mxu1 %v4746_v22 }
 0x844   :  { %4776 = vmatprep.subr.bf16.mxu1 %v6815_v56 }
 0x909   :  { %v4026_v31 = vpop.f32.mrb[22].mxu0  ;;  %v4049_v51 = vpop.f32.mrb[18].mxu1 }
 0x90a   :  { %v2473_v57 = vadd.f32 %v4026_v31, %v3856_v39  ;;  %v2467_v46 = vpop.f32.mrb[23].mxu0  ;;  %v2559_v58 = vpop.f32.mrb[19].mxu1  ;;  %v2565_v52 = vadd.f32 %v4049_v51, %v3859_v40 }
 0x90b   :  { %v2560_v4 = vadd.f32 %v3859_v40, %v2559_v58  ;;  %v2468_v30 = vadd.f32 %v3856_v39, %v2467_v46 }
 0x911   :  { %v2638_v61 = vpop.f32.mrb[24].mxu0  ;;  %v2737_v5 = vpop.f32.mrb[20].mxu1 }
 0x912   :  { %v2642_v12 = vadd.f32 %v2638_v61, %v2468_v30  ;;  %v2741_v50 = vadd.f32 %v2737_v5, %v2565_v52  ;;  %v4071_v20 = vpop.f32.mrb[21].mxu1  ;;  %v4060_v35 = vpop.f32.mrb[25].mxu0  ;;  %v2970_v52 = vld [vmem:[%s6733_s17] sm:$0xff]  ;;  %v2971_v30 = vld [vmem:[%s6733_s17 + $0x8] sm:$0xff]  ;;  %v2972_v61 = vld [vmem:[%s6733_s17 + $0x10] sm:$0xff] }
 0x913   :  { %v4760_v5 = vpack.c.bf16 %v2971_v30, %v2970_v52 }
 0x914   :  { %4968 = vtanh.f32 %v2642_v12  ;;  %v3862_v3 = vmul.f32 -1.442695, %v2642_v12  ;;  %v3863_v55 = vmul.f32 -1.442695, %v2741_v50  ;;  %v2973_v12 = vld [vmem:[%s6733_s17 + $0x18] sm:$0xff] }
 0x915   :  { %4970 = vtanh.f32 %v2741_v50  ;;  %v4764_v50 = vpack.c.bf16 %v2973_v12, %v2972_v61  ;;  %4761 = vmatprep.subr.bf16.mxu0 %v4760_v5 }
 0x916   :  { %4972 = vpow2.f32 %v3862_v3 }
 0x917   :  { %4974 = vpow2.f32 %v3863_v55 }
 0x91e   :  { %v4969_v21 = vpop.eup %4968 }
 0x91f   :  { %v4971_v11 = vpop.eup %4970  ;;  %2652 = vrot.lane.b32.xlu1 %v4969_v21, %s5343_s22  ;;  %v2966_v21 = vld [vmem:[%s6732_s16] sm:$0xff] }
 0x920   :  { %2751 = vrot.lane.b32.xlu0 %v4971_v11, %s5343_s22  ;;  %v4973_v28 = vpop.eup %4972  ;;  %v2967_v11 = vld [vmem:[%s6732_s16 + $0x8] sm:$0xff] }
 0x921   :  { %v4975_v7 = vpop.eup %4974  ;;  %v2646_v2 = vadd.f32 1.0, %v4973_v28  ;;  %v4768_v3 = vpack.c.bf16 %v2967_v11, %v2966_v21 }
 0x922   :  { %v2745_v15 = vadd.f32 1.0, %v4975_v7 }
 0x923   :  { %4976 = vrcp.f32 %v2646_v2 }
 0x924   :  { %4978 = vrcp.f32 %v2745_v15  ;;  %v2968_v15 = vld [vmem:[%s6732_s16 + $0x10] sm:$0xff] }
 0x92d   :  { %v4977_v37 = vpop.eup %4976 }
 0x92e   :  { %v4979_v62 = vpop.eup %4978  ;;  %v2650_v13 = vmul.f32 0.0, %v4977_v37 }
 0x92f   :  { %v2749_v26 = vmul.f32 0.0, %v4979_v62 }
 0x991   :  { %v2653_v1 = vpop.permute.xlu1 %2652 }
 0x992   :  { %v2752_v34 = vpop.permute.xlu0 %2751  ;;  %v2655_v48 = vmul.f32 %v4977_v37, %v2653_v1 }
 0x993   :  { %v2754_v38 = vmul.f32 %v4979_v62, %v2752_v34 }
 0x994   :  { %2657 = vrot.lane.b32.xlu1 %v2655_v48, %s5343_s22  ;;  %v3155_v48 = vld [vmem:[%s6735_s19] sm:$0xff] }
 0x995   :  { %2756 = vrot.lane.b32.xlu0 %v2754_v38, %s5343_s22  ;;  %v3156_v38 = vld [vmem:[%s6735_s19 + $0x8] sm:$0xff] }
 0xa06   :  { %v2658_v16 = vpop.permute.xlu1 %2657 }
 0xa07   :  { %v2757_v42 = vpop.permute.xlu0 %2756  ;;  %v2660_v0 = vadd.f32 %v2658_v16, %v2650_v13  ;;  %v4777_v13 = vpack.c.bf16 %v3156_v38, %v3155_v48 }
 0xa08   :  { %v2759_v41 = vadd.f32 %v2757_v42, %v2749_v26  ;;  %v3872_v26 = vld [vmem:[#allocation21] ss:$0 sm:$0xff] }
 0xa09   :  { %4980 = vtanh.f32 %v2660_v0 }
 0xa0a   :  { %4982 = vtanh.f32 %v2759_v41 }
 0xa13   :  { %v4981_v54 = vpop.eup %4980 }
 0xa14   :  { %v4983_v63 = vpop.eup %4982  ;;  %2663 = vrot.lane.b32.xlu1 %v4981_v54, %s5343_s22  ;;  %v3875_v54 = vld [vmem:[%s6735_s19 + $0x10] sm:$0xff] }
 0xa15   :  { %2762 = vrot.lane.b32.xlu0 %v4983_v63, %s5343_s22  ;;  %v3876_v63 = vld [vmem:[%s6735_s19 + $0x18] sm:$0xff] }
 0xa86   :  { %v2664_v47 = vpop.permute.xlu1 %2663 }
 0xa87   :  { %v2763_v10 = vpop.permute.xlu0 %2762  ;;  %v2666_v49 = vmul.f32 %v4977_v37, %v2664_v47  ;;  %v2969_v37 = vld [vmem:[%s6732_s16 + $0x18] sm:$0xff]  ;;  %v4780_v47 = vpack.c.bf16 %v3876_v63, %v3875_v54  ;;  %s5346_s16 = smov [#allocation24]  }
 0xa88   :  { %v2765_v45 = vmul.f32 %v4979_v62, %v2763_v10  ;;  %v4772_v62 = vpack.c.bf16 %v2969_v37, %v2968_v15  ;;  %s3792_s28 = sshll.u32 %s5346_s16, 4  ;;  %s3793_s28 = int_to_ptr.vmem [resolvable:$true] %s3792_s28 }
 0xa89   :  { %2767 = vrot.lane.b32.xlu1 %v2666_v49, %s5344_s9  ;;  %v3878_v49 = vld [vmem:[%s6735_s19 + $0x20] sm:$0xff]  ;;  %p5291_p7 = scmp.lt.s32.totalorder %s3793_s28, %s3793_s28 }
 0xa8a   :  { %2867 = vrot.lane.b32.xlu0 %v2765_v45, %s5344_s9  ;;  %v3879_v45 = vld [vmem:[%s6735_s19 + $0x28] sm:$0xff] }
 0xafb   :  { %v6577_v19 = vpop.permute.xlu1 %2767 }
 0xafc   :  { %v6579_v24 = vpop.permute.xlu0 %2867  ;;  %4081 = vmatmul.mubr.msk.f32.vlgmr.msra.gmra.mrb[26].mxu0 %vm913_vm2, %v6577_v19 }
 0xafd   :  { %4092 = vmatmul.mubr.msk.f32.vlgmr.msra.gmra.mrb[22].mxu1 %vm913_vm2, %v6579_v24  ;;  %4763 = vmatpush3.bf16.msra.mxu0 %v4760_v5 }
 0xafe   :  { %4120 = vmatprep.mubr.msk.f32.mxu1 %vm5345_vm5, %v6832_v6  ;;  %4765 = vmatprep.subr.bf16.mxu0 %v4764_v50 }
 0xaff   :  { %4778 = vmatpush3.bf16.msra.mxu1 %v4777_v13 }
 0xb00   :  { %4779 = vmatprep.subr.bf16.mxu1 %v6815_v56 }
 0xb01   :  { %4767 = vmatpush3.bf16.msra.mxu0 %v4764_v50 }
 0xb02   :  { %4769 = vmatprep.subr.bf16.mxu0 %v4768_v3 }
 0xbcf   :  { %v2837_v23 = vpop.f32.mrb[26].mxu0 }
 0xbd0   :  { %v2841_v33 = vadd.f32 %v2837_v23, %v2473_v57  ;;  %v2937_v36 = vpop.f32.mrb[22].mxu1  ;;  %v4082_v44 = vpop.f32.mrb[27].mxu0  ;;  %v3881_v23 = vld [vmem:[%s6735_s19 + $0x30] sm:$0xff] }
 0xbd1   :  { %v2941_v53 = vadd.f32 %v2937_v36, %v2560_v4  ;;  %v4093_v14 = vpop.f32.mrb[23].mxu1 }
 0xbd2   :  { %4984 = vtanh.f32 %v2841_v33  ;;  %v3865_v17 = vmul.f32 -1.442695, %v2841_v33  ;;  %v3882_v33 = vld [vmem:[%s6735_s19 + $0x38] sm:$0xff]  ;;  %v3885_v14 = vld [vmem:[%s6735_s19 + $0x48] sm:$0xff] }
 0xbd3   :  { %4986 = vtanh.f32 %v2941_v53  ;;  %v3867_v27 = vmul.f32 -1.442695, %v2941_v53  ;;  %v4786_v36 = vpack.c.bf16 %v3882_v33, %v3881_v23  ;;  %v3884_v53 = vld [vmem:[%s6735_s19 + $0x40] sm:$0xff] }
 0xbd4   :  { %4988 = vpow2.f32 %v3865_v17  ;;  %v3887_v17 = vld [vmem:[%s6735_s19 + $0x50] sm:$0xff] }
 0xbd5   :  { %4990 = vpow2.f32 %v3867_v27  ;;  %v3888_v27 = vld [vmem:[%s6735_s19 + $0x58] sm:$0xff] }
 0xbdc   :  { %v4985_v18 = vpop.eup %4984 }
 0xbdd   :  { %v4987_v29 = vpop.eup %4986  ;;  %2851 = vrot.lane.b32.xlu1 %v4985_v18, %s5343_s22  ;;  %v4789_v18 = vpack.c.bf16 %v3885_v14, %v3884_v53 }
 0xbde   :  { %2951 = vrot.lane.b32.xlu0 %v4987_v29, %s5343_s22  ;;  %v4989_v43 = vpop.eup %4988 }
 0xbdf   :  { %v4991_v32 = vpop.eup %4990  ;;  %v2845_v60 = vadd.f32 1.0, %v4989_v43  ;;  %v4792_v43 = vpack.c.bf16 %v3888_v27, %v3887_v17 }
 0xbe0   :  { %v2945_v59 = vadd.f32 1.0, %v4991_v32 }
 0xbe1   :  { %4992 = vrcp.f32 %v2845_v60  ;;  %v3890_v60 = vld [vmem:[%s6735_s19 + $0x60] sm:$0xff] }
 0xbe2   :  { %4994 = vrcp.f32 %v2945_v59  ;;  %v3891_v59 = vld [vmem:[%s6735_s19 + $0x68] sm:$0xff] }
 0xbeb   :  { %v4993_v25 = vpop.eup %4992 }
 0xbec   :  { %v4995_v8 = vpop.eup %4994  ;;  %v2849_v31 = vmul.f32 %v4993_v25, %v2660_v0 }
 0xbed   :  { %v2949_v51 = vmul.f32 %v4995_v8, %v2759_v41 }
 0xc4f   :  { %v2852_v9 = vpop.permute.xlu1 %2851 }
 0xc50   :  { %v2952_v22 = vpop.permute.xlu0 %2951  ;;  %v2854_v39 = vmul.f32 %v4993_v25, %v2852_v9 }
 0xc51   :  { %v2954_v40 = vmul.f32 %v4995_v8, %v2952_v22  ;;  %v3894_v22 = vld [vmem:[%s6735_s19 + $0x78] sm:$0xff] }
 0xc52   :  { %2856 = vrot.lane.b32.xlu1 %v2854_v39, %s5343_s22 }
 0xc53   :  { %2956 = vrot.lane.b32.xlu0 %v2954_v40, %s5343_s22 }
 0xcc4   :  { %v2857_v57 = vpop.permute.xlu1 %2856 }
 0xcc5   :  { %v2957_v46 = vpop.permute.xlu0 %2956  ;;  %v2859_v58 = vadd.f32 %v2857_v57, %v2849_v31 }
 0xcc6   :  { %v2959_v4 = vadd.f32 %v2957_v46, %v2949_v51 }
 0xcc7   :  { %4996 = vtanh.f32 %v2859_v58 }
 0xcc8   :  { %4998 = vtanh.f32 %v2959_v4 }
 0xcd1   :  { %v4997_v20 = vpop.eup %4996 }
 0xcd2   :  { %v4999_v35 = vpop.eup %4998  ;;  %2862 = vrot.lane.b32.xlu1 %v4997_v20, %s5343_s22 }
 0xcd3   :  { %2962 = vrot.lane.b32.xlu0 %v4999_v35, %s5343_s22 }
 0xd44   :  { %v2863_v55 = vpop.permute.xlu1 %2862 }
 0xd45   :  { %v2963_v28 = vpop.permute.xlu0 %2962  ;;  %v2865_v7 = vmul.f32 %v4993_v25, %v2863_v55  ;;  %v4795_v25 = vpack.c.bf16 %v3891_v59, %v3890_v60 }
 0xd46   :  { %v2965_v2 = vmul.f32 %v4995_v8, %v2963_v28  ;;  %v3893_v8 = vld [vmem:[%s6735_s19 + $0x70] sm:$0xff]  ;;  %s5286_s19 = scalar_lea.vmem %s3793_s28, 32 }
 0xd47   :  { %3055 = vrot.lane.b32.xlu1 %v2865_v7, %s5344_s9  ;;  %v4798_v39 = vpack.c.bf16 %v3894_v22, %v3893_v8  ;;  %p5287_p6 = scmp.ne.s32.totalorder %s3793_s28, %s5286_s19  ;;  %p5292_p8 = scmp.lt.s32.totalorder %s5286_s19, %s5286_s19 }
 0xd48   :  { %2975 = vrot.lane.b32.xlu0 %v2965_v2, %s5344_s9 }
 0xd49   :  { %p5293_p9 = por %p5292_p8, %p5291_p7 }
 0xd4b   :  { %p5294_p10 = pnand %p5293_p9, %p5287_p6 }
 0xdb9   :  { %v3056_v34 = vpop.permute.xlu1 %3055 }
 0xdba   :  { %v2976_v1 = vpop.permute.xlu0 %2975 }
 0xdbb   :  { %4102 = vmatprep.mubr.msk.f32.mxu0 %vm913_vm2, %v2976_v1 }
 0xdbc   :  { %4103 = vmatmul.mubr.msk.f32.vlgmr.msra.gmra.mrb[28].mxu0 %vm913_vm2, %v6579_v24 }
 0xdbd   :  { %4771 = vmatpush3.bf16.msra.mxu0 %v4768_v3  ;;  %4113 = vmatprep.mubr.msk.f32.mxu0 %vm913_vm2, %v6577_v19  ;;  %v4783_v19 = vpack.c.bf16 %v3879_v45, %v3878_v49 }
 0xdbe   :  { %4773 = vmatprep.subr.bf16.mxu0 %v4772_v62 }
 0xdc1   :  { %4775 = vmatpush3.bf16.msra.mxu0 %v4772_v62 }
 0xdc4   :  { %4114 = vmatmul.mubr.msk.f32.vlgmr.msra.gmra.mrb[28].mxu0 %vm913_vm2, %v3056_v34 }
 0xe97   :  { %v4115_v16 = vpop.f32.mrb[28].mxu0 }
 0xe98   :  { %v3142_v42 = vadd.f32 %v4115_v16, %v3872_v26  ;;  %v3125_v0 = vpop.f32.mrb[29].mxu0 }
 0xe99   :  { %v3141_v41 = vadd.f32 %v3872_v26, %v3125_v0 }
 0xe9a   :  { %3145 = vst.msk [vmem:[#allocation2 + $0x8] sm:$0xff] %vm3143_vm6, %v3142_v42 }
 0xe9b   :  { %3144 = vst.msk [vmem:[#allocation2] sm:$0xff] %vm3143_vm6, %v3141_v41 }
 0xea2   :  { %v3154_v10 = vld [vmem:[#allocation2] ss:$8 sm:$0x3]  ;;  %v3232_v24 = vld [vmem:[#allocation2 + $0x1] ss:$8 sm:$0x3] }
 0xea3   :  { %4121 = vmatmul.mubr.msk.f32.vlgmr.msra.gmra.mrb[24].mxu1 %vm3143_vm6, %v3154_v10  ;;  %v3311_v44 = vld [vmem:[#allocation2 + $0x2] ss:$8 sm:$0x3]  ;;  %v3390_v29 = vld [vmem:[#allocation2 + $0x3] ss:$8 sm:$0x3] }
 0xea4   :  { %4781 = vmatpush3.bf16.msra.mxu1 %v4780_v47  ;;  %4127 = vmatprep.mubr.msk.f32.mxu1 %vm5345_vm5, %v6832_v6  ;;  %v3469_v32 = vld [vmem:[#allocation2 + $0x4] ss:$8 sm:$0x3]  ;;  %v3548_v9 = vld [vmem:[#allocation2 + $0x5] ss:$8 sm:$0x3] }
 0xea5   :  { %4782 = vmatprep.subr.bf16.mxu1 %v6815_v56  ;;  %v3627_v40 = vld [vmem:[#allocation2 + $0x6] ss:$8 sm:$0x3]  ;;  %v3706_v31 = vld [vmem:[#allocation2 + $0x7] ss:$8 sm:$0x3] }
 0xeab   :  { %4128 = vmatmul.mubr.msk.f32.vlgmr.msra.gmra.mrb[24].mxu1 %vm3143_vm6, %v3232_v24 }
 0xeac   :  { %4784 = vmatpush3.bf16.msra.mxu1 %v4783_v19  ;;  %4134 = vmatprep.mubr.msk.f32.mxu1 %vm5345_vm5, %v6832_v6 }
 0xead   :  { %4785 = vmatprep.subr.bf16.mxu1 %v6815_v56 }
 0xeb3   :  { %4135 = vmatmul.mubr.msk.f32.vlgmr.msra.gmra.mrb[24].mxu1 %vm3143_vm6, %v3311_v44 }
 0xeb4   :  { %4787 = vmatpush3.bf16.msra.mxu1 %v4786_v36  ;;  %4141 = vmatprep.mubr.msk.f32.mxu1 %vm5345_vm5, %v6832_v6 }
 0xeb5   :  { %4788 = vmatprep.subr.bf16.mxu1 %v6815_v56 }
 0xebb   :  { %4142 = vmatmul.mubr.msk.f32.vlgmr.msra.gmra.mrb[24].mxu1 %vm3143_vm6, %v3390_v29 }
 0xebc   :  { %4790 = vmatpush3.bf16.msra.mxu1 %v4789_v18  ;;  %4148 = vmatprep.mubr.msk.f32.mxu1 %vm5345_vm5, %v6832_v6 }
 0xebd   :  { %4791 = vmatprep.subr.bf16.mxu1 %v6815_v56 }
 0xec3   :  { %4149 = vmatmul.mubr.msk.f32.vlgmr.msra.gmra.mrb[24].mxu1 %vm3143_vm6, %v3469_v32 }
 0xec4   :  { %4793 = vmatpush3.bf16.msra.mxu1 %v4792_v43  ;;  %4155 = vmatprep.mubr.msk.f32.mxu1 %vm5345_vm5, %v6832_v6 }
 0xec5   :  { %4794 = vmatprep.subr.bf16.mxu1 %v6815_v56 }
 0xecb   :  { %4156 = vmatmul.mubr.msk.f32.vlgmr.msra.gmra.mrb[24].mxu1 %vm3143_vm6, %v3548_v9 }
 0xecc   :  { %4796 = vmatpush3.bf16.msra.mxu1 %v4795_v25  ;;  %4162 = vmatprep.mubr.msk.f32.mxu1 %vm5345_vm5, %v6832_v6 }
 0xecd   :  { %4797 = vmatprep.subr.bf16.mxu1 %v6815_v56  ;;  %v3873_v56 = vld [vmem:[#allocation23] ss:$0 sm:$0xff] }
 0xed3   :  { %4163 = vmatmul.mubr.msk.f32.vlgmr.msra.gmra.mrb[24].mxu1 %vm3143_vm6, %v3627_v40 }
 0xed4   :  { %4799 = vmatpush3.bf16.msra.mxu1 %v4798_v39  ;;  %4169 = vmatprep.mubr.msk.f32.mxu1 %vm5345_vm5, %v6832_v6 }
 0xedb   :  { %4170 = vmatmul.mubr.msk.f32.vlgmr.msra.gmra.mrb[24].mxu1 %vm3143_vm6, %v3706_v31 }
 0xfae   :  { %v3779_v51 = vpop.f32.mrb[24].mxu1 }
 0xfaf   :  { %v4820_v57 = vadd.f32 %v3873_v56, %v3779_v51  ;;  %v4171_v46 = vpop.f32.mrb[25].mxu1 }
 0xfb1   :  { %3785 = vst.msk [vmem:[#allocation24] sm:$0x3] %vm3784_vm7, %v4820_v57 }
 0xfb2   :  { %5297 = shalt.err (!%p5294_p10)
}
 0xfb3   :  { %s6896_s8 = sld [smem:[#allocation83_spill]] }
 0xfb9   :  { %s5298_s15 = scalar_lea.hbm %s6896_s8, 32 }
 0xfba   :  { %p5299_p11 = scmp.ne.s32.totalorder %s6896_s8, %s5298_s15  ;;  %p5302_p12 = scmp.lt.u32.totalorder %s5298_s15, %s6896_s8 }
 0xfbc   :  { %p5304_p13 = pnand %p5302_p12, %p5299_p11 }
 0xfbe   :  { %5307 = shalt.err (!%p5304_p13)
}
 0xfbf   :  { %3795 = dma.vmem_to_hbm [thread:$0]  %s3793_s28, 32, %s6896_s8, [#allocation5]  }
 0xfc0   :  { %5322 = dma.done.wait [#allocation5], 32  }
 0xfc1   :  { %5323 = vsyncadd [#allocation5], 4294967264 }
 0xfc2   :  { %3799 = vsyncpa [#allocation4], 1 }
 0xfc3   :  { %3800 = vsyncpa [#allocation7], 1 }
 0xfc4   :  { %3801 = vsyncpa [#allocation10], 1 }
 0xfc5   :  { %3802 = vsyncpa [#allocation13], 1 }
 0xfc6   :  { %3803 = vsyncpa [#allocation16], 1 }
 0xfc7   :  { %3804 = vsyncpa [#allocation19], 1 }
 0xfc8   :  { %3805 = vsyncpa [#allocation22], 1 }
 0xfc9   :  { %3806 = vsyncpa [#allocation5], 1 }

</bundles_post_ra>
